<compile_context>
chip_gen: v7x
topology: tpu7x:2x2x1
jax: 0.10.0
libtpu: 0.0.40
codegen_flags: <defaults>
</compile_context>

<pallas_src>
import functools

import jax
import jax.numpy as jnp
from jax.experimental import pallas as pl
from jax.experimental.pallas import tpu as pltpu


# ---------------------------------------------------------------------------
# Pallas kernel 1: point-wise linear over channels (channel-first layout)
#   out = maybe_relu(W @ x + b [+ add])
# ---------------------------------------------------------------------------
def _linear_kernel(x_ref, w_ref, b_ref, o_ref, *, apply_relu):
    y = jnp.dot(w_ref[...], x_ref[...], preferred_element_type=jnp.float32)
    y = y + b_ref[...]                       # (Cout, 1) broadcasts over lanes
    if apply_relu:
        y = jnp.maximum(y, 0.0)
    o_ref[...] = y.astype(o_ref.dtype)


def _linear_add_kernel(x_ref, w_ref, b_ref, add_ref, o_ref, *, apply_relu):
    y = jnp.dot(w_ref[...], x_ref[...], preferred_element_type=jnp.float32)
    y = y + b_ref[...] + add_ref[...]
    if apply_relu:
        y = jnp.maximum(y, 0.0)
    o_ref[...] = y.astype(o_ref.dtype)


def _pick_tile(N, Cin, Cout, has_add):
    """Column tile (multiple of 128): largest in 128..4096 whose double-buffered
    activation blocks fit ~10 MiB (safe for v5e's 16 MiB default scoped VMEM),
    preferring >=2 grid steps and an even step count (megacore balance)."""
    n_bufs = Cin + Cout + (Cout if has_add else 0)
    budget = 10 << 20
    cands = [c for c in (4096, 2048, 1024, 512, 256, 128)
             if 2 * n_bufs * c * 4 <= budget]
    if not cands:
        cands = [128]
    for c in cands:                              # prefer even >=2 grid steps
        steps = pl.cdiv(N, c)
        if steps >= 2 and steps % 2 == 0:
            return c
    for c in cands:                              # else any >=2 grid steps
        if pl.cdiv(N, c) >= 2:
            return c
    return cands[-1]


def linear_cf(x_cf, w, b, add=None, apply_relu=False):
    """x_cf: (Cin, N); w: (Cout, Cin); b: (Cout,); add: (Cout, N) or None."""
    Cin, N = x_cf.shape
    Cout = w.shape[0]
    tn = _pick_tile(N, Cin, Cout, add is not None)
    Np = pl.cdiv(N, tn) * tn
    if Np != N:                                  # pad (never a giant single block)
        pad = ((0, 0), (0, Np - N))
        x_cf = jnp.pad(x_cf, pad)
        if add is not None:
            add = jnp.pad(add, pad)

    x_spec = pl.BlockSpec((Cin, tn), lambda i: (0, i))
    w_spec = pl.BlockSpec((Cout, Cin), lambda i: (0, 0))
    b_spec = pl.BlockSpec((Cout, 1), lambda i: (0, 0))
    o_spec = pl.BlockSpec((Cout, tn), lambda i: (0, i))

    if add is None:
        kern = functools.partial(_linear_kernel, apply_relu=apply_relu)
        in_specs = [x_spec, w_spec, b_spec]
        args = (x_cf, w, b.reshape(Cout, 1))
    else:
        kern = functools.partial(_linear_add_kernel, apply_relu=apply_relu)
        in_specs = [x_spec, w_spec, b_spec, o_spec]
        args = (x_cf, w, b.reshape(Cout, 1), add)

    out = pl.pallas_call(
        kern,
        out_shape=jax.ShapeDtypeStruct((Cout, Np), jnp.float32),
        grid_spec=pltpu.PrefetchScalarGridSpec(
            num_scalar_prefetch=0,
            grid=(Np // tn,),
            in_specs=in_specs,
            out_specs=o_spec,
        ),
        compiler_params=pltpu.CompilerParams(dimension_semantics=("parallel",)),
    )(*args)
    return out[:, :N] if Np != N else out


# ---------------------------------------------------------------------------
# Pallas kernel 2: complex spectral channel mixing (lane dim = channels)
#   out[m, b, o] = sum_i x[m, b, i] * W[m, i, o]     (4-mult complex product)
# ---------------------------------------------------------------------------
def _spectral_kernel(x_ref, w_ref, o_ref):
    xr = x_ref[0, 0]      # (tm, B, Cin)
    xi = x_ref[1, 0]
    wr = w_ref[0, 0]      # (tm, Cin, Cout)
    wi = w_ref[1, 0]
    rr = jnp.einsum('mbi,mio->mbo', xr, wr, preferred_element_type=jnp.float32)
    ii = jnp.einsum('mbi,mio->mbo', xi, wi, preferred_element_type=jnp.float32)
    ri = jnp.einsum('mbi,mio->mbo', xr, wi, preferred_element_type=jnp.float32)
    ir = jnp.einsum('mbi,mio->mbo', xi, wr, preferred_element_type=jnp.float32)
    o_ref[0, 0] = rr - ii
    o_ref[1, 0] = ri + ir


def _roundup(a, b):
    return (a + b - 1) // b * b


def _pick_mode_tile(Mh, B, Cin, Cout):
    """Largest divisor of Mh whose padded per-step block set (x+w+out, counting
    (8,128) VMEM tile padding) stays under ~5 MiB (10 MiB double-buffered)."""
    per_mode = 4 * (2 * _roundup(B, 8) * _roundup(Cin, 128)       # x (ri pair)
                    + 2 * _roundup(Cin, 8) * _roundup(Cout, 128)  # w (ri pair)
                    + 2 * _roundup(B, 8) * _roundup(Cout, 128))   # out (ri pair)
    budget = 5 << 20
    tm = 1
    for cand in range(1, Mh + 1):
        if Mh % cand == 0 and cand * per_mode <= budget:
            tm = cand
    return tm


def spectral_mul(x_stack, w_stack):
    """x_stack: (2_ri, 2_half, Mh, B, Cin); w_stack: (2_ri, 2_half, Mh, Cin, Cout)
    -> (2_ri, 2_half, Mh, B, Cout)."""
    _, _, Mh, B, Cin = x_stack.shape
    Cout = w_stack.shape[-1]
    tm = _pick_mode_tile(Mh, B, Cin, Cout)

    x_spec = pl.BlockSpec((2, 1, tm, B, Cin), lambda h, m: (0, h, m, 0, 0))
    w_spec = pl.BlockSpec((2, 1, tm, Cin, Cout), lambda h, m: (0, h, m, 0, 0))
    o_spec = pl.BlockSpec((2, 1, tm, B, Cout), lambda h, m: (0, h, m, 0, 0))

    return pl.pallas_call(
        _spectral_kernel,
        out_shape=jax.ShapeDtypeStruct((2, 2, Mh, B, Cout), jnp.float32),
        grid_spec=pltpu.PrefetchScalarGridSpec(
            num_scalar_prefetch=0,
            grid=(2, Mh // tm),                 # (weight half, mode tile)
            in_specs=[x_spec, w_spec],
            out_specs=o_spec,
        ),
        compiler_params=pltpu.CompilerParams(
            dimension_semantics=("parallel", "arbitrary")),
    )(x_stack, w_stack)


# ---------------------------------------------------------------------------
# FourierLayer forward (FFT in plain JAX, channel mixing in Pallas)
# ---------------------------------------------------------------------------
def fourier_layer_cf(h_cf, w_stack, B, H, W, modes1, modes2):
    """h_cf: (C, N) f32; w_stack: (2_ri, 2_half, m1*m2, C, C) f32 -> (C, N)."""
    C = h_cf.shape[0]
    Wf = W // 2 + 1
    Mh = modes1 * modes2
    x = h_cf.reshape(C, B, H, W)
    x_ft = jnp.fft.rfft2(x, axes=(2, 3))                  # (C, B, H, Wf) c64

    top = x_ft[:, :, :modes1, :modes2]                    # (C, B, m1, m2)
    bot = x_ft[:, :, H - modes1:, :modes2]
    slab = jnp.stack([top, bot], axis=0)                  # (2, C, B, m1, m2)
    slab = jnp.transpose(slab, (0, 3, 4, 2, 1))           # (2, m1, m2, B, C)
    slab = slab.reshape(2, Mh, B, C)                      # channels on lanes
    x_stack = jnp.stack([jnp.real(slab), jnp.imag(slab)],
                        axis=0).astype(jnp.float32)       # (2, 2, Mh, B, C)

    out = spectral_mul(x_stack, w_stack)                  # (2, 2, Mh, B, C)
    oc = (out[0] + 1j * out[1]).astype(jnp.complex64)     # (2, Mh, B, C)
    oc = oc.reshape(2, modes1, modes2, B, C)
    oc = jnp.transpose(oc, (0, 4, 3, 1, 2))               # (2, C, B, m1, m2)

    # Assemble the retained-mode spectrum by pad + concat (no full zeros +
    # scatter): rows [0:m1] = half 0, rows [H-m1:H] = half 1, rest zero.
    pad_w = Wf - modes2
    top_b = jnp.pad(oc[0], ((0, 0), (0, 0), (0, 0), (0, pad_w)))
    bot_b = jnp.pad(oc[1], ((0, 0), (0, 0), (0, 0), (0, pad_w)))
    mid = jnp.zeros((C, B, H - 2 * modes1, Wf), jnp.complex64)
    out_ft = jnp.concatenate([top_b, mid, bot_b], axis=2)  # (C, B, H, Wf)

    y = jnp.fft.irfft2(out_ft, s=(H, W), axes=(2, 3))
    return y.reshape(C, B * H * W).astype(jnp.float32)


# ---------------------------------------------------------------------------
# Full FNO forward (BN=False)
# ---------------------------------------------------------------------------
def fno_forward(params, x, *, modes1, modes2, L):
    """x: (B, H, W, T_in) -> (B, H, W, d_u)."""
    B, H, W, T_in = x.shape
    N = B * H * W

    # get_grid: append normalized x/y coordinates; build directly channel-first
    x_cf = jnp.transpose(x, (3, 0, 1, 2)).reshape(T_in, N)
    gridx = jnp.broadcast_to(
        jnp.linspace(0.0, 1.0, H, dtype=jnp.float32).reshape(1, H, 1),
        (B, H, W)).reshape(1, N)
    gridy = jnp.broadcast_to(
        jnp.linspace(0.0, 1.0, W, dtype=jnp.float32).reshape(1, 1, W),
        (B, H, W)).reshape(1, N)
    a_cf = jnp.concatenate([x_cf, gridx, gridy], axis=0)      # (d_a, N)

    # lifting p
    h = linear_cf(a_cf, params['p_w'], params['p_b'])          # (d_v, N)

    # L Fourier blocks: h = act( Fourier(h) + W(h) )   (ReLU except last)
    for i in range(L):
        lp = params['layers'][i]
        x1 = fourier_layer_cf(h, lp['sw'], B, H, W, modes1, modes2)
        h = linear_cf(h, lp['w_w'], lp['w_b'], add=x1,
                      apply_relu=(i < L - 1))

    # projection q
    out = linear_cf(h, params['q_w'], params['q_b'])            # (d_u, N)
    d_u = params['q_w'].shape[0]
    return jnp.transpose(out.reshape(d_u, B, H, W), (1, 2, 3, 0))


# ---------------------------------------------------------------------------
# Deterministic parameter init (synthetic; shapes consistent with the module,
# stored in the channel-first / pre-stacked layouts the kernels consume)
# ---------------------------------------------------------------------------
def init_params(key, d_a, d_v, d_u, L, m1, m2):
    def lin_init(k, fan_in, fan_out):
        kw, kb = jax.random.split(k)
        bound = 1.0 / float(fan_in) ** 0.5
        w = jax.random.uniform(kw, (fan_out, fan_in), jnp.float32, -bound, bound)
        b = jax.random.uniform(kb, (fan_out,), jnp.float32, -bound, bound)
        return w, b

    keys = jax.random.split(key, 2 + L)
    params = {}
    params['p_w'], params['p_b'] = lin_init(keys[0], d_a, d_v)
    params['q_w'], params['q_b'] = lin_init(keys[1], d_v, d_u)

    layers = []
    std = (2.0 / (d_v * m1 * m2)) ** 0.5   # kaiming-ish for spectral weights
    for i in range(L):
        ks = jax.random.split(keys[2 + i], 2)
        lp = {
            # (ri, half, m1*m2, Cin, Cout): weights1 / weights2 pre-stacked
            'sw': std * jax.random.normal(ks[0], (2, 2, m1 * m2, d_v, d_v),
                                          jnp.float32),
        }
        lp['w_w'], lp['w_b'] = lin_init(ks[1], d_v, d_v)
        layers.append(lp)
    params['layers'] = layers
    return params


if __name__ == "__main__":
    # small shapes consistent with the module:
    # input (B, nx, ny, T_in); d_a = T_in + 2 (grid channels appended)
    B, H, W, T_in = 2, 16, 16, 8
    d_a, d_v, d_u = T_in + 2, 32, 1
    L, m1, m2 = 3, 4, 4          # m1 <= H//2, m2 <= W//2+1

    key = jax.random.PRNGKey(0)
    kx, kp = jax.random.split(key)
    x = jax.random.normal(kx, (B, H, W, T_in), jnp.float32)
    params = init_params(kp, d_a, d_v, d_u, L, m1, m2)

    fwd = jax.jit(functools.partial(fno_forward, modes1=m1, modes2=m2, L=L))
    out = fwd(params, x)
    jax.block_until_ready(out)

    assert out.shape == (B, H, W, d_u), out.shape
    assert out.dtype == jnp.float32
    print("KERNEL_OK")
</pallas_src>

<mosaic_0001>
module attributes {stable_mosaic.version = 11 : i64} {
  func.func @_linear_kernel(%arg0: i32, %arg1: memref<10x256xf32, #tpu.memory_space<vmem>>, %arg2: memref<32x10xf32, #tpu.memory_space<vmem>>, %arg3: memref<32x1xf32, #tpu.memory_space<vmem>>, %arg4: memref<32x256xf32, #tpu.memory_space<vmem>>) attributes {dimension_semantics = [#tpu.dimension_semantics<parallel>], iteration_bounds = array<i64: 2>, scalar_prefetch = 0 : i64, scratch_operands = 0 : i64, tpu.core_type = #tpu.core_type<tc>, window_params = [{transform_indices = @transform_0, window_bounds = array<i64: 10, 256>}, {pipeline_mode = #tpu.pipeline_mode<synchronous>, transform_indices = @transform_1, window_bounds = array<i64: 32, 10>}, {pipeline_mode = #tpu.pipeline_mode<synchronous>, transform_indices = @transform_2, window_bounds = array<i64: 32, 1>}, {transform_indices = @transform_3, window_bounds = array<i64: 32, 256>}]} {
    %c0 = arith.constant 0 : index
    %c0_0 = arith.constant 0 : index
    %0 = vector.load %arg2[%c0, %c0_0] : memref<32x10xf32, #tpu.memory_space<vmem>>, vector<32x10xf32>
    %c0_1 = arith.constant 0 : index
    %c0_2 = arith.constant 0 : index
    %1 = vector.load %arg1[%c0_1, %c0_2] : memref<10x256xf32, #tpu.memory_space<vmem>>, vector<10x256xf32>
    %cst = arith.constant dense<0.000000e+00> : vector<32x256xf32>
    %2 = tpu.matmul %0, %1, %cst {dimension_numbers = #tpu.dot_dimension_numbers<[1], [0], [0], [1], [0, 0, 1, 1], [], []>} : vector<32x10xf32>, vector<10x256xf32>, vector<32x256xf32> -> vector<32x256xf32>
    %c0_3 = arith.constant 0 : index
    %c0_4 = arith.constant 0 : index
    %3 = vector.load %arg3[%c0_3, %c0_4] : memref<32x1xf32, #tpu.memory_space<vmem>>, vector<32x1xf32>
    %4 = vector.broadcast %3 : vector<32x1xf32> to vector<32x256xf32>
    %5 = arith.addf %2, %4 : vector<32x256xf32>
    %c0_5 = arith.constant 0 : index
    %c0_6 = arith.constant 0 : index
    %6 = vector.load %arg4[%c0_5, %c0_6] : memref<32x256xf32, #tpu.memory_space<vmem>>, vector<32x256xf32>
    tpu.vector_store %arg4[%c0_5, %c0_6], %5 {strides = array<i32>} : memref<32x256xf32, #tpu.memory_space<vmem>>, vector<32x256xf32>,
    return
  }
  func.func @transform_0(%arg0: i32) -> (i32, i32) {
    %c0_i32 = arith.constant 0 : i32
    %c0_i32_0 = arith.constant 0 : i32
    return %c0_i32, %arg0 : i32, i32
  }
  func.func @transform_1(%arg0: i32) -> (i32, i32) {
    %c0_i32 = arith.constant 0 : i32
    %c0_i32_0 = arith.constant 0 : i32
    %c0_i32_1 = arith.constant 0 : i32
    return %c0_i32, %c0_i32_0 : i32, i32
  }
  func.func @transform_2(%arg0: i32) -> (i32, i32) {
    %c0_i32 = arith.constant 0 : i32
    %c0_i32_0 = arith.constant 0 : i32
    %c0_i32_1 = arith.constant 0 : i32
    return %c0_i32, %c0_i32_0 : i32, i32
  }
  func.func @transform_3(%arg0: i32) -> (i32, i32) {
    %c0_i32 = arith.constant 0 : i32
    %c0_i32_0 = arith.constant 0 : i32
    return %c0_i32, %arg0 : i32, i32
  }
}

module attributes {stable_mosaic.version = 11 : i64} {
  func.func @_spectral_kernel(%arg0: i32, %arg1: i32, %arg2: memref<2x1x16x2x32xf32, #tpu.memory_space<vmem>>, %arg3: memref<2x1x16x32x32xf32, #tpu.memory_space<vmem>>, %arg4: memref<2x1x16x2x32xf32, #tpu.memory_space<vmem>>) attributes {dimension_semantics = [#tpu.dimension_semantics<parallel>, #tpu.dimension_semantics<arbitrary>], iteration_bounds = array<i64: 2, 1>, scalar_prefetch = 0 : i64, scratch_operands = 0 : i64, tpu.core_type = #tpu.core_type<tc>, window_params = [{transform_indices = @transform_0, window_bounds = array<i64: 2, 1, 16, 2, 32>}, {transform_indices = @transform_1, window_bounds = array<i64: 2, 1, 16, 32, 32>}, {transform_indices = @transform_2, window_bounds = array<i64: 2, 1, 16, 2, 32>}]} {
    %c0 = arith.constant 0 : index
    %c0_0 = arith.constant 0 : index
    %c0_1 = arith.constant 0 : index
    %c0_2 = arith.constant 0 : index
    %c0_3 = arith.constant 0 : index
    %0 = vector.load %arg2[%c0, %c0_0, %c0_1, %c0_2, %c0_3] : memref<2x1x16x2x32xf32, #tpu.memory_space<vmem>>, vector<1x1x16x2x32xf32>
    %1 = vector.shape_cast %0 : vector<1x1x16x2x32xf32> to vector<16x2x32xf32>
    %c1 = arith.constant 1 : index
    %c0_4 = arith.constant 0 : index
    %c0_5 = arith.constant 0 : index
    %c0_6 = arith.constant 0 : index
    %c0_7 = arith.constant 0 : index
    %2 = vector.load %arg2[%c1, %c0_4, %c0_5, %c0_6, %c0_7] : memref<2x1x16x2x32xf32, #tpu.memory_space<vmem>>, vector<1x1x16x2x32xf32>
    %3 = vector.shape_cast %2 : vector<1x1x16x2x32xf32> to vector<16x2x32xf32>
    %c0_8 = arith.constant 0 : index
    %c0_9 = arith.constant 0 : index
    %c0_10 = arith.constant 0 : index
    %c0_11 = arith.constant 0 : index
    %c0_12 = arith.constant 0 : index
    %4 = vector.load %arg3[%c0_8, %c0_9, %c0_10, %c0_11, %c0_12] : memref<2x1x16x32x32xf32, #tpu.memory_space<vmem>>, vector<1x1x16x32x32xf32>
    %5 = vector.shape_cast %4 : vector<1x1x16x32x32xf32> to vector<16x32x32xf32>
    %c1_13 = arith.constant 1 : index
    %c0_14 = arith.constant 0 : index
    %c0_15 = arith.constant 0 : index
    %c0_16 = arith.constant 0 : index
    %c0_17 = arith.constant 0 : index
    %6 = vector.load %arg3[%c1_13, %c0_14, %c0_15, %c0_16, %c0_17] : memref<2x1x16x32x32xf32, #tpu.memory_space<vmem>>, vector<1x1x16x32x32xf32>
    %7 = vector.shape_cast %6 : vector<1x1x16x32x32xf32> to vector<16x32x32xf32>
    "tpu.trace_start"() <{level = 10 : i32, message = "mbi,mio->mbo"}> : () -> ()
    %cst = arith.constant dense<0.000000e+00> : vector<16x2x32xf32>
    %8 = tpu.matmul %1, %5, %cst {dimension_numbers = #tpu.dot_dimension_numbers<[2], [1], [1], [2], [0, 0, 0, 1, 1, 2], [0], [0]>} : vector<16x2x32xf32>, vector<16x32x32xf32>, vector<16x2x32xf32> -> vector<16x2x32xf32>
    %cst_18 = arith.constant dense<0.000000e+00> : vector<16x2x32xf32>
    %9 = tpu.matmul %3, %7, %cst_18 {dimension_numbers = #tpu.dot_dimension_numbers<[2], [1], [1], [2], [0, 0, 0, 1, 1, 2], [0], [0]>} : vector<16x2x32xf32>, vector<16x32x32xf32>, vector<16x2x32xf32> -> vector<16x2x32xf32>
    %cst_19 = arith.constant dense<0.000000e+00> : vector<16x2x32xf32>
    %10 = tpu.matmul %1, %7, %cst_19 {dimension_numbers = #tpu.dot_dimension_numbers<[2], [1], [1], [2], [0, 0, 0, 1, 1, 2], [0], [0]>} : vector<16x2x32xf32>, vector<16x32x32xf32>, vector<16x2x32xf32> -> vector<16x2x32xf32>
    %cst_20 = arith.constant dense<0.000000e+00> : vector<16x2x32xf32>
    %11 = tpu.matmul %3, %5, %cst_20 {dimension_numbers = #tpu.dot_dimension_numbers<[2], [1], [1], [2], [0, 0, 0, 1, 1, 2], [0], [0]>} : vector<16x2x32xf32>, vector<16x32x32xf32>, vector<16x2x32xf32> -> vector<16x2x32xf32>
    "tpu.trace_stop"() : () -> ()
    %12 = arith.subf %8, %9 : vector<16x2x32xf32>
    %c0_21 = arith.constant 0 : index
    %c0_22 = arith.constant 0 : index
    %c0_23 = arith.constant 0 : index
    %c0_24 = arith.constant 0 : index
    %c0_25 = arith.constant 0 : index
    %13 = vector.load %arg4[%c0_21, %c0_22, %c0_23, %c0_24, %c0_25] : memref<2x1x16x2x32xf32, #tpu.memory_space<vmem>>, vector<1x1x16x2x32xf32>
    %14 = vector.shape_cast %13 : vector<1x1x16x2x32xf32> to vector<16x2x32xf32>
    %15 = vector.shape_cast %12 : vector<16x2x32xf32> to vector<1x1x16x2x32xf32>
    tpu.vector_store %arg4[%c0_21, %c0_22, %c0_23, %c0_24, %c0_25], %15 {strides = array<i32>} : memref<2x1x16x2x32xf32, #tpu.memory_space<vmem>>, vector<1x1x16x2x32xf32>,
    %16 = arith.addf %10, %11 : vector<16x2x32xf32>
    %c1_26 = arith.constant 1 : index
    %c0_27 = arith.constant 0 : index
    %c0_28 = arith.constant 0 : index
    %c0_29 = arith.constant 0 : index
    %c0_30 = arith.constant 0 : index
    %17 = vector.load %arg4[%c1_26, %c0_27, %c0_28, %c0_29, %c0_30] : memref<2x1x16x2x32xf32, #tpu.memory_space<vmem>>, vector<1x1x16x2x32xf32>
    %18 = vector.shape_cast %17 : vector<1x1x16x2x32xf32> to vector<16x2x32xf32>
    %19 = vector.shape_cast %16 : vector<16x2x32xf32> to vector<1x1x16x2x32xf32>
    tpu.vector_store %arg4[%c1_26, %c0_27, %c0_28, %c0_29, %c0_30], %19 {strides = array<i32>} : memref<2x1x16x2x32xf32, #tpu.memory_space<vmem>>, vector<1x1x16x2x32xf32>,
    return
  }
  func.func @transform_0(%arg0: i32, %arg1: i32) -> (i32, i32, i32, i32, i32) {
    %c0_i32 = arith.constant 0 : i32
    %c0_i32_0 = arith.constant 0 : i32
    %c0_i32_1 = arith.constant 0 : i32
    %c0_i32_2 = arith.constant 0 : i32
    return %c0_i32, %arg0, %arg1, %c0_i32_0, %c0_i32_1 : i32, i32, i32, i32, i32
  }
  func.func @transform_1(%arg0: i32, %arg1: i32) -> (i32, i32, i32, i32, i32) {
    %c0_i32 = arith.constant 0 : i32
    %c0_i32_0 = arith.constant 0 : i32
    %c0_i32_1 = arith.constant 0 : i32
    %c0_i32_2 = arith.constant 0 : i32
    return %c0_i32, %arg0, %arg1, %c0_i32_0, %c0_i32_1 : i32, i32, i32, i32, i32
  }
  func.func @transform_2(%arg0: i32, %arg1: i32) -> (i32, i32, i32, i32, i32) {
    %c0_i32 = arith.constant 0 : i32
    %c0_i32_0 = arith.constant 0 : i32
    %c0_i32_1 = arith.constant 0 : i32
    %c0_i32_2 = arith.constant 0 : i32
    return %c0_i32, %arg0, %arg1, %c0_i32_0, %c0_i32_1 : i32, i32, i32, i32, i32
  }
}

module attributes {stable_mosaic.version = 11 : i64} {
  func.func @_linear_add_kernel(%arg0: i32, %arg1: memref<32x256xf32, #tpu.memory_space<vmem>>, %arg2: memref<32x32xf32, #tpu.memory_space<vmem>>, %arg3: memref<32x1xf32, #tpu.memory_space<vmem>>, %arg4: memref<32x256xf32, #tpu.memory_space<vmem>>, %arg5: memref<32x256xf32, #tpu.memory_space<vmem>>) attributes {dimension_semantics = [#tpu.dimension_semantics<parallel>], iteration_bounds = array<i64: 2>, scalar_prefetch = 0 : i64, scratch_operands = 0 : i64, tpu.core_type = #tpu.core_type<tc>, window_params = [{transform_indices = @transform_0, window_bounds = array<i64: 32, 256>}, {pipeline_mode = #tpu.pipeline_mode<synchronous>, transform_indices = @transform_1, window_bounds = array<i64: 32, 32>}, {pipeline_mode = #tpu.pipeline_mode<synchronous>, transform_indices = @transform_2, window_bounds = array<i64: 32, 1>}, {transform_indices = @transform_3, window_bounds = array<i64: 32, 256>}, {transform_indices = @transform_4, window_bounds = array<i64: 32, 256>}]} {
    %c0 = arith.constant 0 : index
    %c0_0 = arith.constant 0 : index
    %0 = vector.load %arg2[%c0, %c0_0] : memref<32x32xf32, #tpu.memory_space<vmem>>, vector<32x32xf32>
    %c0_1 = arith.constant 0 : index
    %c0_2 = arith.constant 0 : index
    %1 = vector.load %arg1[%c0_1, %c0_2] : memref<32x256xf32, #tpu.memory_space<vmem>>, vector<32x256xf32>
    %cst = arith.constant dense<0.000000e+00> : vector<32x256xf32>
    %2 = tpu.matmul %0, %1, %cst {dimension_numbers = #tpu.dot_dimension_numbers<[1], [0], [0], [1], [0, 0, 1, 1], [], []>} : vector<32x32xf32>, vector<32x256xf32>, vector<32x256xf32> -> vector<32x256xf32>
    %c0_3 = arith.constant 0 : index
    %c0_4 = arith.constant 0 : index
    %3 = vector.load %arg3[%c0_3, %c0_4] : memref<32x1xf32, #tpu.memory_space<vmem>>, vector<32x1xf32>
    %4 = vector.broadcast %3 : vector<32x1xf32> to vector<32x256xf32>
    %5 = arith.addf %2, %4 : vector<32x256xf32>
    %c0_5 = arith.constant 0 : index
    %c0_6 = arith.constant 0 : index
    %6 = vector.load %arg4[%c0_5, %c0_6] : memref<32x256xf32, #tpu.memory_space<vmem>>, vector<32x256xf32>
    %7 = arith.addf %5, %6 : vector<32x256xf32>
    %cst_7 = arith.constant 0.000000e+00 : f32
    %8 = vector.broadcast %cst_7 : f32 to vector<32x256xf32>
    %9 = arith.maximumf %7, %8 : vector<32x256xf32>
    %c0_8 = arith.constant 0 : index
    %c0_9 = arith.constant 0 : index
    %10 = vector.load %arg5[%c0_8, %c0_9] : memref<32x256xf32, #tpu.memory_space<vmem>>, vector<32x256xf32>
    tpu.vector_store %arg5[%c0_8, %c0_9], %9 {strides = array<i32>} : memref<32x256xf32, #tpu.memory_space<vmem>>, vector<32x256xf32>,
    return
  }
  func.func @transform_0(%arg0: i32) -> (i32, i32) {
    %c0_i32 = arith.constant 0 : i32
    %c0_i32_0 = arith.constant 0 : i32
    return %c0_i32, %arg0 : i32, i32
  }
  func.func @transform_1(%arg0: i32) -> (i32, i32) {
    %c0_i32 = arith.constant 0 : i32
    %c0_i32_0 = arith.constant 0 : i32
    %c0_i32_1 = arith.constant 0 : i32
    return %c0_i32, %c0_i32_0 : i32, i32
  }
  func.func @transform_2(%arg0: i32) -> (i32, i32) {
    %c0_i32 = arith.constant 0 : i32
    %c0_i32_0 = arith.constant 0 : i32
    %c0_i32_1 = arith.constant 0 : i32
    return %c0_i32, %c0_i32_0 : i32, i32
  }
  func.func @transform_3(%arg0: i32) -> (i32, i32) {
    %c0_i32 = arith.constant 0 : i32
    %c0_i32_0 = arith.constant 0 : i32
    return %c0_i32, %arg0 : i32, i32
  }
  func.func @transform_4(%arg0: i32) -> (i32, i32) {
    %c0_i32 = arith.constant 0 : i32
    %c0_i32_0 = arith.constant 0 : i32
    return %c0_i32, %arg0 : i32, i32
  }
}

module attributes {stable_mosaic.version = 11 : i64} {
  func.func @_linear_add_kernel(%arg0: i32, %arg1: memref<32x256xf32, #tpu.memory_space<vmem>>, %arg2: memref<32x32xf32, #tpu.memory_space<vmem>>, %arg3: memref<32x1xf32, #tpu.memory_space<vmem>>, %arg4: memref<32x256xf32, #tpu.memory_space<vmem>>, %arg5: memref<32x256xf32, #tpu.memory_space<vmem>>) attributes {dimension_semantics = [#tpu.dimension_semantics<parallel>], iteration_bounds = array<i64: 2>, scalar_prefetch = 0 : i64, scratch_operands = 0 : i64, tpu.core_type = #tpu.core_type<tc>, window_params = [{transform_indices = @transform_0, window_bounds = array<i64: 32, 256>}, {pipeline_mode = #tpu.pipeline_mode<synchronous>, transform_indices = @transform_1, window_bounds = array<i64: 32, 32>}, {pipeline_mode = #tpu.pipeline_mode<synchronous>, transform_indices = @transform_2, window_bounds = array<i64: 32, 1>}, {transform_indices = @transform_3, window_bounds = array<i64: 32, 256>}, {transform_indices = @transform_4, window_bounds = array<i64: 32, 256>}]} {
    %c0 = arith.constant 0 : index
    %c0_0 = arith.constant 0 : index
    %0 = vector.load %arg2[%c0, %c0_0] : memref<32x32xf32, #tpu.memory_space<vmem>>, vector<32x32xf32>
    %c0_1 = arith.constant 0 : index
    %c0_2 = arith.constant 0 : index
    %1 = vector.load %arg1[%c0_1, %c0_2] : memref<32x256xf32, #tpu.memory_space<vmem>>, vector<32x256xf32>
    %cst = arith.constant dense<0.000000e+00> : vector<32x256xf32>
    %2 = tpu.matmul %0, %1, %cst {dimension_numbers = #tpu.dot_dimension_numbers<[1], [0], [0], [1], [0, 0, 1, 1], [], []>} : vector<32x32xf32>, vector<32x256xf32>, vector<32x256xf32> -> vector<32x256xf32>
    %c0_3 = arith.constant 0 : index
    %c0_4 = arith.constant 0 : index
    %3 = vector.load %arg3[%c0_3, %c0_4] : memref<32x1xf32, #tpu.memory_space<vmem>>, vector<32x1xf32>
    %4 = vector.broadcast %3 : vector<32x1xf32> to vector<32x256xf32>
    %5 = arith.addf %2, %4 : vector<32x256xf32>
    %c0_5 = arith.constant 0 : index
    %c0_6 = arith.constant 0 : index
    %6 = vector.load %arg4[%c0_5, %c0_6] : memref<32x256xf32, #tpu.memory_space<vmem>>, vector<32x256xf32>
    %7 = arith.addf %5, %6 : vector<32x256xf32>
    %c0_7 = arith.constant 0 : index
    %c0_8 = arith.constant 0 : index
    %8 = vector.load %arg5[%c0_7, %c0_8] : memref<32x256xf32, #tpu.memory_space<vmem>>, vector<32x256xf32>
    tpu.vector_store %arg5[%c0_7, %c0_8], %7 {strides = array<i32>} : memref<32x256xf32, #tpu.memory_space<vmem>>, vector<32x256xf32>,
    return
  }
  func.func @transform_0(%arg0: i32) -> (i32, i32) {
    %c0_i32 = arith.constant 0 : i32
    %c0_i32_0 = arith.constant 0 : i32
    return %c0_i32, %arg0 : i32, i32
  }
  func.func @transform_1(%arg0: i32) -> (i32, i32) {
    %c0_i32 = arith.constant 0 : i32
    %c0_i32_0 = arith.constant 0 : i32
    %c0_i32_1 = arith.constant 0 : i32
    return %c0_i32, %c0_i32_0 : i32, i32
  }
  func.func @transform_2(%arg0: i32) -> (i32, i32) {
    %c0_i32 = arith.constant 0 : i32
    %c0_i32_0 = arith.constant 0 : i32
    %c0_i32_1 = arith.constant 0 : i32
    return %c0_i32, %c0_i32_0 : i32, i32
  }
  func.func @transform_3(%arg0: i32) -> (i32, i32) {
    %c0_i32 = arith.constant 0 : i32
    %c0_i32_0 = arith.constant 0 : i32
    return %c0_i32, %arg0 : i32, i32
  }
  func.func @transform_4(%arg0: i32) -> (i32, i32) {
    %c0_i32 = arith.constant 0 : i32
    %c0_i32_0 = arith.constant 0 : i32
    return %c0_i32, %arg0 : i32, i32
  }
}

module attributes {stable_mosaic.version = 11 : i64} {
  func.func @_linear_kernel(%arg0: i32, %arg1: memref<32x256xf32, #tpu.memory_space<vmem>>, %arg2: memref<1x32xf32, #tpu.memory_space<vmem>>, %arg3: memref<1x1xf32, #tpu.memory_space<vmem>>, %arg4: memref<1x256xf32, #tpu.memory_space<vmem>>) attributes {dimension_semantics = [#tpu.dimension_semantics<parallel>], iteration_bounds = array<i64: 2>, scalar_prefetch = 0 : i64, scratch_operands = 0 : i64, tpu.core_type = #tpu.core_type<tc>, window_params = [{transform_indices = @transform_0, window_bounds = array<i64: 32, 256>}, {pipeline_mode = #tpu.pipeline_mode<synchronous>, transform_indices = @transform_1, window_bounds = array<i64: 1, 32>}, {pipeline_mode = #tpu.pipeline_mode<synchronous>, transform_indices = @transform_2, window_bounds = array<i64: 1, 1>}, {transform_indices = @transform_3, window_bounds = array<i64: 1, 256>}]} {
    %c0 = arith.constant 0 : index
    %c0_0 = arith.constant 0 : index
    %0 = vector.load %arg2[%c0, %c0_0] : memref<1x32xf32, #tpu.memory_space<vmem>>, vector<1x32xf32>
    %c0_1 = arith.constant 0 : index
    %c0_2 = arith.constant 0 : index
    %1 = vector.load %arg1[%c0_1, %c0_2] : memref<32x256xf32, #tpu.memory_space<vmem>>, vector<32x256xf32>
    %cst = arith.constant dense<0.000000e+00> : vector<1x256xf32>
    %2 = tpu.matmul %0, %1, %cst {dimension_numbers = #tpu.dot_dimension_numbers<[1], [0], [0], [1], [0, 0, 1, 1], [], []>} : vector<1x32xf32>, vector<32x256xf32>, vector<1x256xf32> -> vector<1x256xf32>
    %c0_3 = arith.constant 0 : index
    %c0_4 = arith.constant 0 : index
    %3 = vector.load %arg3[%c0_3, %c0_4] : memref<1x1xf32, #tpu.memory_space<vmem>>, vector<1x1xf32>
    %4 = vector.broadcast %3 : vector<1x1xf32> to vector<1x256xf32>
    %5 = arith.addf %2, %4 : vector<1x256xf32>
    %c0_5 = arith.constant 0 : index
    %c0_6 = arith.constant 0 : index
    %6 = vector.load %arg4[%c0_5, %c0_6] : memref<1x256xf32, #tpu.memory_space<vmem>>, vector<1x256xf32>
    tpu.vector_store %arg4[%c0_5, %c0_6], %5 {strides = array<i32>} : memref<1x256xf32, #tpu.memory_space<vmem>>, vector<1x256xf32>,
    return
  }
  func.func @transform_0(%arg0: i32) -> (i32, i32) {
    %c0_i32 = arith.constant 0 : i32
    %c0_i32_0 = arith.constant 0 : i32
    return %c0_i32, %arg0 : i32, i32
  }
  func.func @transform_1(%arg0: i32) -> (i32, i32) {
    %c0_i32 = arith.constant 0 : i32
    %c0_i32_0 = arith.constant 0 : i32
    %c0_i32_1 = arith.constant 0 : i32
    return %c0_i32, %c0_i32_0 : i32, i32
  }
  func.func @transform_2(%arg0: i32) -> (i32, i32) {
    %c0_i32 = arith.constant 0 : i32
    %c0_i32_0 = arith.constant 0 : i32
    %c0_i32_1 = arith.constant 0 : i32
    return %c0_i32, %c0_i32_0 : i32, i32
  }
  func.func @transform_3(%arg0: i32) -> (i32, i32) {
    %c0_i32 = arith.constant 0 : i32
    %c0_i32_0 = arith.constant 0 : i32
    return %c0_i32, %arg0 : i32, i32
  }
}

</mosaic_0001>

<bundles_post_ra>
// kernel: fno_forward.8
= control target key start
LH: loop header
LB: loop body
LE: loop exit
PB: predicated region body
PF: predicated region fallthrough
CT: control target
= control target key end

     0   :  { %s546_s12 = smov 0   ;;  %s548_s13 = smov 0   ;;  %s664_s0 = inlined_call_operand.vmem [shape: f32[10,512], index: 0, kind: input, shape index: {}]   ;;  %s665_s1 = inlined_call_operand.vmem [shape: f32[32,10], index: 1, kind: input, shape index: {}]   ;;  %s666_s2 = inlined_call_operand.vmem [shape: f32[32,1], index: 2, kind: input, shape index: {}]   ;;  %s667_s3 = inlined_call_operand.vmem [shape: f32[32,512], index: 3, kind: output, shape index: {}]  }
   0x1   :  { %s550_s14 = smov 0  }
   0x2 LB: > { %s439_s15 = sadd.s32 4294967295, %s521_s14   ;;  %s563_s16 = sadd.s32 1, %s521_s14   ;;  %s521_s14 = sphi %s550_s14, %s673_s14   ;;  %s517_s13 = sphi %s548_s13, %s672_s13   ;;  %s513_s12 = sphi %s546_s12, %s671_s12  }
   0x3   : > { %s17_s17 = ssub.s32 %s521_s14, %s563_s16  ;;  %s20_s18 = sadd.s32 1, %s517_s13 }
   0x4   : > { %p18_p0 = scmp.eq.s32.totalorder %s17_s17, 0  ;;  %p27_p1 = scmp.ne.s32.totalorder %s517_s13, %s513_s12 }
   0x5   : > { %p28_p2 = scmp.eq.s32.totalorder %s521_s14, 0  ;;  %p99_p3 = scmp.eq.s32.totalorder %s439_s15, 1 }
   0x6   : > { %s574_s19 = scalar_select %p18_p0, %s517_s13, %s20_s18  }
   0x7   : > { %p29_p4 = por %p28_p2, %p27_p1  ;;  %p576_p5 = por %p99_p3, %p27_p1 }
   0x8   : > { %p442_p6 = scmp.ge.s32.totalorder %s521_s14, 2 }
   0xa   : > { %127 = sbr.rel (%p442_p6) target bundleno = 24 (0x18), region = 24 }
  0x11   : > { %130 = sbr.rel (!%p29_p4) target bundleno = 24 (0x18), region = 28  ;;  %s132_s21 = sand.u32 (%p29_p4), 1, %s517_s13  }
  0x12   : > { %s460_s22 = sshll.u32 (%p29_p4), %s521_s14, 4  ;;  %s443_s23 = sshll.u32 (%p29_p4), %s132_s21, 5 }
  0x13   : > { %s137_s26 = scalar_lea.vmem (%p29_p4), %s664_s0, %s460_s22  ;;  %s134_s27 = scalar_lea.vmem (%p29_p4), [#allocation2], %s443_s23 }
  0x14   : > { %v150_v0 = vld [vmem:[%s137_s26] sm:$0xff] (%p29_p4)  ;;  %v152_v1 = vld [vmem:[%s137_s26 + $0x8] sm:$0xff] (%p29_p4) }
  0x15   : > { %v154_v2 = vld [vmem:[%s137_s26 + $0x20] sm:$0xff] (%p29_p4)  ;;  %151 = vst [vmem:[%s134_s27] sm:$0xff] (%p29_p4), %v150_v0  ;;  %153 = vst [vmem:[%s134_s27 + $0x8] sm:$0xff] (%p29_p4), %v152_v1  ;;  %v156_v3 = vld [vmem:[%s137_s26 + $0x28] sm:$0xff] (%p29_p4) }
  0x16   : > { %155 = vst [vmem:[%s134_s27 + $0x10] sm:$0xff] (%p29_p4), %v154_v2  ;;  %157 = vst [vmem:[%s134_s27 + $0x18] sm:$0xff] (%p29_p4), %v156_v3 }
  0x18 PF: > { %p446_p7 = scmp.ge.s32.totalorder %s521_s14, 1  ;;  %p162_p8 = scmp.lt.s32.totalorder %s521_s14, 3 }
  0x1a   : > { %p163_p9 = pnand %p446_p7, %p162_p8 }
  0x1b   : > { %s169_s28 = sand.u32 (!%p163_p9), 1, %s513_s12   ;;  %vm238_vm0 = vcmask (!%p163_p9), 1041408   ;;  %v523_v4 = vmov (!%p163_p9), 0.0   ;;  %vm524_vm1 = vmmov (!%p163_p9), 1   ;;  %v525_v6 = vmov (!%p163_p9), 0   ;;  %v203_v7 = vld [vmem:[%s666_s2 + $0x10] sm:$0xff] (!%p163_p9) }
  0x1c   : > { %166 = sbr.rel (%p163_p9) target bundleno = 266 (0x10a), region = 51  ;;  %s447_s29 = sshll.u32 (!%p163_p9), %s169_s28, 5  ;;  %309 = vmatprep.mubr.f32.mxu0 (!%p163_p9), %v523_v4  ;;  %321 = vmatprep.mubr.f32.mxu1 (!%p163_p9), %v523_v4  ;;  %vm591_vm2 = vmpackc.low (!%p163_p9), %vm238_vm0, %vm524_vm1  ;;  %v201_v8 = vld [vmem:[%s666_s2] sm:$0xff] (!%p163_p9)  ;;  %v204_v15 = vld [vmem:[%s666_s2 + $0x18] sm:$0xff] (!%p163_p9)  ;;  %vm225_vm3 = vcmask (!%p163_p9), 80896  }
  0x1d   : > { %498 = vset.pattern.permute.xlu1 (!%p163_p9), %v525_v6  ;;  %497 = vset.pattern.permute.xlu0 (!%p163_p9), %v525_v6  ;;  %s171_s7 = scalar_lea.vmem (!%p163_p9), [#allocation2], %s447_s29  ;;  %v202_v16 = vld [vmem:[%s666_s2 + $0x8] sm:$0xff] (!%p163_p9)  ;;  %v193_v17 = vld [vmem:[%s665_s1] sm:$0xff] (!%p163_p9)  ;;  %v195_v18 = vld [vmem:[%s665_s1 + $0x10] sm:$0xff] (!%p163_p9)  ;;  %s448_s27 = sshll.u32 (!%p163_p9), %s169_s28, 6 }
  0x1e   : > { %v198_v9 = vld [vmem:[%s171_s7 + $0x8] sm:$0xff] (!%p163_p9)  ;;  %v200_v10 = vld [vmem:[%s171_s7 + $0x18] sm:$0x3] (!%p163_p9)  ;;  %v197_v11 = vld [vmem:[%s171_s7] sm:$0xff] (!%p163_p9)  ;;  %217 = vperm.xlu1 (!%p163_p9), %498, %v203_v7   ;;  %207 = vperm.xlu0 (!%p163_p9), %497, %v201_v8   ;;  %s629_s29 = scalar_lea.vmem (!%p163_p9), [#allocation3], %s448_s27 }
  0x1f   : > { %v462_v12 = vpack.c.bf16 (!%p163_p9), %v200_v10, %v198_v9  ;;  %v199_v13 = vld [vmem:[%s171_s7 + $0x10] sm:$0x3] (!%p163_p9)  ;;  %v194_v19 = vld [vmem:[%s665_s1 + $0x8] sm:$0xff] (!%p163_p9)  ;;  %v196_v20 = vld [vmem:[%s665_s1 + $0x18] sm:$0xff] (!%p163_p9) }
  0x20   : > { %v465_v14 = vpack.c.bf16 (!%p163_p9), %v199_v13, %v197_v11 }
  0x21   : > { %464 = vmatprep.subr.msk.bf16.mxu0 (!%p163_p9), %vm591_vm2, %v462_v12  ;;  %468 = vmatprep.subr.msk.bf16.mxu1 (!%p163_p9), %vm591_vm2, %v462_v12 }
  0x22   : > { %467 = vmatpush1.bf16.msk.msra.mxu0 (!%p163_p9), %vm591_vm2, %v465_v14  ;;  %469 = vmatpush1.bf16.msk.msra.mxu1 (!%p163_p9), %vm591_vm2, %v465_v14 }
  0x23   : > { %222 = vperm.xlu1 %498, %v204_v15   ;;  %212 = vperm.xlu0 %497, %v202_v16   ;;  %s461_s12 = sshll.u32 (%p576_p5), %s439_s15, 4 }
  0x24   : > { %s351_s4 = scalar_lea.vmem (%p576_p5), %s667_s3, %s461_s12 }
  0x25   : > { %451 = vmatmul.mubr.msk.f32.vlgmr.msra.gmra.mrb[0].mxu0 %vm225_vm3, %v193_v17  ;;  %453 = vmatmul.mubr.msk.f32.vlgmr.msra.gmra.mrb[0].mxu1 %vm225_vm3, %v195_v18 }
  0x26   : > { %315 = vmatprep.mubr.f32.mxu0 %v523_v4  ;;  %327 = vmatprep.mubr.f32.mxu1 %v523_v4 }
  0x29   : > { %452 = vmatmul.mubr.msk.f32.gmra.mrb[2].mxu0 %vm225_vm3, %v194_v19  ;;  %454 = vmatmul.mubr.msk.f32.gmra.mrb[2].mxu1 %vm225_vm3, %v196_v20 }
  0x9d   : > { %v218_v21 = vpop.permute.xlu1 %217  ;;  %v208_v22 = vpop.permute.xlu0 %207 }
  0xa2   : > { %v223_v31 = vpop.permute.xlu1 %222  ;;  %v213_v32 = vpop.permute.xlu0 %212 }
  0xf8   : > { %v311_v23 = vpop.f32.mrb[0].mxu0  ;;  %v323_v24 = vpop.f32.mrb[0].mxu1 }
  0xf9   : > { %v312_v25 = vadd.f32 %v311_v23, %v208_v22  ;;  %v324_v26 = vadd.f32 %v323_v24, %v218_v21  ;;  %v313_v27 = vpop.f32.mrb[1].mxu0  ;;  %v325_v28 = vpop.f32.mrb[1].mxu1 }
  0xfa   : > { %v314_v29 = vadd.f32 %v313_v27, %v208_v22  ;;  %v326_v30 = vadd.f32 %v325_v28, %v218_v21  ;;  %348 = sbr.rel (!%p576_p5) target bundleno = 266 (0x10a), region = 59 }
  0xfb   : > { %334 = vst [vmem:[%s629_s29] sm:$0xff] %v312_v25  ;;  %338 = vst [vmem:[%s629_s29 + $0x20] sm:$0xff] %v324_v26 }
  0xfc   : > { %335 = vst [vmem:[%s629_s29 + $0x8] sm:$0xff] %v314_v29  ;;  %339 = vst [vmem:[%s629_s29 + $0x28] sm:$0xff] %v326_v30  ;;  %v317_v33 = vpop.f32.mrb[2].mxu0  ;;  %v329_v34 = vpop.f32.mrb[2].mxu1 }
  0xfd   : > { %v318_v35 = vadd.f32 %v317_v33, %v213_v32  ;;  %v330_v36 = vadd.f32 %v329_v34, %v223_v31  ;;  %v319_v37 = vpop.f32.mrb[3].mxu0  ;;  %v331_v38 = vpop.f32.mrb[3].mxu1 }
  0xfe   : > { %v320_v39 = vadd.f32 %v319_v37, %v213_v32  ;;  %v332_v40 = vadd.f32 %v331_v38, %v223_v31 }
  0xff   : > { %336 = vst [vmem:[%s629_s29 + $0x10] sm:$0xff] %v318_v35  ;;  %340 = vst [vmem:[%s629_s29 + $0x30] sm:$0xff] %v330_v36 }
 0x100   : > { %337 = vst [vmem:[%s629_s29 + $0x18] sm:$0xff] %v320_v39  ;;  %341 = vst [vmem:[%s629_s29 + $0x38] sm:$0xff] %v332_v40 }
 0x102   : > { %v364_v41 = vld [vmem:[%s629_s29] sm:$0xff] }
 0x103   : > { %v366_v42 = vld [vmem:[%s629_s29 + $0x8] sm:$0xff]  ;;  %v372_v45 = vld [vmem:[%s629_s29 + $0x20] sm:$0xff]  ;;  %365 = vst [vmem:[%s351_s4] sm:$0xff] %v364_v41 }
 0x104   : > { %v374_v46 = vld [vmem:[%s629_s29 + $0x28] sm:$0xff]  ;;  %367 = vst [vmem:[%s351_s4 + $0x8] sm:$0xff] %v366_v42  ;;  %373 = vst [vmem:[%s351_s4 + $0x40] sm:$0xff] %v372_v45 }
 0x105   : > { %375 = vst [vmem:[%s351_s4 + $0x48] sm:$0xff] %v374_v46 }
 0x106   : > { %v368_v43 = vld [vmem:[%s629_s29 + $0x10] sm:$0xff] }
 0x107   : > { %v370_v44 = vld [vmem:[%s629_s29 + $0x18] sm:$0xff]  ;;  %369 = vst [vmem:[%s351_s4 + $0x20] sm:$0xff] %v368_v43  ;;  %v376_v47 = vld [vmem:[%s629_s29 + $0x30] sm:$0xff] }
 0x108   : > { %371 = vst [vmem:[%s351_s4 + $0x28] sm:$0xff] %v370_v44  ;;  %v378_v48 = vld [vmem:[%s629_s29 + $0x38] sm:$0xff]  ;;  %377 = vst [vmem:[%s351_s4 + $0x60] sm:$0xff] %v376_v47 }
 0x109   : > { %379 = vst [vmem:[%s351_s4 + $0x68] sm:$0xff] %v378_v48 }
 0x10a PF: > { %p10_p10 = scmp.ge.s32.totalorder %s563_s16, 4   ;;  %s671_s12 = smov %s517_s13 }
 0x10b   : > { %s672_s13 = smov %s574_s19  ;;  %s673_s14 = smov %s563_s16 }
 0x10c   :  { %12 = sbr.rel (!%p10_p10) target bundleno = 2 (0x2), region = 113 }

// kernel: reverse.6
= control target key start
LH: loop header
LB: loop body
LE: loop exit
PB: predicated region body
PF: predicated region fallthrough
CT: control target
= control target key end

     0   :  { %s344_s0 = inlined_call_operand.vmem [shape: f32[32,2,16,7], index: 0, kind: input, shape index: {}]   ;;  %s345_s1 = inlined_call_operand.vmem [shape: f32[32,2,16,7], index: 1, kind: output, shape index: {}]  }
   0x1   :  { %v112_v0 = vld [vmem:[%s344_s0 + $0x60] sm:$0xff]  ;;  %v113_v1 = vld [vmem:[%s344_s0 + $0xd0] sm:$0xff]  ;;  %v138_v14 = vld [vmem:[%s344_s0 + $0x68] sm:$0xff] }
   0x2   :  { %v115_v2 = vld [vmem:[%s344_s0 + $0x50] sm:$0xff]  ;;  %4 = vst [vmem:[%s345_s1] sm:$0xff] %v112_v0  ;;  %114 = vst [vmem:[%s345_s1 + $0x70] sm:$0xff] %v113_v1  ;;  %v117_v3 = vld [vmem:[%s344_s0 + $0xc0] sm:$0xff] }
   0x3   :  { %116 = vst [vmem:[%s345_s1 + $0x10] sm:$0xff] %v115_v2  ;;  %v119_v4 = vld [vmem:[%s344_s0 + $0x40] sm:$0xff]  ;;  %v121_v5 = vld [vmem:[%s344_s0 + $0xb0] sm:$0xff]  ;;  %118 = vst [vmem:[%s345_s1 + $0x80] sm:$0xff] %v117_v3 }
   0x4   :  { %120 = vst [vmem:[%s345_s1 + $0x20] sm:$0xff] %v119_v4  ;;  %122 = vst [vmem:[%s345_s1 + $0x90] sm:$0xff] %v121_v5  ;;  %v123_v6 = vld [vmem:[%s344_s0 + $0x30] sm:$0xff]  ;;  %v125_v7 = vld [vmem:[%s344_s0 + $0xa0] sm:$0xff] }
   0x5   :  { %v127_v8 = vld [vmem:[%s344_s0 + $0x20] sm:$0xff]  ;;  %124 = vst [vmem:[%s345_s1 + $0x30] sm:$0xff] %v123_v6  ;;  %126 = vst [vmem:[%s345_s1 + $0xa0] sm:$0xff] %v125_v7  ;;  %v129_v9 = vld [vmem:[%s344_s0 + $0x90] sm:$0xff] }
   0x6   :  { %128 = vst [vmem:[%s345_s1 + $0x40] sm:$0xff] %v127_v8  ;;  %v131_v10 = vld [vmem:[%s344_s0 + $0x10] sm:$0xff]  ;;  %v133_v11 = vld [vmem:[%s344_s0 + $0x80] sm:$0xff]  ;;  %130 = vst [vmem:[%s345_s1 + $0xb0] sm:$0xff] %v129_v9 }
   0x7   :  { %132 = vst [vmem:[%s345_s1 + $0x50] sm:$0xff] %v131_v10  ;;  %134 = vst [vmem:[%s345_s1 + $0xc0] sm:$0xff] %v133_v11  ;;  %v49_v12 = vld [vmem:[%s344_s0] sm:$0xff]  ;;  %v136_v13 = vld [vmem:[%s344_s0 + $0x70] sm:$0xff] }
   0x8   :  { %135 = vst [vmem:[%s345_s1 + $0x60] sm:$0xff] %v49_v12  ;;  %137 = vst [vmem:[%s345_s1 + $0xd0] sm:$0xff] %v136_v13  ;;  %v140_v15 = vld [vmem:[%s344_s0 + $0xd8] sm:$0xff]  ;;  %v144_v17 = vld [vmem:[%s344_s0 + $0xc8] sm:$0xff] }
   0x9   :  { %139 = vst [vmem:[%s345_s1 + $0x8] sm:$0xff] %v138_v14  ;;  %v142_v16 = vld [vmem:[%s344_s0 + $0x58] sm:$0xff]  ;;  %141 = vst [vmem:[%s345_s1 + $0x78] sm:$0xff] %v140_v15  ;;  %v146_v18 = vld [vmem:[%s344_s0 + $0x48] sm:$0xff] }
   0xa   :  { %143 = vst [vmem:[%s345_s1 + $0x18] sm:$0xff] %v142_v16  ;;  %145 = vst [vmem:[%s345_s1 + $0x88] sm:$0xff] %v144_v17  ;;  %v148_v19 = vld [vmem:[%s344_s0 + $0xb8] sm:$0xff]  ;;  %v152_v21 = vld [vmem:[%s344_s0 + $0xa8] sm:$0xff] }
   0xb   :  { %v150_v20 = vld [vmem:[%s344_s0 + $0x38] sm:$0xff]  ;;  %147 = vst [vmem:[%s345_s1 + $0x28] sm:$0xff] %v146_v18  ;;  %149 = vst [vmem:[%s345_s1 + $0x98] sm:$0xff] %v148_v19  ;;  %v154_v22 = vld [vmem:[%s344_s0 + $0x28] sm:$0xff] }
   0xc   :  { %151 = vst [vmem:[%s345_s1 + $0x38] sm:$0xff] %v150_v20  ;;  %v156_v23 = vld [vmem:[%s344_s0 + $0x98] sm:$0xff]  ;;  %153 = vst [vmem:[%s345_s1 + $0xa8] sm:$0xff] %v152_v21  ;;  %v160_v25 = vld [vmem:[%s344_s0 + $0x88] sm:$0xff] }
   0xd   :  { %155 = vst [vmem:[%s345_s1 + $0x48] sm:$0xff] %v154_v22  ;;  %157 = vst [vmem:[%s345_s1 + $0xb8] sm:$0xff] %v156_v23  ;;  %v158_v24 = vld [vmem:[%s344_s0 + $0x18] sm:$0xff]  ;;  %v162_v26 = vld [vmem:[%s344_s0 + $0x8] sm:$0xff] }
   0xe   :  { %159 = vst [vmem:[%s345_s1 + $0x58] sm:$0xff] %v158_v24  ;;  %161 = vst [vmem:[%s345_s1 + $0xc8] sm:$0xff] %v160_v25  ;;  %v164_v27 = vld [vmem:[%s344_s0 + $0x78] sm:$0xff] }
   0xf   :  { %163 = vst [vmem:[%s345_s1 + $0x68] sm:$0xff] %v162_v26  ;;  %165 = vst [vmem:[%s345_s1 + $0xd8] sm:$0xff] %v164_v27 }

// kernel: fno_forward.9
= control target key start
LH: loop header
LB: loop body
LE: loop exit
PB: predicated region body
PF: predicated region fallthrough
CT: control target
= control target key end

     0   :  { %s7672_s9 = smov 0   ;;  %s7674_s10 = smov 0   ;;  %s9002_s0 = inlined_call_operand.vmem [shape: f32[2,2,16,2,32], index: 0, kind: input, shape index: {}]   ;;  %s9003_s1 = inlined_call_operand.vmem [shape: f32[2,2,16,32,32], index: 1, kind: input, shape index: {}]   ;;  %s9004_s2 = inlined_call_operand.vmem [shape: f32[2,2,16,2,32], index: 2, kind: output, shape index: {}]  }
   0x1   :  { %s7676_s11 = smov 0   ;;  %s7678_s12 = smov 0  }
   0x2   :  { %s7680_s13 = smov 0  }
   0x3 LB: > { %s24_s14 = sadd.s32 1, %s7648_s12  ;;  %s5949_s15 = sadd.s32 4294967295, %s7652_s13   ;;  %s7652_s13 = sphi %s7680_s13, %s12_s13   ;;  %s7648_s12 = sphi %s7678_s12, %s9127_s12   ;;  %s7644_s11 = sphi %s7676_s11, %s9126_s11   ;;  %s7640_s10 = sphi %s7674_s10, %s9125_s10   ;;  %s7636_s9 = sphi %s7672_s9, %s9124_s9  }
   0x4   : > { %p26_p0 = scmp.ge.s32.totalorder %s24_s14, 2  ;;  %p40_p1 = scmp.ne.s32.totalorder %s7640_s10, %s7636_s9 }
   0x5   : > { %p41_p2 = scmp.eq.s32.totalorder %s7652_s13, 0  ;;  %p100_p4 = scmp.eq.s32.totalorder %s5949_s15, 1 }
   0x6   : > { %s9129_s14 = smov (%p26_p0, %s24_s14), 0  ;;  %s33_s18 = sadd.s32 1, %s7640_s10 }
   0x7   : > { %p7704_p3 = por %p41_p2, %p40_p1  ;;  %s28_s17 = ssub.s32 %s7648_s12, %s9129_s14 }
   0x8   : > { %p31_p5 = scmp.eq.s32.totalorder %s28_s17, 0  ;;  %p7711_p6 = por %p100_p4, %p40_p1 }
   0x9   : > { %p5952_p7 = scmp.ge.s32.totalorder %s7652_s13, 2 }
   0xa   : > { %s7716_s20 = scalar_select %p31_p5, %s7640_s10, %s33_s18  }
   0xb   : > { %122 = sbr.rel (%p5952_p7) target bundleno = 94 (0x5e), region = 16 }
  0x12   : > { %125 = sbr.rel (!%p7704_p3) target bundleno = 26 (0x1a), region = 20  ;;  %s127_s21 = sand.u32 (%p7704_p3), 1, %s7640_s10  }
  0x13   : > { %s6128_s22 = sshll.u32 (%p7704_p3), %s7648_s12, 5  ;;  %s5953_s23 = sshll.u32 (%p7704_p3), %s127_s21, 6 }
  0x14   : > { %s134_s26 = scalar_lea.vmem (%p7704_p3), %s9002_s0, %s6128_s22  ;;  %s129_s27 = scalar_lea.vmem (%p7704_p3), [#allocation2], %s5953_s23 }
  0x15   : > { %v150_v0 = vld [vmem:[%s134_s26] sm:$0xff] (%p7704_p3)   ;;  %v158_v1 = vld [vmem:[%s134_s26 + $0x8] sm:$0xff] (%p7704_p3)   ;;  %v166_v2 = vld [vmem:[%s134_s26 + $0x10] sm:$0xff] (%p7704_p3)  }
  0x16   : > { %151 = vst [vmem:[%s129_s27] sm:$0xff] (%p7704_p3), %v150_v0   ;;  %159 = vst [vmem:[%s129_s27 + $0x8] sm:$0xff] (%p7704_p3), %v158_v1   ;;  %v174_v3 = vld [vmem:[%s134_s26 + $0x18] sm:$0xff] (%p7704_p3)   ;;  %v182_v4 = vld [vmem:[%s134_s26 + $0x40] sm:$0xff] (%p7704_p3)  }
  0x17   : > { %167 = vst [vmem:[%s129_s27 + $0x10] sm:$0xff] (%p7704_p3), %v166_v2   ;;  %v190_v5 = vld [vmem:[%s134_s26 + $0x48] sm:$0xff] (%p7704_p3)   ;;  %175 = vst [vmem:[%s129_s27 + $0x18] sm:$0xff] (%p7704_p3), %v174_v3   ;;  %v198_v6 = vld [vmem:[%s134_s26 + $0x50] sm:$0xff] (%p7704_p3)  }
  0x18   : > { %183 = vst [vmem:[%s129_s27 + $0x20] sm:$0xff] (%p7704_p3), %v182_v4   ;;  %191 = vst [vmem:[%s129_s27 + $0x28] sm:$0xff] (%p7704_p3), %v190_v5   ;;  %v206_v7 = vld [vmem:[%s134_s26 + $0x58] sm:$0xff] (%p7704_p3)  }
  0x19   : > { %199 = vst [vmem:[%s129_s27 + $0x30] sm:$0xff] %v198_v6   ;;  %207 = vst [vmem:[%s129_s27 + $0x38] sm:$0xff] %v206_v7  }
  0x1a PF: > { %300 = sbr.rel (!%p7704_p3) target bundleno = 94 (0x5e), region = 61  ;;  %s302_s28 = sand.u32 (%p7704_p3), 1, %s7640_s10  }
  0x1b   : > { %s6129_s29 = sshll.u32 (%p7704_p3), %s7648_s12, 9  ;;  %s5956_s30 = sshll.u32 (%p7704_p3), %s302_s28, 10 }
  0x1c   : > { %s7733_s5 = scalar_lea.vmem (%p7704_p3), %s9003_s1, %s6129_s29  ;;  %s7738_s6 = scalar_lea.vmem (%p7704_p3), [#allocation3], %s5956_s30 }
  0x1d   : > { %v592_v8 = vld [vmem:[%s7733_s5] sm:$0xff] (%p7704_p3)  ;;  %v594_v9 = vld [vmem:[%s7733_s5 + $0x8] sm:$0xff] (%p7704_p3)  ;;  %v596_v10 = vld [vmem:[%s7733_s5 + $0x10] sm:$0xff] (%p7704_p3) }
  0x1e   : > { %593 = vst [vmem:[%s7738_s6] sm:$0xff] (%p7704_p3), %v592_v8  ;;  %595 = vst [vmem:[%s7738_s6 + $0x8] sm:$0xff] (%p7704_p3), %v594_v9  ;;  %v598_v11 = vld [vmem:[%s7733_s5 + $0x18] sm:$0xff] (%p7704_p3)  ;;  %v600_v12 = vld [vmem:[%s7733_s5 + $0x20] sm:$0xff] (%p7704_p3) }
  0x1f   : > { %597 = vst [vmem:[%s7738_s6 + $0x10] sm:$0xff] (%p7704_p3), %v596_v10  ;;  %v602_v13 = vld [vmem:[%s7733_s5 + $0x28] sm:$0xff] (%p7704_p3)  ;;  %599 = vst [vmem:[%s7738_s6 + $0x18] sm:$0xff] (%p7704_p3), %v598_v11  ;;  %v604_v14 = vld [vmem:[%s7733_s5 + $0x30] sm:$0xff] (%p7704_p3) }
  0x20   : > { %601 = vst [vmem:[%s7738_s6 + $0x20] sm:$0xff] (%p7704_p3), %v600_v12  ;;  %603 = vst [vmem:[%s7738_s6 + $0x28] sm:$0xff] (%p7704_p3), %v602_v13  ;;  %v606_v15 = vld [vmem:[%s7733_s5 + $0x38] sm:$0xff] (%p7704_p3)  ;;  %v608_v16 = vld [vmem:[%s7733_s5 + $0x40] sm:$0xff] (%p7704_p3) }
  0x21   : > { %605 = vst [vmem:[%s7738_s6 + $0x30] sm:$0xff] %v604_v14  ;;  %607 = vst [vmem:[%s7738_s6 + $0x38] sm:$0xff] %v606_v15  ;;  %v610_v17 = vld [vmem:[%s7733_s5 + $0x48] sm:$0xff]  ;;  %v612_v18 = vld [vmem:[%s7733_s5 + $0x50] sm:$0xff] }
  0x22   : > { %609 = vst [vmem:[%s7738_s6 + $0x40] sm:$0xff] %v608_v16  ;;  %v614_v19 = vld [vmem:[%s7733_s5 + $0x58] sm:$0xff]  ;;  %611 = vst [vmem:[%s7738_s6 + $0x48] sm:$0xff] %v610_v17  ;;  %v616_v20 = vld [vmem:[%s7733_s5 + $0x60] sm:$0xff] }
  0x23   : > { %613 = vst [vmem:[%s7738_s6 + $0x50] sm:$0xff] %v612_v18  ;;  %615 = vst [vmem:[%s7738_s6 + $0x58] sm:$0xff] %v614_v19  ;;  %v618_v21 = vld [vmem:[%s7733_s5 + $0x68] sm:$0xff]  ;;  %v620_v22 = vld [vmem:[%s7733_s5 + $0x70] sm:$0xff] }
  0x24   : > { %617 = vst [vmem:[%s7738_s6 + $0x60] sm:$0xff] %v616_v20  ;;  %619 = vst [vmem:[%s7738_s6 + $0x68] sm:$0xff] %v618_v21  ;;  %v622_v23 = vld [vmem:[%s7733_s5 + $0x78] sm:$0xff]  ;;  %v624_v24 = vld [vmem:[%s7733_s5 + $0x80] sm:$0xff] }
  0x25   : > { %621 = vst [vmem:[%s7738_s6 + $0x70] sm:$0xff] %v620_v22  ;;  %v626_v25 = vld [vmem:[%s7733_s5 + $0x88] sm:$0xff]  ;;  %623 = vst [vmem:[%s7738_s6 + $0x78] sm:$0xff] %v622_v23  ;;  %v628_v26 = vld [vmem:[%s7733_s5 + $0x90] sm:$0xff] }
  0x26   : > { %625 = vst [vmem:[%s7738_s6 + $0x80] sm:$0xff] %v624_v24  ;;  %627 = vst [vmem:[%s7738_s6 + $0x88] sm:$0xff] %v626_v25  ;;  %v630_v27 = vld [vmem:[%s7733_s5 + $0x98] sm:$0xff]  ;;  %v632_v28 = vld [vmem:[%s7733_s5 + $0xa0] sm:$0xff] }
  0x27   : > { %629 = vst [vmem:[%s7738_s6 + $0x90] sm:$0xff] %v628_v26  ;;  %631 = vst [vmem:[%s7738_s6 + $0x98] sm:$0xff] %v630_v27  ;;  %v634_v29 = vld [vmem:[%s7733_s5 + $0xa8] sm:$0xff]  ;;  %v636_v30 = vld [vmem:[%s7733_s5 + $0xb0] sm:$0xff] }
  0x28   : > { %633 = vst [vmem:[%s7738_s6 + $0xa0] sm:$0xff] %v632_v28  ;;  %v638_v31 = vld [vmem:[%s7733_s5 + $0xb8] sm:$0xff]  ;;  %635 = vst [vmem:[%s7738_s6 + $0xa8] sm:$0xff] %v634_v29  ;;  %v640_v32 = vld [vmem:[%s7733_s5 + $0xc0] sm:$0xff] }
  0x29   : > { %637 = vst [vmem:[%s7738_s6 + $0xb0] sm:$0xff] %v636_v30  ;;  %639 = vst [vmem:[%s7738_s6 + $0xb8] sm:$0xff] %v638_v31  ;;  %v642_v33 = vld [vmem:[%s7733_s5 + $0xc8] sm:$0xff]  ;;  %v644_v34 = vld [vmem:[%s7733_s5 + $0xd0] sm:$0xff] }
  0x2a   : > { %641 = vst [vmem:[%s7738_s6 + $0xc0] sm:$0xff] %v640_v32  ;;  %643 = vst [vmem:[%s7738_s6 + $0xc8] sm:$0xff] %v642_v33  ;;  %v646_v35 = vld [vmem:[%s7733_s5 + $0xd8] sm:$0xff]  ;;  %v648_v36 = vld [vmem:[%s7733_s5 + $0xe0] sm:$0xff] }
  0x2b   : > { %645 = vst [vmem:[%s7738_s6 + $0xd0] sm:$0xff] %v644_v34  ;;  %v650_v37 = vld [vmem:[%s7733_s5 + $0xe8] sm:$0xff]  ;;  %647 = vst [vmem:[%s7738_s6 + $0xd8] sm:$0xff] %v646_v35  ;;  %v652_v38 = vld [vmem:[%s7733_s5 + $0xf0] sm:$0xff] }
  0x2c   : > { %649 = vst [vmem:[%s7738_s6 + $0xe0] sm:$0xff] %v648_v36  ;;  %651 = vst [vmem:[%s7738_s6 + $0xe8] sm:$0xff] %v650_v37  ;;  %v654_v39 = vld [vmem:[%s7733_s5 + $0xf8] sm:$0xff]  ;;  %v656_v40 = vld [vmem:[%s7733_s5 + $0x100] sm:$0xff] }
  0x2d   : > { %653 = vst [vmem:[%s7738_s6 + $0xf0] sm:$0xff] %v652_v38  ;;  %655 = vst [vmem:[%s7738_s6 + $0xf8] sm:$0xff] %v654_v39  ;;  %v658_v41 = vld [vmem:[%s7733_s5 + $0x108] sm:$0xff]  ;;  %v660_v42 = vld [vmem:[%s7733_s5 + $0x110] sm:$0xff] }
  0x2e   : > { %657 = vst [vmem:[%s7738_s6 + $0x100] sm:$0xff] %v656_v40  ;;  %v662_v43 = vld [vmem:[%s7733_s5 + $0x118] sm:$0xff]  ;;  %659 = vst [vmem:[%s7738_s6 + $0x108] sm:$0xff] %v658_v41  ;;  %v664_v44 = vld [vmem:[%s7733_s5 + $0x120] sm:$0xff] }
  0x2f   : > { %661 = vst [vmem:[%s7738_s6 + $0x110] sm:$0xff] %v660_v42  ;;  %663 = vst [vmem:[%s7738_s6 + $0x118] sm:$0xff] %v662_v43  ;;  %v666_v45 = vld [vmem:[%s7733_s5 + $0x128] sm:$0xff]  ;;  %v668_v46 = vld [vmem:[%s7733_s5 + $0x130] sm:$0xff] }
  0x30   : > { %665 = vst [vmem:[%s7738_s6 + $0x120] sm:$0xff] %v664_v44  ;;  %667 = vst [vmem:[%s7738_s6 + $0x128] sm:$0xff] %v666_v45  ;;  %v670_v47 = vld [vmem:[%s7733_s5 + $0x138] sm:$0xff]  ;;  %v672_v48 = vld [vmem:[%s7733_s5 + $0x140] sm:$0xff] }
  0x31   : > { %669 = vst [vmem:[%s7738_s6 + $0x130] sm:$0xff] %v668_v46  ;;  %v674_v49 = vld [vmem:[%s7733_s5 + $0x148] sm:$0xff]  ;;  %671 = vst [vmem:[%s7738_s6 + $0x138] sm:$0xff] %v670_v47  ;;  %v676_v50 = vld [vmem:[%s7733_s5 + $0x150] sm:$0xff] }
  0x32   : > { %673 = vst [vmem:[%s7738_s6 + $0x140] sm:$0xff] %v672_v48  ;;  %675 = vst [vmem:[%s7738_s6 + $0x148] sm:$0xff] %v674_v49  ;;  %v678_v51 = vld [vmem:[%s7733_s5 + $0x158] sm:$0xff]  ;;  %v680_v52 = vld [vmem:[%s7733_s5 + $0x160] sm:$0xff] }
  0x33   : > { %677 = vst [vmem:[%s7738_s6 + $0x150] sm:$0xff] %v676_v50  ;;  %679 = vst [vmem:[%s7738_s6 + $0x158] sm:$0xff] %v678_v51  ;;  %v682_v53 = vld [vmem:[%s7733_s5 + $0x168] sm:$0xff]  ;;  %v684_v54 = vld [vmem:[%s7733_s5 + $0x170] sm:$0xff] }
  0x34   : > { %681 = vst [vmem:[%s7738_s6 + $0x160] sm:$0xff] %v680_v52  ;;  %v686_v55 = vld [vmem:[%s7733_s5 + $0x178] sm:$0xff]  ;;  %683 = vst [vmem:[%s7738_s6 + $0x168] sm:$0xff] %v682_v53  ;;  %v688_v56 = vld [vmem:[%s7733_s5 + $0x180] sm:$0xff] }
  0x35   : > { %685 = vst [vmem:[%s7738_s6 + $0x170] sm:$0xff] %v684_v54  ;;  %687 = vst [vmem:[%s7738_s6 + $0x178] sm:$0xff] %v686_v55  ;;  %v690_v57 = vld [vmem:[%s7733_s5 + $0x188] sm:$0xff]  ;;  %v692_v58 = vld [vmem:[%s7733_s5 + $0x190] sm:$0xff] }
  0x36   : > { %689 = vst [vmem:[%s7738_s6 + $0x180] sm:$0xff] %v688_v56  ;;  %691 = vst [vmem:[%s7738_s6 + $0x188] sm:$0xff] %v690_v57  ;;  %v694_v59 = vld [vmem:[%s7733_s5 + $0x198] sm:$0xff]  ;;  %v696_v60 = vld [vmem:[%s7733_s5 + $0x1a0] sm:$0xff] }
  0x37   : > { %693 = vst [vmem:[%s7738_s6 + $0x190] sm:$0xff] %v692_v58  ;;  %v698_v61 = vld [vmem:[%s7733_s5 + $0x1a8] sm:$0xff]  ;;  %695 = vst [vmem:[%s7738_s6 + $0x198] sm:$0xff] %v694_v59  ;;  %v700_v62 = vld [vmem:[%s7733_s5 + $0x1b0] sm:$0xff] }
  0x38   : > { %697 = vst [vmem:[%s7738_s6 + $0x1a0] sm:$0xff] %v696_v60  ;;  %699 = vst [vmem:[%s7738_s6 + $0x1a8] sm:$0xff] %v698_v61  ;;  %v702_v63 = vld [vmem:[%s7733_s5 + $0x1b8] sm:$0xff]  ;;  %v704_v0 = vld [vmem:[%s7733_s5 + $0x1c0] sm:$0xff] }
  0x39   : > { %701 = vst [vmem:[%s7738_s6 + $0x1b0] sm:$0xff] %v700_v62  ;;  %703 = vst [vmem:[%s7738_s6 + $0x1b8] sm:$0xff] %v702_v63  ;;  %v706_v1 = vld [vmem:[%s7733_s5 + $0x1c8] sm:$0xff]  ;;  %v708_v2 = vld [vmem:[%s7733_s5 + $0x1d0] sm:$0xff] }
  0x3a   : > { %705 = vst [vmem:[%s7738_s6 + $0x1c0] sm:$0xff] %v704_v0  ;;  %v710_v3 = vld [vmem:[%s7733_s5 + $0x1d8] sm:$0xff]  ;;  %707 = vst [vmem:[%s7738_s6 + $0x1c8] sm:$0xff] %v706_v1  ;;  %v712_v4 = vld [vmem:[%s7733_s5 + $0x1e0] sm:$0xff] }
  0x3b   : > { %709 = vst [vmem:[%s7738_s6 + $0x1d0] sm:$0xff] %v708_v2  ;;  %711 = vst [vmem:[%s7738_s6 + $0x1d8] sm:$0xff] %v710_v3  ;;  %v714_v5 = vld [vmem:[%s7733_s5 + $0x1e8] sm:$0xff]  ;;  %v716_v6 = vld [vmem:[%s7733_s5 + $0x1f0] sm:$0xff] }
  0x3c   : > { %713 = vst [vmem:[%s7738_s6 + $0x1e0] sm:$0xff] %v712_v4  ;;  %715 = vst [vmem:[%s7738_s6 + $0x1e8] sm:$0xff] %v714_v5  ;;  %v718_v7 = vld [vmem:[%s7733_s5 + $0x1f8] sm:$0xff]  ;;  %v720_v8 = vld [vmem:[%s7733_s5 + $0x400] sm:$0xff] }
  0x3d   : > { %717 = vst [vmem:[%s7738_s6 + $0x1f0] sm:$0xff] %v716_v6  ;;  %v722_v9 = vld [vmem:[%s7733_s5 + $0x408] sm:$0xff]  ;;  %719 = vst [vmem:[%s7738_s6 + $0x1f8] sm:$0xff] %v718_v7  ;;  %v724_v10 = vld [vmem:[%s7733_s5 + $0x410] sm:$0xff] }
  0x3e   : > { %721 = vst [vmem:[%s7738_s6 + $0x200] sm:$0xff] %v720_v8  ;;  %723 = vst [vmem:[%s7738_s6 + $0x208] sm:$0xff] %v722_v9  ;;  %v726_v11 = vld [vmem:[%s7733_s5 + $0x418] sm:$0xff]  ;;  %v728_v12 = vld [vmem:[%s7733_s5 + $0x420] sm:$0xff] }
  0x3f   : > { %725 = vst [vmem:[%s7738_s6 + $0x210] sm:$0xff] %v724_v10  ;;  %727 = vst [vmem:[%s7738_s6 + $0x218] sm:$0xff] %v726_v11  ;;  %v730_v13 = vld [vmem:[%s7733_s5 + $0x428] sm:$0xff]  ;;  %v732_v14 = vld [vmem:[%s7733_s5 + $0x430] sm:$0xff] }
  0x40   : > { %729 = vst [vmem:[%s7738_s6 + $0x220] sm:$0xff] %v728_v12  ;;  %v734_v15 = vld [vmem:[%s7733_s5 + $0x438] sm:$0xff]  ;;  %731 = vst [vmem:[%s7738_s6 + $0x228] sm:$0xff] %v730_v13  ;;  %v736_v16 = vld [vmem:[%s7733_s5 + $0x440] sm:$0xff] }
  0x41   : > { %733 = vst [vmem:[%s7738_s6 + $0x230] sm:$0xff] %v732_v14  ;;  %735 = vst [vmem:[%s7738_s6 + $0x238] sm:$0xff] %v734_v15  ;;  %v738_v17 = vld [vmem:[%s7733_s5 + $0x448] sm:$0xff]  ;;  %v740_v18 = vld [vmem:[%s7733_s5 + $0x450] sm:$0xff] }
  0x42   : > { %737 = vst [vmem:[%s7738_s6 + $0x240] sm:$0xff] %v736_v16  ;;  %739 = vst [vmem:[%s7738_s6 + $0x248] sm:$0xff] %v738_v17  ;;  %v742_v19 = vld [vmem:[%s7733_s5 + $0x458] sm:$0xff]  ;;  %v744_v20 = vld [vmem:[%s7733_s5 + $0x460] sm:$0xff] }
  0x43   : > { %741 = vst [vmem:[%s7738_s6 + $0x250] sm:$0xff] %v740_v18  ;;  %v746_v21 = vld [vmem:[%s7733_s5 + $0x468] sm:$0xff]  ;;  %743 = vst [vmem:[%s7738_s6 + $0x258] sm:$0xff] %v742_v19  ;;  %v748_v22 = vld [vmem:[%s7733_s5 + $0x470] sm:$0xff] }
  0x44   : > { %745 = vst [vmem:[%s7738_s6 + $0x260] sm:$0xff] %v744_v20  ;;  %747 = vst [vmem:[%s7738_s6 + $0x268] sm:$0xff] %v746_v21  ;;  %v750_v23 = vld [vmem:[%s7733_s5 + $0x478] sm:$0xff]  ;;  %v752_v24 = vld [vmem:[%s7733_s5 + $0x480] sm:$0xff] }
  0x45   : > { %749 = vst [vmem:[%s7738_s6 + $0x270] sm:$0xff] %v748_v22  ;;  %751 = vst [vmem:[%s7738_s6 + $0x278] sm:$0xff] %v750_v23  ;;  %v754_v25 = vld [vmem:[%s7733_s5 + $0x488] sm:$0xff]  ;;  %v756_v26 = vld [vmem:[%s7733_s5 + $0x490] sm:$0xff] }
  0x46   : > { %753 = vst [vmem:[%s7738_s6 + $0x280] sm:$0xff] %v752_v24  ;;  %v758_v27 = vld [vmem:[%s7733_s5 + $0x498] sm:$0xff]  ;;  %755 = vst [vmem:[%s7738_s6 + $0x288] sm:$0xff] %v754_v25  ;;  %v760_v28 = vld [vmem:[%s7733_s5 + $0x4a0] sm:$0xff] }
  0x47   : > { %757 = vst [vmem:[%s7738_s6 + $0x290] sm:$0xff] %v756_v26  ;;  %759 = vst [vmem:[%s7738_s6 + $0x298] sm:$0xff] %v758_v27  ;;  %v762_v29 = vld [vmem:[%s7733_s5 + $0x4a8] sm:$0xff]  ;;  %v764_v30 = vld [vmem:[%s7733_s5 + $0x4b0] sm:$0xff] }
  0x48   : > { %761 = vst [vmem:[%s7738_s6 + $0x2a0] sm:$0xff] %v760_v28  ;;  %763 = vst [vmem:[%s7738_s6 + $0x2a8] sm:$0xff] %v762_v29  ;;  %v766_v31 = vld [vmem:[%s7733_s5 + $0x4b8] sm:$0xff]  ;;  %v768_v32 = vld [vmem:[%s7733_s5 + $0x4c0] sm:$0xff] }
  0x49   : > { %765 = vst [vmem:[%s7738_s6 + $0x2b0] sm:$0xff] %v764_v30  ;;  %v770_v33 = vld [vmem:[%s7733_s5 + $0x4c8] sm:$0xff]  ;;  %767 = vst [vmem:[%s7738_s6 + $0x2b8] sm:$0xff] %v766_v31  ;;  %v772_v34 = vld [vmem:[%s7733_s5 + $0x4d0] sm:$0xff] }
  0x4a   : > { %769 = vst [vmem:[%s7738_s6 + $0x2c0] sm:$0xff] %v768_v32  ;;  %771 = vst [vmem:[%s7738_s6 + $0x2c8] sm:$0xff] %v770_v33  ;;  %v774_v35 = vld [vmem:[%s7733_s5 + $0x4d8] sm:$0xff]  ;;  %v776_v36 = vld [vmem:[%s7733_s5 + $0x4e0] sm:$0xff] }
  0x4b   : > { %773 = vst [vmem:[%s7738_s6 + $0x2d0] sm:$0xff] %v772_v34  ;;  %775 = vst [vmem:[%s7738_s6 + $0x2d8] sm:$0xff] %v774_v35  ;;  %v778_v37 = vld [vmem:[%s7733_s5 + $0x4e8] sm:$0xff]  ;;  %v780_v38 = vld [vmem:[%s7733_s5 + $0x4f0] sm:$0xff] }
  0x4c   : > { %777 = vst [vmem:[%s7738_s6 + $0x2e0] sm:$0xff] %v776_v36  ;;  %v782_v39 = vld [vmem:[%s7733_s5 + $0x4f8] sm:$0xff]  ;;  %779 = vst [vmem:[%s7738_s6 + $0x2e8] sm:$0xff] %v778_v37  ;;  %v784_v40 = vld [vmem:[%s7733_s5 + $0x500] sm:$0xff] }
  0x4d   : > { %781 = vst [vmem:[%s7738_s6 + $0x2f0] sm:$0xff] %v780_v38  ;;  %783 = vst [vmem:[%s7738_s6 + $0x2f8] sm:$0xff] %v782_v39  ;;  %v786_v41 = vld [vmem:[%s7733_s5 + $0x508] sm:$0xff]  ;;  %v788_v42 = vld [vmem:[%s7733_s5 + $0x510] sm:$0xff] }
  0x4e   : > { %785 = vst [vmem:[%s7738_s6 + $0x300] sm:$0xff] %v784_v40  ;;  %787 = vst [vmem:[%s7738_s6 + $0x308] sm:$0xff] %v786_v41  ;;  %v790_v43 = vld [vmem:[%s7733_s5 + $0x518] sm:$0xff]  ;;  %v792_v44 = vld [vmem:[%s7733_s5 + $0x520] sm:$0xff] }
  0x4f   : > { %789 = vst [vmem:[%s7738_s6 + $0x310] sm:$0xff] %v788_v42  ;;  %v794_v45 = vld [vmem:[%s7733_s5 + $0x528] sm:$0xff]  ;;  %791 = vst [vmem:[%s7738_s6 + $0x318] sm:$0xff] %v790_v43  ;;  %v796_v46 = vld [vmem:[%s7733_s5 + $0x530] sm:$0xff] }
  0x50   : > { %793 = vst [vmem:[%s7738_s6 + $0x320] sm:$0xff] %v792_v44  ;;  %795 = vst [vmem:[%s7738_s6 + $0x328] sm:$0xff] %v794_v45  ;;  %v798_v47 = vld [vmem:[%s7733_s5 + $0x538] sm:$0xff]  ;;  %v800_v48 = vld [vmem:[%s7733_s5 + $0x540] sm:$0xff] }
  0x51   : > { %797 = vst [vmem:[%s7738_s6 + $0x330] sm:$0xff] %v796_v46  ;;  %799 = vst [vmem:[%s7738_s6 + $0x338] sm:$0xff] %v798_v47  ;;  %v802_v49 = vld [vmem:[%s7733_s5 + $0x548] sm:$0xff]  ;;  %v804_v50 = vld [vmem:[%s7733_s5 + $0x550] sm:$0xff] }
  0x52   : > { %801 = vst [vmem:[%s7738_s6 + $0x340] sm:$0xff] %v800_v48  ;;  %v806_v51 = vld [vmem:[%s7733_s5 + $0x558] sm:$0xff]  ;;  %803 = vst [vmem:[%s7738_s6 + $0x348] sm:$0xff] %v802_v49  ;;  %v808_v52 = vld [vmem:[%s7733_s5 + $0x560] sm:$0xff] }
  0x53   : > { %805 = vst [vmem:[%s7738_s6 + $0x350] sm:$0xff] %v804_v50  ;;  %807 = vst [vmem:[%s7738_s6 + $0x358] sm:$0xff] %v806_v51  ;;  %v810_v53 = vld [vmem:[%s7733_s5 + $0x568] sm:$0xff]  ;;  %v812_v54 = vld [vmem:[%s7733_s5 + $0x570] sm:$0xff] }
  0x54   : > { %809 = vst [vmem:[%s7738_s6 + $0x360] sm:$0xff] %v808_v52  ;;  %811 = vst [vmem:[%s7738_s6 + $0x368] sm:$0xff] %v810_v53  ;;  %v814_v55 = vld [vmem:[%s7733_s5 + $0x578] sm:$0xff]  ;;  %v816_v56 = vld [vmem:[%s7733_s5 + $0x580] sm:$0xff] }
  0x55   : > { %813 = vst [vmem:[%s7738_s6 + $0x370] sm:$0xff] %v812_v54  ;;  %v818_v57 = vld [vmem:[%s7733_s5 + $0x588] sm:$0xff]  ;;  %815 = vst [vmem:[%s7738_s6 + $0x378] sm:$0xff] %v814_v55  ;;  %v820_v58 = vld [vmem:[%s7733_s5 + $0x590] sm:$0xff] }
  0x56   : > { %817 = vst [vmem:[%s7738_s6 + $0x380] sm:$0xff] %v816_v56  ;;  %819 = vst [vmem:[%s7738_s6 + $0x388] sm:$0xff] %v818_v57  ;;  %v822_v59 = vld [vmem:[%s7733_s5 + $0x598] sm:$0xff]  ;;  %v824_v60 = vld [vmem:[%s7733_s5 + $0x5a0] sm:$0xff] }
  0x57   : > { %821 = vst [vmem:[%s7738_s6 + $0x390] sm:$0xff] %v820_v58  ;;  %823 = vst [vmem:[%s7738_s6 + $0x398] sm:$0xff] %v822_v59  ;;  %v826_v61 = vld [vmem:[%s7733_s5 + $0x5a8] sm:$0xff]  ;;  %v828_v62 = vld [vmem:[%s7733_s5 + $0x5b0] sm:$0xff] }
  0x58   : > { %825 = vst [vmem:[%s7738_s6 + $0x3a0] sm:$0xff] %v824_v60  ;;  %v830_v63 = vld [vmem:[%s7733_s5 + $0x5b8] sm:$0xff]  ;;  %827 = vst [vmem:[%s7738_s6 + $0x3a8] sm:$0xff] %v826_v61  ;;  %v832_v0 = vld [vmem:[%s7733_s5 + $0x5c0] sm:$0xff] }
  0x59   : > { %829 = vst [vmem:[%s7738_s6 + $0x3b0] sm:$0xff] %v828_v62  ;;  %831 = vst [vmem:[%s7738_s6 + $0x3b8] sm:$0xff] %v830_v63  ;;  %v834_v1 = vld [vmem:[%s7733_s5 + $0x5c8] sm:$0xff]  ;;  %v836_v2 = vld [vmem:[%s7733_s5 + $0x5d0] sm:$0xff] }
  0x5a   : > { %833 = vst [vmem:[%s7738_s6 + $0x3c0] sm:$0xff] %v832_v0  ;;  %835 = vst [vmem:[%s7738_s6 + $0x3c8] sm:$0xff] %v834_v1  ;;  %v838_v3 = vld [vmem:[%s7733_s5 + $0x5d8] sm:$0xff]  ;;  %v840_v4 = vld [vmem:[%s7733_s5 + $0x5e0] sm:$0xff] }
  0x5b   : > { %837 = vst [vmem:[%s7738_s6 + $0x3d0] sm:$0xff] %v836_v2  ;;  %v842_v5 = vld [vmem:[%s7733_s5 + $0x5e8] sm:$0xff]  ;;  %839 = vst [vmem:[%s7738_s6 + $0x3d8] sm:$0xff] %v838_v3  ;;  %v844_v6 = vld [vmem:[%s7733_s5 + $0x5f0] sm:$0xff] }
  0x5c   : > { %841 = vst [vmem:[%s7738_s6 + $0x3e0] sm:$0xff] %v840_v4  ;;  %843 = vst [vmem:[%s7738_s6 + $0x3e8] sm:$0xff] %v842_v5  ;;  %v846_v7 = vld [vmem:[%s7733_s5 + $0x5f8] sm:$0xff] }
  0x5d   : > { %845 = vst [vmem:[%s7738_s6 + $0x3f0] sm:$0xff] %v844_v6  ;;  %847 = vst [vmem:[%s7738_s6 + $0x3f8] sm:$0xff] %v846_v7 }
  0x5e PF: > { %p5959_p8 = scmp.ge.s32.totalorder %s7652_s13, 1  ;;  %p852_p9 = scmp.lt.s32.totalorder %s7652_s13, 3 }
  0x60   : > { %p853_p10 = pnand %p5959_p8, %p852_p9 }
  0x62   : > { %856 = sbr.rel (%p853_p10) target bundleno = 588 (0x24c), region = 99 }
  0x69   : > { %s859_s7 = sand.u32 1, %s7636_s9   ;;  %v7654_v8 = vmov 0.0|0.0   ;;  %vm7655_vm0 = vmmov 0   ;;  %v9005_v9 = vmov 0.0   ;;  %vm1055_vm1 = vcmask 261120   ;;  %s6130_s18 = sshll.u32 (%p7711_p6), %s7644_s11, 5 }
  0x6a   : > { %7155 = vmatprep.subr.bf16.mxu0 %v7654_v8  ;;  %7161 = vmatprep.subr.bf16.mxu1 %v7654_v8  ;;  %s5961_s8 = sshll.u32 %s859_s7, 10  ;;  %s8012_s9 = sshll.u32 %s859_s7, 6  ;;  %vm4528_vm2 = vcmask 254976  }
  0x6b   : > { %6459 = vmatprep.mubr.msk.f32.mxu0 %vm7655_vm0, %v9005_v9  ;;  %6470 = vmatprep.mubr.msk.f32.mxu1 %vm7655_vm0, %v9005_v9  ;;  %s8002_s15 = scalar_lea.vmem [#allocation3], %s5961_s8  ;;  %s8032_s16 = scalar_lea.vmem [#allocation2], %s8012_s9 }
  0x6c   : > { %v926_v10 = vld [vmem:[%s8002_s15] sm:$0xff]  ;;  %v927_v11 = vld [vmem:[%s8002_s15 + $0x8] sm:$0xff]  ;;  %v928_v15 = vld [vmem:[%s8002_s15 + $0x10] sm:$0xff]  ;;  %s8896_s17 = scalar_lea.vmem [#allocation4], %s8012_s9  ;;  %s5693_s23 = scalar_lea.vmem (%p7711_p6), %s9004_s2, %s6130_s18 }
  0x6d   : > { %v930_v12 = vld [vmem:[%s8002_s15 + $0x20] sm:$0xff]  ;;  %v8007_v13 = vpack.c.bf16 %v927_v11, %v926_v10  ;;  %v931_v14 = vld [vmem:[%s8002_s15 + $0x28] sm:$0xff]  ;;  %v929_v16 = vld [vmem:[%s8002_s15 + $0x18] sm:$0xff] }
  0x6e   : > { %v8014_v17 = vpack.c.bf16 %v931_v14, %v930_v12  ;;  %v932_v18 = vld [vmem:[%s8002_s15 + $0x30] sm:$0xff]  ;;  %v933_v19 = vld [vmem:[%s8002_s15 + $0x38] sm:$0xff]  ;;  %v8019_v20 = vpack.c.bf16 %v929_v16, %v928_v15  ;;  %v934_v22 = vld [vmem:[%s8002_s15 + $0x40] sm:$0xff] }
  0x6f   : > { %7157 = vmatpush3.bf16.msra.mxu0 %v8007_v13  ;;  %v8023_v21 = vpack.c.bf16 %v933_v19, %v932_v18  ;;  %v935_v23 = vld [vmem:[%s8002_s15 + $0x48] sm:$0xff]  ;;  %v938_v24 = vld [vmem:[%s8002_s15 + $0x60] sm:$0xff]  ;;  %v936_v30 = vld [vmem:[%s8002_s15 + $0x50] sm:$0xff] }
  0x70   : > { %7163 = vmatpush3.bf16.msra.mxu1 %v8014_v17  ;;  %7158 = vmatprep.subr.bf16.mxu0 %v7654_v8  ;;  %v939_v25 = vld [vmem:[%s8002_s15 + $0x68] sm:$0xff]  ;;  %v8035_v26 = vld [vmem:[%s8032_s16] sm:$0x3]  ;;  %v8037_v27 = vpack.c.bf16 %v935_v23, %v934_v22  ;;  %v8041_v28 = vld [vmem:[%s8032_s16 + $0x2] sm:$0x3] }
  0x71   : > { %7164 = vmatprep.subr.bf16.mxu1 %v7654_v8  ;;  %9047 = vst [vmem:[#allocation5_spill] sm:$0xff] %v8041_v28  ;;  %v8044_v29 = vpack.c.bf16 %v939_v25, %v938_v24  ;;  %v937_v31 = vld [vmem:[%s8002_s15 + $0x58] sm:$0xff]  ;;  %v940_v32 = vld [vmem:[%s8002_s15 + $0x70] sm:$0xff]  ;;  %v942_v36 = vld [vmem:[%s8002_s15 + $0x80] sm:$0xff] }
  0x72   : > { %v941_v33 = vld [vmem:[%s8002_s15 + $0x78] sm:$0xff]  ;;  %v8056_v34 = vpack.c.bf16 %v937_v31, %v936_v30  ;;  %v943_v37 = vld [vmem:[%s8002_s15 + $0x88] sm:$0xff]  ;;  %v946_v38 = vld [vmem:[%s8002_s15 + $0xa0] sm:$0xff] }
  0x73   : > { %7160 = vmatpush3.bf16.msra.mxu0 %v8019_v20  ;;  %v8060_v35 = vpack.c.bf16 %v941_v33, %v940_v32  ;;  %v947_v39 = vld [vmem:[%s8002_s15 + $0xa8] sm:$0xff]  ;;  %v8073_v40 = vld [vmem:[%s8032_s16 + $0x4] sm:$0x3]  ;;  %v8075_v41 = vpack.c.bf16 %v943_v37, %v942_v36  ;;  %v8079_v42 = vld [vmem:[%s8032_s16 + $0x6] sm:$0x3] }
  0x74   : > { %7166 = vmatpush3.bf16.msra.mxu1 %v8023_v21  ;;  %7167 = vmatprep.subr.bf16.mxu0 %v7654_v8  ;;  %9048 = vst [vmem:[#allocation6_spill] sm:$0xff] %v8073_v40  ;;  %9049 = vst [vmem:[#allocation7_spill] sm:$0xff] %v8079_v42  ;;  %v8082_v43 = vpack.c.bf16 %v947_v39, %v946_v38  ;;  %v944_v44 = vld [vmem:[%s8002_s15 + $0x90] sm:$0xff]  ;;  %v945_v45 = vld [vmem:[%s8002_s15 + $0x98] sm:$0xff] }
  0x75   : > { %7173 = vmatprep.subr.bf16.mxu1 %v7654_v8  ;;  %v948_v46 = vld [vmem:[%s8002_s15 + $0xb0] sm:$0xff]  ;;  %v949_v47 = vld [vmem:[%s8002_s15 + $0xb8] sm:$0xff]  ;;  %v8094_v48 = vpack.c.bf16 %v945_v45, %v944_v44  ;;  %v950_v50 = vld [vmem:[%s8002_s15 + $0xc0] sm:$0xff] }
  0x76   : > { %6460 = vmatmul.mubr.msk.f32.vlgmr.msra.gmra.mrb[0].mxu0 %vm1055_vm1, %v8035_v26  ;;  %v8098_v49 = vpack.c.bf16 %v949_v47, %v948_v46  ;;  %v951_v51 = vld [vmem:[%s8002_s15 + $0xc8] sm:$0xff]  ;;  %v954_v52 = vld [vmem:[%s8002_s15 + $0xe0] sm:$0xff]  ;;  %v952_v58 = vld [vmem:[%s8002_s15 + $0xd0] sm:$0xff] }
  0x77   : > { %6471 = vmatmul.mubr.msk.f32.vlgmr.msra.gmra.mrb[0].mxu1 %vm1055_vm1, %v8041_v28  ;;  %7169 = vmatpush3.bf16.msra.mxu0 %v8037_v27  ;;  %v955_v53 = vld [vmem:[%s8002_s15 + $0xe8] sm:$0xff]  ;;  %v8113_v55 = vpack.c.bf16 %v951_v51, %v950_v50  ;;  %v953_v59 = vld [vmem:[%s8002_s15 + $0xd8] sm:$0xff]  ;;  %v956_v60 = vld [vmem:[%s8002_s15 + $0xf0] sm:$0xff] }
  0x78   : > { %7175 = vmatpush3.bf16.msra.mxu1 %v8044_v29  ;;  %7170 = vmatprep.subr.bf16.mxu0 %v7654_v8  ;;  %v8111_v54 = vld [vmem:[%s8032_s16 + $0x8] sm:$0x3]  ;;  %v8117_v56 = vld [vmem:[%s8032_s16 + $0xa] sm:$0x3]  ;;  %v8120_v57 = vpack.c.bf16 %v955_v53, %v954_v52  ;;  %v957_v61 = vld [vmem:[%s8002_s15 + $0xf8] sm:$0xff]  ;;  %v8132_v62 = vpack.c.bf16 %v953_v59, %v952_v58 }
  0x79   : > { %7176 = vmatprep.subr.bf16.mxu1 %v7654_v8  ;;  %6481 = vmatprep.mubr.msk.f32.mxu0 %vm7655_vm0, %v9005_v9  ;;  %9050 = vst [vmem:[#allocation8_spill] sm:$0xff] %v8111_v54  ;;  %9051 = vst [vmem:[#allocation9_spill] sm:$0xff] %v8117_v56  ;;  %v8136_v63 = vpack.c.bf16 %v957_v61, %v956_v60  ;;  %v958_v0 = vld [vmem:[%s8002_s15 + $0x100] sm:$0xff]  ;;  %v959_v1 = vld [vmem:[%s8002_s15 + $0x108] sm:$0xff] }
  0x7a   : > { %6492 = vmatprep.mubr.msk.f32.mxu1 %vm7655_vm0, %v9005_v9  ;;  %v962_v2 = vld [vmem:[%s8002_s15 + $0x120] sm:$0xff]  ;;  %v963_v3 = vld [vmem:[%s8002_s15 + $0x128] sm:$0xff]  ;;  %v8151_v5 = vpack.c.bf16 %v959_v1, %v958_v0  ;;  %v960_v10 = vld [vmem:[%s8002_s15 + $0x110] sm:$0xff] }
  0x7b   : > { %7172 = vmatpush3.bf16.msra.mxu0 %v8056_v34  ;;  %v8149_v4 = vld [vmem:[%s8032_s16 + $0xc] sm:$0x3]  ;;  %v8155_v6 = vld [vmem:[%s8032_s16 + $0xe] sm:$0x3]  ;;  %v8158_v7 = vpack.c.bf16 %v963_v3, %v962_v2  ;;  %v961_v11 = vld [vmem:[%s8002_s15 + $0x118] sm:$0xff] }
  0x7c   : > { %7178 = vmatpush3.bf16.msra.mxu1 %v8060_v35  ;;  %7179 = vmatprep.subr.bf16.mxu0 %v7654_v8  ;;  %9052 = vst [vmem:[#allocation10_spill] sm:$0xff] %v8149_v4  ;;  %9053 = vst [vmem:[#allocation11_spill] sm:$0xff] %v8155_v6  ;;  %v964_v12 = vld [vmem:[%s8002_s15 + $0x130] sm:$0xff]  ;;  %v965_v14 = vld [vmem:[%s8002_s15 + $0x138] sm:$0xff]  ;;  %v8170_v15 = vpack.c.bf16 %v961_v11, %v960_v10 }
  0x7d   : > { %7185 = vmatprep.subr.bf16.mxu1 %v7654_v8  ;;  %v8174_v16 = vpack.c.bf16 %v965_v14, %v964_v12  ;;  %v966_v18 = vld [vmem:[%s8002_s15 + $0x140] sm:$0xff]  ;;  %v967_v19 = vld [vmem:[%s8002_s15 + $0x148] sm:$0xff]  ;;  %v8187_v24 = vld [vmem:[%s8032_s16 + $0x10] sm:$0x3] }
  0x7e   : > { %6482 = vmatmul.mubr.msk.f32.vlgmr.msra.gmra.mrb[2].mxu0 %vm1055_vm1, %v8073_v40  ;;  %v970_v22 = vld [vmem:[%s8002_s15 + $0x160] sm:$0xff]  ;;  %v971_v23 = vld [vmem:[%s8002_s15 + $0x168] sm:$0xff]  ;;  %9054 = vst [vmem:[#allocation12_spill] sm:$0xff] %v8187_v24  ;;  %v8189_v25 = vpack.c.bf16 %v967_v19, %v966_v18  ;;  %v8193_v30 = vld [vmem:[%s8032_s16 + $0x12] sm:$0x3] }
  0x7f   : > { %6493 = vmatmul.mubr.msk.f32.vlgmr.msra.gmra.mrb[2].mxu1 %vm1055_vm1, %v8079_v42  ;;  %7181 = vmatpush3.bf16.msra.mxu0 %v8075_v41  ;;  %9055 = vst [vmem:[#allocation13_spill] sm:$0xff] %v8193_v30  ;;  %v8196_v31 = vpack.c.bf16 %v971_v23, %v970_v22  ;;  %v968_v32 = vld [vmem:[%s8002_s15 + $0x150] sm:$0xff]  ;;  %v969_v33 = vld [vmem:[%s8002_s15 + $0x158] sm:$0xff]  ;;  %v974_v44 = vld [vmem:[%s8002_s15 + $0x180] sm:$0xff] }
  0x80   : > { %7187 = vmatpush3.bf16.msra.mxu1 %v8082_v43  ;;  %7182 = vmatprep.subr.bf16.mxu0 %v7654_v8  ;;  %v972_v36 = vld [vmem:[%s8002_s15 + $0x170] sm:$0xff]  ;;  %v973_v37 = vld [vmem:[%s8002_s15 + $0x178] sm:$0xff]  ;;  %v8208_v38 = vpack.c.bf16 %v969_v33, %v968_v32  ;;  %v975_v45 = vld [vmem:[%s8002_s15 + $0x188] sm:$0xff] }
  0x81   : > { %7188 = vmatprep.subr.bf16.mxu1 %v7654_v8  ;;  %6503 = vmatprep.mubr.msk.f32.mxu0 %vm7655_vm0, %v9005_v9  ;;  %v8212_v39 = vpack.c.bf16 %v973_v37, %v972_v36  ;;  %v978_v46 = vld [vmem:[%s8002_s15 + $0x1a0] sm:$0xff]  ;;  %v979_v47 = vld [vmem:[%s8002_s15 + $0x1a8] sm:$0xff]  ;;  %v8225_v50 = vld [vmem:[%s8032_s16 + $0x14] sm:$0x3]  ;;  %v8227_v51 = vpack.c.bf16 %v975_v45, %v974_v44 }
  0x82   : > { %6514 = vmatprep.mubr.msk.f32.mxu1 %vm7655_vm0, %v9005_v9  ;;  %9056 = vst [vmem:[#allocation14_spill] sm:$0xff] %v8225_v50  ;;  %v8231_v52 = vld [vmem:[%s8032_s16 + $0x16] sm:$0x3]  ;;  %v8234_v53 = vpack.c.bf16 %v979_v47, %v978_v46  ;;  %v977_v59 = vld [vmem:[%s8002_s15 + $0x198] sm:$0xff]  ;;  %v982_v2 = vld [vmem:[%s8002_s15 + $0x1c0] sm:$0xff] }
  0x83   : > { %7184 = vmatpush3.bf16.msra.mxu0 %v8094_v48  ;;  %9057 = vst [vmem:[#allocation15_spill] sm:$0xff] %v8231_v52  ;;  %v976_v58 = vld [vmem:[%s8002_s15 + $0x190] sm:$0xff]  ;;  %v981_v61 = vld [vmem:[%s8002_s15 + $0x1b8] sm:$0xff]  ;;  %v983_v3 = vld [vmem:[%s8002_s15 + $0x1c8] sm:$0xff] }
  0x84   : > { %7190 = vmatpush3.bf16.msra.mxu1 %v8098_v49  ;;  %7191 = vmatprep.subr.bf16.mxu0 %v7654_v8  ;;  %v980_v60 = vld [vmem:[%s8002_s15 + $0x1b0] sm:$0xff]  ;;  %v8246_v0 = vpack.c.bf16 %v977_v59, %v976_v58  ;;  %v986_v10 = vld [vmem:[%s8002_s15 + $0x1e0] sm:$0xff]  ;;  %v987_v11 = vld [vmem:[%s8002_s15 + $0x1e8] sm:$0xff]  ;;  %v8265_v14 = vpack.c.bf16 %v983_v3, %v982_v2 }
  0x85   : > { %7197 = vmatprep.subr.bf16.mxu1 %v7654_v8  ;;  %v8250_v1 = vpack.c.bf16 %v981_v61, %v980_v60  ;;  %v8263_v12 = vld [vmem:[%s8032_s16 + $0x18] sm:$0x3]  ;;  %v8269_v18 = vld [vmem:[%s8032_s16 + $0x1a] sm:$0x3]  ;;  %v8272_v19 = vpack.c.bf16 %v987_v11, %v986_v10  ;;  %v984_v22 = vld [vmem:[%s8002_s15 + $0x1d0] sm:$0xff] }
  0x86   : > { %6504 = vmatmul.mubr.msk.f32.vlgmr.msra.gmra.mrb[4].mxu0 %vm1055_vm1, %v8111_v54  ;;  %9058 = vst [vmem:[#allocation16_spill] sm:$0xff] %v8263_v12  ;;  %9059 = vst [vmem:[#allocation17_spill] sm:$0xff] %v8269_v18  ;;  %v985_v23 = vld [vmem:[%s8002_s15 + $0x1d8] sm:$0xff]  ;;  %v988_v32 = vld [vmem:[%s8002_s15 + $0x1f0] sm:$0xff] }
  0x87   : > { %6515 = vmatmul.mubr.msk.f32.vlgmr.msra.gmra.mrb[4].mxu1 %vm1055_vm1, %v8117_v56  ;;  %7193 = vmatpush3.bf16.msra.mxu0 %v8113_v55  ;;  %v989_v33 = vld [vmem:[%s8002_s15 + $0x1f8] sm:$0xff]  ;;  %v8284_v36 = vpack.c.bf16 %v985_v23, %v984_v22  ;;  %v5979_v44 = vld [vmem:[%s8002_s15 + $0x200] sm:$0xff]  ;;  %v5980_v45 = vld [vmem:[%s8002_s15 + $0x208] sm:$0xff] }
  0x88   : > { %7199 = vmatpush3.bf16.msra.mxu1 %v8120_v57  ;;  %7194 = vmatprep.subr.bf16.mxu0 %v7654_v8  ;;  %v8288_v37 = vpack.c.bf16 %v989_v33, %v988_v32  ;;  %v5983_v46 = vld [vmem:[%s8002_s15 + $0x220] sm:$0xff]  ;;  %v5984_v47 = vld [vmem:[%s8002_s15 + $0x228] sm:$0xff]  ;;  %v8301_v58 = vld [vmem:[%s8032_s16 + $0x1c] sm:$0x3]  ;;  %v8303_v59 = vpack.c.bf16 %v5980_v45, %v5979_v44 }
  0x89   : > { %7200 = vmatprep.subr.bf16.mxu1 %v7654_v8  ;;  %6525 = vmatprep.mubr.msk.f32.mxu0 %vm7655_vm0, %v9005_v9  ;;  %9060 = vst [vmem:[#allocation18_spill] sm:$0xff] %v8301_v58  ;;  %v8307_v60 = vld [vmem:[%s8032_s16 + $0x1e] sm:$0x3]  ;;  %v8310_v61 = vpack.c.bf16 %v5984_v47, %v5983_v46  ;;  %v5981_v2 = vld [vmem:[%s8002_s15 + $0x210] sm:$0xff]  ;;  %v5987_v32 = vld [vmem:[%s8002_s15 + $0x240] sm:$0xff] }
  0x8a   : > { %6536 = vmatprep.mubr.msk.f32.mxu1 %vm7655_vm0, %v9005_v9  ;;  %9061 = vst [vmem:[#allocation19_spill] sm:$0xff] %v8307_v60  ;;  %v5982_v3 = vld [vmem:[%s8002_s15 + $0x218] sm:$0xff]  ;;  %v5985_v10 = vld [vmem:[%s8002_s15 + $0x230] sm:$0xff]  ;;  %v5988_v33 = vld [vmem:[%s8002_s15 + $0x248] sm:$0xff] }
  0x8b   : > { %7196 = vmatpush3.bf16.msra.mxu0 %v8132_v62  ;;  %v5986_v11 = vld [vmem:[%s8002_s15 + $0x238] sm:$0xff]  ;;  %v8322_v22 = vpack.c.bf16 %v5982_v3, %v5981_v2  ;;  %v5991_v44 = vld [vmem:[%s8002_s15 + $0x260] sm:$0xff]  ;;  %v5992_v45 = vld [vmem:[%s8002_s15 + $0x268] sm:$0xff]  ;;  %v8341_v47 = vpack.c.bf16 %v5988_v33, %v5987_v32 }
  0x8c   : > { %7202 = vmatpush3.bf16.msra.mxu1 %v8136_v63  ;;  %7203 = vmatprep.subr.bf16.mxu0 %v7654_v8  ;;  %v8326_v23 = vpack.c.bf16 %v5986_v11, %v5985_v10  ;;  %v8339_v46 = vld [vmem:[%s8032_s16 + $0x20] sm:$0x3]  ;;  %v8345_v2 = vld [vmem:[%s8032_s16 + $0x22] sm:$0x3]  ;;  %v8348_v3 = vpack.c.bf16 %v5992_v45, %v5991_v44  ;;  %v5989_v10 = vld [vmem:[%s8002_s15 + $0x250] sm:$0xff] }
  0x8d   : > { %7209 = vmatprep.subr.bf16.mxu1 %v7654_v8  ;;  %9062 = vst [vmem:[#allocation20_spill] sm:$0xff] %v8341_v47  ;;  %v5990_v11 = vld [vmem:[%s8002_s15 + $0x258] sm:$0xff]  ;;  %v5995_v44 = vld [vmem:[%s8002_s15 + $0x280] sm:$0xff]  ;;  %v5996_v45 = vld [vmem:[%s8002_s15 + $0x288] sm:$0xff] }
  0x8e   : > { %6526 = vmatmul.mubr.msk.f32.vlgmr.msra.gmra.mrb[6].mxu0 %vm1055_vm1, %v8149_v4  ;;  %9063 = vst [vmem:[#allocation21_spill] sm:$0xff] %v8348_v3  ;;  %v8360_v32 = vpack.c.bf16 %v5990_v11, %v5989_v10  ;;  %v6000_v10 = vld [vmem:[%s8002_s15 + $0x2a8] sm:$0xff]  ;;  %v8377_v11 = vld [vmem:[%s8032_s16 + $0x24] sm:$0x3]  ;;  %v6005_v56 = vld [vmem:[%s8002_s15 + $0x2d0] sm:$0xff] }
  0x8f   : > { %6537 = vmatmul.mubr.msk.f32.vlgmr.msra.gmra.mrb[6].mxu1 %vm1055_vm1, %v8155_v6  ;;  %7205 = vmatpush3.bf16.msra.mxu0 %v8151_v5  ;;  %v6007_v6 = vld [vmem:[%s8002_s15 + $0x2e0] sm:$0xff]  ;;  %v6006_v54 = vld [vmem:[%s8002_s15 + $0x2d8] sm:$0xff]  ;;  %v6041_v28 = vld [vmem:[%s8002_s15 + $0x3f0] sm:$0xff] }
  0x90   : > { %7211 = vmatpush3.bf16.msra.mxu1 %v8158_v7  ;;  %7206 = vmatprep.subr.bf16.mxu0 %v7654_v8  ;;  %9064 = vst [vmem:[#allocation22_spill] sm:$0xff] %v8360_v32  ;;  %v6018_v42 = vld [vmem:[%s8002_s15 + $0x338] sm:$0xff] }
  0x91   : > { %7212 = vmatprep.subr.bf16.mxu1 %v7654_v8  ;;  %6547 = vmatprep.mubr.msk.f32.mxu0 %vm7655_vm0, %v9005_v9  ;;  %v6022_v40 = vld [vmem:[%s8002_s15 + $0x358] sm:$0xff] }
  0x92   : > { %6558 = vmatprep.mubr.msk.f32.mxu1 %vm7655_vm0, %v9005_v9 }
  0x93   : > { %7208 = vmatpush3.bf16.msra.mxu0 %v8170_v15 }
  0x94   : > { %7214 = vmatpush3.bf16.msra.mxu1 %v8174_v16  ;;  %7215 = vmatprep.subr.bf16.mxu0 %v7654_v8 }
  0x95   : > { %7221 = vmatprep.subr.bf16.mxu1 %v7654_v8 }
  0x96   : > { %6548 = vmatmul.mubr.msk.f32.vlgmr.msra.gmra.mrb[8].mxu0 %vm1055_vm1, %v8187_v24  ;;  %v6002_v24 = vld [vmem:[%s8002_s15 + $0x2b8] sm:$0xff] }
  0x97   : > { %6559 = vmatmul.mubr.msk.f32.vlgmr.msra.gmra.mrb[8].mxu1 %vm1055_vm1, %v8193_v30  ;;  %7217 = vmatpush3.bf16.msra.mxu0 %v8189_v25  ;;  %v6001_v30 = vld [vmem:[%s8002_s15 + $0x2b0] sm:$0xff] }
  0x98   : > { %7223 = vmatpush3.bf16.msra.mxu1 %v8196_v31  ;;  %7218 = vmatprep.subr.bf16.mxu0 %v7654_v8 }
  0x99   : > { %7224 = vmatprep.subr.bf16.mxu1 %v7654_v8  ;;  %6569 = vmatprep.mubr.msk.f32.mxu0 %vm7655_vm0, %v9005_v9 }
  0x9a   : > { %6580 = vmatprep.mubr.msk.f32.mxu1 %vm7655_vm0, %v9005_v9 }
  0x9b   : > { %7220 = vmatpush3.bf16.msra.mxu0 %v8208_v38 }
  0x9c   : > { %7226 = vmatpush3.bf16.msra.mxu1 %v8212_v39  ;;  %7227 = vmatprep.subr.bf16.mxu0 %v7654_v8 }
  0x9d   : > { %7233 = vmatprep.subr.bf16.mxu1 %v7654_v8 }
  0x9e   : > { %6570 = vmatmul.mubr.msk.f32.vlgmr.msra.gmra.mrb[10].mxu0 %vm1055_vm1, %v8225_v50  ;;  %v5998_v50 = vld [vmem:[%s8002_s15 + $0x298] sm:$0xff] }
  0x9f   : > { %6581 = vmatmul.mubr.msk.f32.vlgmr.msra.gmra.mrb[10].mxu1 %vm1055_vm1, %v8231_v52  ;;  %7229 = vmatpush3.bf16.msra.mxu0 %v8227_v51  ;;  %v5997_v52 = vld [vmem:[%s8002_s15 + $0x290] sm:$0xff] }
  0xa0   : > { %7235 = vmatpush3.bf16.msra.mxu1 %v8234_v53  ;;  %7230 = vmatprep.subr.bf16.mxu0 %v7654_v8 }
  0xa1   : > { %7236 = vmatprep.subr.bf16.mxu1 %v7654_v8  ;;  %6591 = vmatprep.mubr.msk.f32.mxu0 %vm7655_vm0, %v9005_v9 }
  0xa2   : > { %6602 = vmatprep.mubr.msk.f32.mxu1 %vm7655_vm0, %v9005_v9 }
  0xa3   : > { %7232 = vmatpush3.bf16.msra.mxu0 %v8246_v0 }
  0xa4   : > { %7238 = vmatpush3.bf16.msra.mxu1 %v8250_v1  ;;  %7239 = vmatprep.subr.bf16.mxu0 %v7654_v8 }
  0xa5   : > { %7245 = vmatprep.subr.bf16.mxu1 %v7654_v8 }
  0xa6   : > { %6592 = vmatmul.mubr.msk.f32.vlgmr.msra.gmra.mrb[12].mxu0 %vm1055_vm1, %v8263_v12 }
  0xa7   : > { %6603 = vmatmul.mubr.msk.f32.vlgmr.msra.gmra.mrb[12].mxu1 %vm1055_vm1, %v8269_v18  ;;  %7241 = vmatpush3.bf16.msra.mxu0 %v8265_v14  ;;  %v5999_v18 = vld [vmem:[%s8002_s15 + $0x2a0] sm:$0xff] }
  0xa8   : > { %7247 = vmatpush3.bf16.msra.mxu1 %v8272_v19  ;;  %7242 = vmatprep.subr.bf16.mxu0 %v7654_v8  ;;  %v8386_v12 = vpack.c.bf16 %v6000_v10, %v5999_v18  ;;  %v8398_v18 = vpack.c.bf16 %v5998_v50, %v5997_v52  ;;  %v6004_v10 = vld [vmem:[%s8002_s15 + $0x2c8] sm:$0xff] }
  0xa9   : > { %7248 = vmatprep.subr.bf16.mxu1 %v7654_v8  ;;  %6613 = vmatprep.mubr.msk.f32.mxu0 %vm7655_vm0, %v9005_v9  ;;  %v6008_v50 = vld [vmem:[%s8002_s15 + $0x2e8] sm:$0xff] }
  0xaa   : > { %6624 = vmatprep.mubr.msk.f32.mxu1 %vm7655_vm0, %v9005_v9  ;;  %9068 = vst [vmem:[#allocation25_spill] sm:$0xff] %v8386_v12  ;;  %9069 = vst [vmem:[#allocation26_spill] sm:$0xff] %v8398_v18  ;;  %v8415_v52 = vld [vmem:[%s8032_s16 + $0x28] sm:$0x3]  ;;  %v8424_v4 = vpack.c.bf16 %v6008_v50, %v6007_v6  ;;  %v8436_v6 = vpack.c.bf16 %v6006_v54, %v6005_v56  ;;  %v8453_v56 = vld [vmem:[%s8032_s16 + $0x2c] sm:$0x3] }
  0xab   : > { %7244 = vmatpush3.bf16.msra.mxu0 %v8284_v36  ;;  %v6012_v50 = vld [vmem:[%s8002_s15 + $0x308] sm:$0xff] }
  0xac   : > { %7250 = vmatpush3.bf16.msra.mxu1 %v8288_v37  ;;  %7251 = vmatprep.subr.bf16.mxu0 %v7654_v8  ;;  %9072 = vst [vmem:[#allocation29_spill] sm:$0xff] %v8424_v4  ;;  %9073 = vst [vmem:[#allocation30_spill] sm:$0xff] %v8436_v6  ;;  %v6016_v54 = vld [vmem:[%s8002_s15 + $0x328] sm:$0xff] }
  0xad   : > { %7257 = vmatprep.subr.bf16.mxu1 %v7654_v8 }
  0xae   : > { %6614 = vmatmul.mubr.msk.f32.vlgmr.msra.gmra.mrb[14].mxu0 %vm1055_vm1, %v8301_v58  ;;  %v9066_v58 = vmov 0.0  }
  0xaf   : > { %6625 = vmatmul.mubr.msk.f32.vlgmr.msra.gmra.mrb[14].mxu1 %vm1055_vm1, %v8307_v60  ;;  %7253 = vmatpush3.bf16.msra.mxu0 %v8303_v59  ;;  %v5994_v60 = vld [vmem:[%s8002_s15 + $0x278] sm:$0xff] }
  0xb0   : > { %7259 = vmatpush3.bf16.msra.mxu1 %v8310_v61  ;;  %7254 = vmatprep.subr.bf16.mxu0 %v7654_v8 }
  0xb1   : > { %7260 = vmatprep.subr.bf16.mxu1 %v7654_v8  ;;  %6635 = vmatprep.mubr.msk.f32.mxu0 %vm7655_vm0, %v9005_v9 }
  0xb2   : > { %6646 = vmatprep.mubr.msk.f32.mxu1 %vm7655_vm0, %v9005_v9  ;;  %v5993_v9 = vld [vmem:[%s8002_s15 + $0x270] sm:$0xff] }
  0xb3   : > { %7256 = vmatpush3.bf16.msra.mxu0 %v8322_v22  ;;  %v8364_v33 = vpack.c.bf16 %v5994_v60, %v5993_v9  ;;  %v8379_v9 = vpack.c.bf16 %v5996_v45, %v5995_v44  ;;  %v8383_v60 = vld [vmem:[%s8032_s16 + $0x26] sm:$0x3]  ;;  %v8402_v44 = vpack.c.bf16 %v6002_v24, %v6001_v30  ;;  %v8421_v30 = vld [vmem:[%s8032_s16 + $0x2a] sm:$0x3] }
  0xb4   : > { %7262 = vmatpush3.bf16.msra.mxu1 %v8326_v23  ;;  %7263 = vmatprep.subr.bf16.mxu0 %v7654_v8  ;;  %v6003_v45 = vld [vmem:[%s8002_s15 + $0x2c0] sm:$0xff] }
  0xb5   : > { %7269 = vmatprep.subr.bf16.mxu1 %v7654_v8  ;;  %9065 = vst [vmem:[#allocation23_spill] sm:$0xff] %v8364_v33  ;;  %9067 = vst [vmem:[#allocation24_spill] sm:$0xff] %v8379_v9  ;;  %v8417_v24 = vpack.c.bf16 %v6004_v10, %v6003_v45  ;;  %v6011_v10 = vld [vmem:[%s8002_s15 + $0x300] sm:$0xff] }
  0xb6   : > { %6636 = vmatmul.mubr.msk.f32.vlgmr.msra.gmra.mrb[16].mxu0 %vm1055_vm1, %v8339_v46  ;;  %9070 = vst [vmem:[#allocation27_spill] sm:$0xff] %v8402_v44 }
  0xb7   : > { %6647 = vmatmul.mubr.msk.f32.vlgmr.msra.gmra.mrb[16].mxu1 %vm1055_vm1, %v8345_v2  ;;  %7265 = vmatpush3.bf16.msra.mxu0 %v8341_v47  ;;  %9071 = vst [vmem:[#allocation28_spill] sm:$0xff] %v8417_v24  ;;  %v6038_v47 = vld [vmem:[%s8002_s15 + $0x3d8] sm:$0xff] }
  0xb8   : > { %7271 = vmatpush3.bf16.msra.mxu1 %v8348_v3  ;;  %7266 = vmatprep.subr.bf16.mxu0 %v7654_v8  ;;  %v6034_v3 = vld [vmem:[%s8002_s15 + $0x3b8] sm:$0xff] }
  0xb9   : > { %7272 = vmatprep.subr.bf16.mxu1 %v7654_v8  ;;  %6657 = vmatprep.mubr.msk.f32.mxu0 %vm7655_vm0, %v9066_v58 }
  0xba   : > { %6668 = vmatprep.mubr.msk.f32.mxu1 %vm7655_vm0, %v9066_v58 }
  0xbb   : > { %7268 = vmatpush3.bf16.msra.mxu0 %v8360_v32  ;;  %v6030_v32 = vld [vmem:[%s8002_s15 + $0x398] sm:$0xff] }
  0xbc   : > { %7274 = vmatpush3.bf16.msra.mxu1 %v8364_v33  ;;  %7275 = vmatprep.subr.bf16.mxu0 %v7654_v8  ;;  %v6026_v33 = vld [vmem:[%s8002_s15 + $0x378] sm:$0xff] }
  0xbd   : > { %7281 = vmatprep.subr.bf16.mxu1 %v7654_v8 }
  0xbe   : > { %6658 = vmatmul.mubr.msk.f32.vlgmr.msra.gmra.mrb[18].mxu0 %vm1055_vm1, %v8377_v11 }
  0xbf   : > { %6669 = vmatmul.mubr.msk.f32.vlgmr.msra.gmra.mrb[18].mxu1 %vm1055_vm1, %v8383_v60  ;;  %7277 = vmatpush3.bf16.msra.mxu0 %v8379_v9  ;;  %v6014_v9 = vld [vmem:[%s8002_s15 + $0x318] sm:$0xff] }
  0xc0   : > { %7283 = vmatpush3.bf16.msra.mxu1 %v8386_v12  ;;  %7278 = vmatprep.subr.bf16.mxu0 %v7654_v8  ;;  %v6010_v12 = vld [vmem:[%s8002_s15 + $0x2f8] sm:$0xff] }
  0xc1   : > { %7284 = vmatprep.subr.bf16.mxu1 %v7654_v8  ;;  %6679 = vmatprep.mubr.msk.f32.mxu0 %vm7655_vm0, %v9066_v58 }
  0xc2   : > { %6690 = vmatprep.mubr.msk.f32.mxu1 %vm7655_vm0, %v9066_v58 }
  0xc3   : > { %7280 = vmatpush3.bf16.msra.mxu0 %v8398_v18  ;;  %v6009_v18 = vld [vmem:[%s8002_s15 + $0x2f0] sm:$0xff] }
  0xc4   : > { %7286 = vmatpush3.bf16.msra.mxu1 %v8402_v44  ;;  %7287 = vmatprep.subr.bf16.mxu0 %v7654_v8  ;;  %v8440_v45 = vpack.c.bf16 %v6010_v12, %v6009_v18  ;;  %v8455_v12 = vpack.c.bf16 %v6012_v50, %v6011_v10  ;;  %v8459_v18 = vld [vmem:[%s8032_s16 + $0x2e] sm:$0x3]  ;;  %v6013_v44 = vld [vmem:[%s8002_s15 + $0x310] sm:$0xff]  ;;  %v6019_v50 = vld [vmem:[%s8002_s15 + $0x340] sm:$0xff] }
  0xc5   : > { %7293 = vmatprep.subr.bf16.mxu1 %v7654_v8 }
  0xc6   : > { %6680 = vmatmul.mubr.msk.f32.vlgmr.msra.gmra.mrb[20].mxu0 %vm1055_vm1, %v8415_v52  ;;  %9074 = vst [vmem:[#allocation31_spill] sm:$0xff] %v8440_v45  ;;  %9075 = vst [vmem:[#allocation32_spill] sm:$0xff] %v8455_v12 }
  0xc7   : > { %6691 = vmatmul.mubr.msk.f32.vlgmr.msra.gmra.mrb[20].mxu1 %vm1055_vm1, %v8421_v30  ;;  %7289 = vmatpush3.bf16.msra.mxu0 %v8417_v24  ;;  %v6015_v24 = vld [vmem:[%s8002_s15 + $0x320] sm:$0xff] }
  0xc8   : > { %7295 = vmatpush3.bf16.msra.mxu1 %v8424_v4  ;;  %7290 = vmatprep.subr.bf16.mxu0 %v7654_v8  ;;  %v8462_v4 = vpack.c.bf16 %v6016_v54, %v6015_v24  ;;  %v8474_v24 = vpack.c.bf16 %v6014_v9, %v6013_v44  ;;  %v6020_v54 = vld [vmem:[%s8002_s15 + $0x348] sm:$0xff]  ;;  %v8491_v44 = vld [vmem:[%s8032_s16 + $0x30] sm:$0x3] }
  0xc9   : > { %7296 = vmatprep.subr.bf16.mxu1 %v7654_v8  ;;  %6701 = vmatprep.mubr.msk.f32.mxu0 %vm7655_vm0, %v9066_v58  ;;  %v6024_v9 = vld [vmem:[%s8002_s15 + $0x368] sm:$0xff] }
  0xca   : > { %6712 = vmatprep.mubr.msk.f32.mxu1 %vm7655_vm0, %v9066_v58  ;;  %9076 = vst [vmem:[#allocation33_spill] sm:$0xff] %v8462_v4  ;;  %9077 = vst [vmem:[#allocation34_spill] sm:$0xff] %v8474_v24 }
  0xcb   : > { %7292 = vmatpush3.bf16.msra.mxu0 %v8436_v6  ;;  %v6017_v6 = vld [vmem:[%s8002_s15 + $0x330] sm:$0xff] }
  0xcc   : > { %7298 = vmatpush3.bf16.msra.mxu1 %v8440_v45  ;;  %7299 = vmatprep.subr.bf16.mxu0 %v7654_v8  ;;  %v8478_v10 = vpack.c.bf16 %v6018_v42, %v6017_v6  ;;  %v8493_v42 = vpack.c.bf16 %v6020_v54, %v6019_v50  ;;  %v8497_v6 = vld [vmem:[%s8032_s16 + $0x32] sm:$0x3]  ;;  %v6027_v54 = vld [vmem:[%s8002_s15 + $0x380] sm:$0xff] }
  0xcd   : > { %7305 = vmatprep.subr.bf16.mxu1 %v7654_v8  ;;  %v6021_v45 = vld [vmem:[%s8002_s15 + $0x350] sm:$0xff] }
  0xce   : > { %6702 = vmatmul.mubr.msk.f32.vlgmr.msra.gmra.mrb[22].mxu0 %vm1055_vm1, %v8453_v56  ;;  %9078 = vst [vmem:[#allocation35_spill] sm:$0xff] %v8478_v10  ;;  %9079 = vst [vmem:[#allocation36_spill] sm:$0xff] %v8493_v42 }
  0xcf   : > { %6713 = vmatmul.mubr.msk.f32.vlgmr.msra.gmra.mrb[22].mxu1 %vm1055_vm1, %v8459_v18  ;;  %7301 = vmatpush3.bf16.msra.mxu0 %v8455_v12  ;;  %v6023_v12 = vld [vmem:[%s8002_s15 + $0x360] sm:$0xff] }
  0xd0   : > { %7307 = vmatpush3.bf16.msra.mxu1 %v8462_v4  ;;  %7302 = vmatprep.subr.bf16.mxu0 %v7654_v8  ;;  %v8500_v4 = vpack.c.bf16 %v6024_v9, %v6023_v12  ;;  %v8512_v12 = vpack.c.bf16 %v6022_v40, %v6021_v45  ;;  %v6028_v9 = vld [vmem:[%s8002_s15 + $0x388] sm:$0xff]  ;;  %v8529_v45 = vld [vmem:[%s8032_s16 + $0x34] sm:$0x3] }
  0xd1   : > { %7308 = vmatprep.subr.bf16.mxu1 %v7654_v8  ;;  %6723 = vmatprep.mubr.msk.f32.mxu0 %vm7655_vm0, %v9066_v58  ;;  %v6032_v40 = vld [vmem:[%s8002_s15 + $0x3a8] sm:$0xff] }
  0xd2   : > { %6734 = vmatprep.mubr.msk.f32.mxu1 %vm7655_vm0, %v9066_v58  ;;  %9080 = vst [vmem:[#allocation37_spill] sm:$0xff] %v8500_v4  ;;  %9081 = vst [vmem:[#allocation38_spill] sm:$0xff] %v8512_v12 }
  0xd3   : > { %7304 = vmatpush3.bf16.msra.mxu0 %v8474_v24  ;;  %v6025_v24 = vld [vmem:[%s8002_s15 + $0x370] sm:$0xff] }
  0xd4   : > { %7310 = vmatpush3.bf16.msra.mxu1 %v8478_v10  ;;  %7311 = vmatprep.subr.bf16.mxu0 %v7654_v8  ;;  %v8516_v50 = vpack.c.bf16 %v6026_v33, %v6025_v24  ;;  %v8531_v33 = vpack.c.bf16 %v6028_v9, %v6027_v54  ;;  %v8535_v24 = vld [vmem:[%s8032_s16 + $0x36] sm:$0x3]  ;;  %v6035_v9 = vld [vmem:[%s8002_s15 + $0x3c0] sm:$0xff] }
  0xd5   : > { %7317 = vmatprep.subr.bf16.mxu1 %v7654_v8  ;;  %v6029_v10 = vld [vmem:[%s8002_s15 + $0x390] sm:$0xff] }
  0xd6   : > { %6724 = vmatmul.mubr.msk.f32.vlgmr.msra.gmra.mrb[24].mxu0 %vm1055_vm1, %v8491_v44  ;;  %9082 = vst [vmem:[#allocation39_spill] sm:$0xff] %v8516_v50  ;;  %9083 = vst [vmem:[#allocation40_spill] sm:$0xff] %v8531_v33 }
  0xd7   : > { %6735 = vmatmul.mubr.msk.f32.vlgmr.msra.gmra.mrb[24].mxu1 %vm1055_vm1, %v8497_v6  ;;  %7313 = vmatpush3.bf16.msra.mxu0 %v8493_v42  ;;  %v6031_v42 = vld [vmem:[%s8002_s15 + $0x3a0] sm:$0xff] }
  0xd8   : > { %7319 = vmatpush3.bf16.msra.mxu1 %v8500_v4  ;;  %7314 = vmatprep.subr.bf16.mxu0 %v7654_v8  ;;  %v8538_v4 = vpack.c.bf16 %v6032_v40, %v6031_v42  ;;  %v8550_v42 = vpack.c.bf16 %v6030_v32, %v6029_v10  ;;  %v6036_v40 = vld [vmem:[%s8002_s15 + $0x3c8] sm:$0xff]  ;;  %v8567_v10 = vld [vmem:[%s8032_s16 + $0x38] sm:$0x3] }
  0xd9   : > { %7320 = vmatprep.subr.bf16.mxu1 %v7654_v8  ;;  %6745 = vmatprep.mubr.msk.f32.mxu0 %vm7655_vm0, %v9066_v58  ;;  %v6040_v32 = vld [vmem:[%s8002_s15 + $0x3e8] sm:$0xff] }
  0xda   : > { %6756 = vmatprep.mubr.msk.f32.mxu1 %vm7655_vm0, %v9066_v58  ;;  %9084 = vst [vmem:[#allocation41_spill] sm:$0xff] %v8538_v4  ;;  %9085 = vst [vmem:[#allocation42_spill] sm:$0xff] %v8550_v42 }
  0xdb   : > { %7316 = vmatpush3.bf16.msra.mxu0 %v8512_v12  ;;  %v6033_v12 = vld [vmem:[%s8002_s15 + $0x3b0] sm:$0xff] }
  0xdc   : > { %7322 = vmatpush3.bf16.msra.mxu1 %v8516_v50  ;;  %7323 = vmatprep.subr.bf16.mxu0 %v7654_v8  ;;  %v8554_v54 = vpack.c.bf16 %v6034_v3, %v6033_v12  ;;  %v8569_v3 = vpack.c.bf16 %v6036_v40, %v6035_v9  ;;  %v8573_v12 = vld [vmem:[%s8032_s16 + $0x3a] sm:$0x3]  ;;  %v6037_v50 = vld [vmem:[%s8002_s15 + $0x3d0] sm:$0xff]  ;;  %v8601_v40 = vld [vmem:[%s8032_s16 + $0x3c] sm:$0x3] }
  0xdd   : > { %7329 = vmatprep.subr.bf16.mxu1 %v7654_v8  ;;  %v8588_v9 = vpack.c.bf16 %v6038_v47, %v6037_v50  ;;  %v8605_v47 = vld [vmem:[%s8032_s16 + $0x3e] sm:$0x3] }
  0xde   : > { %6746 = vmatmul.mubr.msk.f32.vlgmr.msra.gmra.mrb[26].mxu0 %vm1055_vm1, %v8529_v45 }
  0xdf   : > { %6757 = vmatmul.mubr.msk.f32.vlgmr.msra.gmra.mrb[26].mxu1 %vm1055_vm1, %v8535_v24  ;;  %7325 = vmatpush3.bf16.msra.mxu0 %v8531_v33  ;;  %v6039_v33 = vld [vmem:[%s8002_s15 + $0x3e0] sm:$0xff] }
  0xe0   : > { %7331 = vmatpush3.bf16.msra.mxu1 %v8538_v4  ;;  %7326 = vmatprep.subr.bf16.mxu0 %v7654_v8  ;;  %v8576_v4 = vpack.c.bf16 %v6040_v32, %v6039_v33 }
  0xe1   : > { %7332 = vmatprep.subr.bf16.mxu1 %v7654_v8  ;;  %6767 = vmatprep.mubr.msk.f32.mxu0 %vm7655_vm0, %v9066_v58 }
  0xe2   : > { %6778 = vmatprep.mubr.msk.f32.mxu1 %vm7655_vm0, %v9066_v58 }
  0xe3   : > { %7328 = vmatpush3.bf16.msra.mxu0 %v8550_v42  ;;  %v6042_v42 = vld [vmem:[%s8002_s15 + $0x3f8] sm:$0xff] }
  0xe4   : > { %7334 = vmatpush3.bf16.msra.mxu1 %v8554_v54  ;;  %7335 = vmatprep.subr.bf16.mxu0 %v7654_v8  ;;  %v8592_v33 = vpack.c.bf16 %v6042_v42, %v6041_v28  ;;  %v9092_v28 = vld [vmem:[#allocation7_spill] sm:$0xff]  ;;  %v9121_v42 = vld [vmem:[#allocation17_spill] sm:$0xff] }
  0xe5   : > { %7341 = vmatprep.subr.bf16.mxu1 %v7654_v8 }
  0xe6   : > { %6768 = vmatmul.mubr.msk.f32.vlgmr.msra.gmra.mrb[28].mxu0 %vm1055_vm1, %v8567_v10 }
  0xe7   : > { %6779 = vmatmul.mubr.msk.f32.vlgmr.msra.gmra.mrb[28].mxu1 %vm1055_vm1, %v8573_v12  ;;  %7337 = vmatpush3.bf16.msra.mxu0 %v8569_v3 }
  0xe8   : > { %7343 = vmatpush3.bf16.msra.mxu1 %v8576_v4  ;;  %7338 = vmatprep.subr.bf16.mxu0 %v7654_v8 }
  0xe9   : > { %7344 = vmatprep.subr.bf16.mxu1 %v7654_v8  ;;  %6789 = vmatprep.mubr.msk.f32.mxu0 %vm7655_vm0, %v9066_v58 }
  0xea   : > { %6800 = vmatprep.mubr.msk.f32.mxu1 %vm7655_vm0, %v9066_v58 }
  0xeb   : > { %7340 = vmatpush3.bf16.msra.mxu0 %v8588_v9 }
  0xec   : > { %7346 = vmatpush3.bf16.msra.mxu1 %v8592_v33  ;;  %7347 = vmatprep.subr.bf16.mxu0 %v7654_v8 }
  0xed   : > { %7353 = vmatprep.subr.bf16.mxu1 %v7654_v8 }
  0xee   : > { %6790 = vmatmul.mubr.msk.f32.vlgmr.msra.gmra.mrb[30].mxu0 %vm1055_vm1, %v8601_v40 }
  0xef   : > { %6801 = vmatmul.mubr.msk.f32.vlgmr.msra.gmra.mrb[30].mxu1 %vm1055_vm1, %v8605_v47  ;;  %7349 = vmatpush3.bf16.msra.mxu0 %v8007_v13  ;;  %v9086_v13 = vld [vmem:[#allocation5_spill] sm:$0xff] }
  0xf0   : > { %7355 = vmatpush3.bf16.msra.mxu1 %v8014_v17  ;;  %7350 = vmatprep.subr.bf16.mxu0 %v7654_v8  ;;  %v9087_v17 = vld [vmem:[#allocation20_spill] sm:$0xff] }
  0xf1   : > { %7356 = vmatprep.subr.bf16.mxu1 %v7654_v8  ;;  %6811 = vmatprep.mubr.msk.f32.mxu0 %vm7655_vm0, %v9066_v58 }
  0xf2   : > { %6822 = vmatprep.mubr.msk.f32.mxu1 %vm7655_vm0, %v9066_v58 }
  0xf3   : > { %7352 = vmatpush3.bf16.msra.mxu0 %v8019_v20  ;;  %v9088_v20 = vld [vmem:[#allocation21_spill] sm:$0xff] }
  0xf4   : > { %7358 = vmatpush3.bf16.msra.mxu1 %v8023_v21  ;;  %7359 = vmatprep.subr.bf16.mxu0 %v7654_v8  ;;  %v9089_v21 = vld [vmem:[#allocation22_spill] sm:$0xff] }
  0xf5   : > { %7365 = vmatprep.subr.bf16.mxu1 %v7654_v8 }
  0xf6   : > { %6812 = vmatmul.mubr.msk.f32.vlgmr.msra.gmra.mrb[32].mxu0 %vm1055_vm1, %v8339_v46 }
  0xf7   : > { %6823 = vmatmul.mubr.msk.f32.vlgmr.msra.gmra.mrb[32].mxu1 %vm1055_vm1, %v8345_v2  ;;  %7361 = vmatpush3.bf16.msra.mxu0 %v8037_v27  ;;  %v9091_v27 = vld [vmem:[#allocation6_spill] sm:$0xff] }
  0xf8   : > { %7367 = vmatpush3.bf16.msra.mxu1 %v8044_v29  ;;  %7362 = vmatprep.subr.bf16.mxu0 %v7654_v8  ;;  %v9093_v29 = vld [vmem:[#allocation24_spill] sm:$0xff]  ;;  %v9113_v2 = vld [vmem:[#allocation38_spill] sm:$0xff] }
  0xf9   : > { %7368 = vmatprep.subr.bf16.mxu1 %v7654_v8  ;;  %6833 = vmatprep.mubr.msk.f32.mxu0 %vm7655_vm0, %v9066_v58 }
  0xfa   : > { %6844 = vmatprep.mubr.msk.f32.mxu1 %vm7655_vm0, %v9066_v58 }
  0xfb   : > { %7364 = vmatpush3.bf16.msra.mxu0 %v8056_v34  ;;  %v9094_v34 = vld [vmem:[#allocation25_spill] sm:$0xff] }
  0xfc   : > { %7370 = vmatpush3.bf16.msra.mxu1 %v8060_v35  ;;  %7371 = vmatprep.subr.bf16.mxu0 %v7654_v8  ;;  %v9095_v35 = vld [vmem:[#allocation26_spill] sm:$0xff] }
  0xfd   : > { %7377 = vmatprep.subr.bf16.mxu1 %v7654_v8 }
  0xfe   : > { %6834 = vmatmul.mubr.msk.f32.vlgmr.msra.gmra.mrb[34].mxu0 %vm1055_vm1, %v8377_v11  ;;  %v9114_v11 = vld [vmem:[#allocation39_spill] sm:$0xff] }
  0xff   : > { %6845 = vmatmul.mubr.msk.f32.vlgmr.msra.gmra.mrb[34].mxu1 %vm1055_vm1, %v8383_v60  ;;  %7373 = vmatpush3.bf16.msra.mxu0 %v8075_v41  ;;  %v9096_v41 = vld [vmem:[#allocation27_spill] sm:$0xff]  ;;  %v9115_v60 = vld [vmem:[#allocation14_spill] sm:$0xff] }
 0x100   : > { %7379 = vmatpush3.bf16.msra.mxu1 %v8082_v43  ;;  %7374 = vmatprep.subr.bf16.mxu0 %v7654_v8  ;;  %v9097_v43 = vld [vmem:[#allocation8_spill] sm:$0xff] }
 0x101   : > { %7380 = vmatprep.subr.bf16.mxu1 %v7654_v8  ;;  %6855 = vmatprep.mubr.msk.f32.mxu0 %vm7655_vm0, %v9066_v58 }
 0x102   : > { %6866 = vmatprep.mubr.msk.f32.mxu1 %vm7655_vm0, %v9066_v58 }
 0x103   : > { %7376 = vmatpush3.bf16.msra.mxu0 %v8094_v48  ;;  %v9098_v48 = vld [vmem:[#allocation9_spill] sm:$0xff] }
 0x104   : > { %7382 = vmatpush3.bf16.msra.mxu1 %v8098_v49  ;;  %7383 = vmatprep.subr.bf16.mxu0 %v7654_v8  ;;  %v9099_v49 = vld [vmem:[#allocation28_spill] sm:$0xff] }
 0x105   : > { %7389 = vmatprep.subr.bf16.mxu1 %v7654_v8 }
 0x106   : > { %6856 = vmatmul.mubr.msk.f32.vlgmr.msra.gmra.mrb[36].mxu0 %vm1055_vm1, %v8415_v52  ;;  %v9116_v52 = vld [vmem:[#allocation15_spill] sm:$0xff] }
 0x107   : > { %6867 = vmatmul.mubr.msk.f32.vlgmr.msra.gmra.mrb[36].mxu1 %vm1055_vm1, %v8421_v30  ;;  %7385 = vmatpush3.bf16.msra.mxu0 %v8113_v55  ;;  %v9100_v55 = vld [vmem:[#allocation29_spill] sm:$0xff]  ;;  %v9117_v30 = vld [vmem:[#allocation40_spill] sm:$0xff] }
 0x108   : > { %7391 = vmatpush3.bf16.msra.mxu1 %v8120_v57  ;;  %7386 = vmatprep.subr.bf16.mxu0 %v7654_v8 }
 0x109   : > { %7392 = vmatprep.subr.bf16.mxu1 %v7654_v8  ;;  %6877 = vmatprep.mubr.msk.f32.mxu0 %vm7655_vm0, %v9066_v58 }
 0x10a   : > { %6888 = vmatprep.mubr.msk.f32.mxu1 %vm7655_vm0, %v9066_v58 }
 0x10b   : > { %7388 = vmatpush3.bf16.msra.mxu0 %v8132_v62 }
 0x10c   : > { %7394 = vmatpush3.bf16.msra.mxu1 %v8136_v63  ;;  %7395 = vmatprep.subr.bf16.mxu0 %v7654_v8 }
 0x10d   : > { %7401 = vmatprep.subr.bf16.mxu1 %v7654_v8 }
 0x10e   : > { %6878 = vmatmul.mubr.msk.f32.vlgmr.msra.gmra.mrb[38].mxu0 %vm1055_vm1, %v8453_v56  ;;  %v9118_v56 = vld [vmem:[#allocation41_spill] sm:$0xff] }
 0x10f   : > { %6889 = vmatmul.mubr.msk.f32.vlgmr.msra.gmra.mrb[38].mxu1 %vm1055_vm1, %v8459_v18  ;;  %7397 = vmatpush3.bf16.msra.mxu0 %v8151_v5 }
 0x110   : > { %7403 = vmatpush3.bf16.msra.mxu1 %v8158_v7  ;;  %7398 = vmatprep.subr.bf16.mxu0 %v7654_v8  ;;  %v9101_v7 = vld [vmem:[#allocation30_spill] sm:$0xff] }
 0x111   : > { %7404 = vmatprep.subr.bf16.mxu1 %v7654_v8  ;;  %6899 = vmatprep.mubr.msk.f32.mxu0 %vm7655_vm0, %v9066_v58 }
 0x112   : > { %6910 = vmatprep.mubr.msk.f32.mxu1 %vm7655_vm0, %v9066_v58 }
 0x113   : > { %7400 = vmatpush3.bf16.msra.mxu0 %v8170_v15  ;;  %v9102_v15 = vld [vmem:[#allocation31_spill] sm:$0xff] }
 0x114   : > { %7406 = vmatpush3.bf16.msra.mxu1 %v8174_v16  ;;  %7407 = vmatprep.subr.bf16.mxu0 %v7654_v8  ;;  %v9103_v16 = vld [vmem:[#allocation10_spill] sm:$0xff] }
 0x115   : > { %7413 = vmatprep.subr.bf16.mxu1 %v7654_v8 }
 0x116   : > { %6900 = vmatmul.mubr.msk.f32.vlgmr.msra.gmra.mrb[40].mxu0 %vm1055_vm1, %v8491_v44 }
 0x117   : > { %6911 = vmatmul.mubr.msk.f32.vlgmr.msra.gmra.mrb[40].mxu1 %vm1055_vm1, %v8497_v6  ;;  %7409 = vmatpush3.bf16.msra.mxu0 %v8189_v25  ;;  %v9104_v25 = vld [vmem:[#allocation11_spill] sm:$0xff] }
 0x118   : > { %7415 = vmatpush3.bf16.msra.mxu1 %v8196_v31  ;;  %7410 = vmatprep.subr.bf16.mxu0 %v7654_v8  ;;  %v9105_v31 = vld [vmem:[#allocation32_spill] sm:$0xff] }
 0x119   : > { %7416 = vmatprep.subr.bf16.mxu1 %v7654_v8  ;;  %6921 = vmatprep.mubr.msk.f32.mxu0 %vm7655_vm0, %v9066_v58 }
 0x11a   : > { %6932 = vmatprep.mubr.msk.f32.mxu1 %vm7655_vm0, %v9066_v58 }
 0x11b   : > { %7412 = vmatpush3.bf16.msra.mxu0 %v8208_v38  ;;  %v9106_v38 = vld [vmem:[#allocation33_spill] sm:$0xff] }
 0x11c   : > { %7418 = vmatpush3.bf16.msra.mxu1 %v8212_v39  ;;  %7419 = vmatprep.subr.bf16.mxu0 %v7654_v8 }
 0x11d   : > { %7425 = vmatprep.subr.bf16.mxu1 %v7654_v8 }
 0x11e   : > { %6922 = vmatmul.mubr.msk.f32.vlgmr.msra.gmra.mrb[42].mxu0 %vm1055_vm1, %v8529_v45  ;;  %v9119_v45 = vld [vmem:[#allocation42_spill] sm:$0xff] }
 0x11f   : > { %6933 = vmatmul.mubr.msk.f32.vlgmr.msra.gmra.mrb[42].mxu1 %vm1055_vm1, %v8535_v24  ;;  %7421 = vmatpush3.bf16.msra.mxu0 %v8227_v51  ;;  %v9120_v24 = vld [vmem:[#allocation16_spill] sm:$0xff] }
 0x120   : > { %7427 = vmatpush3.bf16.msra.mxu1 %v8234_v53  ;;  %7422 = vmatprep.subr.bf16.mxu0 %v7654_v8 }
 0x121   : > { %7428 = vmatprep.subr.bf16.mxu1 %v7654_v8  ;;  %6943 = vmatprep.mubr.msk.f32.mxu0 %vm7655_vm0, %v9066_v58 }
 0x122   : > { %6954 = vmatprep.mubr.msk.f32.mxu1 %vm7655_vm0, %v9066_v58 }
 0x123   : > { %7424 = vmatpush3.bf16.msra.mxu0 %v8246_v0 }
 0x124   : > { %7430 = vmatpush3.bf16.msra.mxu1 %v8250_v1  ;;  %7431 = vmatprep.subr.bf16.mxu0 %v7654_v8  ;;  %v9107_v1 = vld [vmem:[#allocation34_spill] sm:$0xff] }
 0x125   : > { %7437 = vmatprep.subr.bf16.mxu1 %v7654_v8 }
 0x126   : > { %6944 = vmatmul.mubr.msk.f32.vlgmr.msra.gmra.mrb[44].mxu0 %vm1055_vm1, %v8567_v10 }
 0x127   : > { %6955 = vmatmul.mubr.msk.f32.vlgmr.msra.gmra.mrb[44].mxu1 %vm1055_vm1, %v8573_v12  ;;  %7433 = vmatpush3.bf16.msra.mxu0 %v8265_v14  ;;  %v9108_v14 = vld [vmem:[#allocation35_spill] sm:$0xff] }
 0x128   : > { %7439 = vmatpush3.bf16.msra.mxu1 %v8272_v19  ;;  %7434 = vmatprep.subr.bf16.mxu0 %v7654_v8  ;;  %v9109_v19 = vld [vmem:[#allocation12_spill] sm:$0xff] }
 0x129   : > { %7440 = vmatprep.subr.bf16.mxu1 %v7654_v8  ;;  %6965 = vmatprep.mubr.msk.f32.mxu0 %vm7655_vm0, %v9066_v58 }
 0x12a   : > { %6976 = vmatprep.mubr.msk.f32.mxu1 %vm7655_vm0, %v9066_v58 }
 0x12b   : > { %7436 = vmatpush3.bf16.msra.mxu0 %v8284_v36  ;;  %v9110_v36 = vld [vmem:[#allocation13_spill] sm:$0xff] }
 0x12c   : > { %7442 = vmatpush3.bf16.msra.mxu1 %v8288_v37  ;;  %7443 = vmatprep.subr.bf16.mxu0 %v7654_v8  ;;  %v9111_v37 = vld [vmem:[#allocation36_spill] sm:$0xff] }
 0x12d   : > { %7449 = vmatprep.subr.bf16.mxu1 %v7654_v8 }
 0x12e   : > { %6966 = vmatmul.mubr.msk.f32.vlgmr.msra.gmra.mrb[46].mxu0 %vm1055_vm1, %v8601_v40 }
 0x12f   : > { %6977 = vmatmul.mubr.msk.f32.vlgmr.msra.gmra.mrb[46].mxu1 %vm1055_vm1, %v8605_v47  ;;  %7445 = vmatpush3.bf16.msra.mxu0 %v8303_v59  ;;  %v9112_v59 = vld [vmem:[#allocation37_spill] sm:$0xff] }
 0x130   : > { %7451 = vmatpush3.bf16.msra.mxu1 %v8310_v61  ;;  %7446 = vmatprep.subr.bf16.mxu0 %v7654_v8 }
 0x131   : > { %7452 = vmatprep.subr.bf16.mxu1 %v7654_v8  ;;  %6987 = vmatprep.mubr.msk.f32.mxu0 %vm7655_vm0, %v9066_v58 }
 0x132   : > { %6998 = vmatprep.mubr.msk.f32.mxu1 %vm7655_vm0, %v9066_v58 }
 0x133   : > { %7448 = vmatpush3.bf16.msra.mxu0 %v8322_v22 }
 0x134   : > { %7454 = vmatpush3.bf16.msra.mxu1 %v8326_v23  ;;  %7455 = vmatprep.subr.bf16.mxu0 %v7654_v8 }
 0x135   : > { %7461 = vmatprep.subr.bf16.mxu1 %v7654_v8 }
 0x136   : > { %6988 = vmatmul.mubr.msk.f32.vlgmr.msra.gmra.mrb[32].mxu0 %vm1055_vm1, %v8035_v26  ;;  %v9090_v26 = vld [vmem:[#allocation23_spill] sm:$0xff] }
 0x137   : > { %6999 = vmatmul.mubr.msk.f32.vlgmr.msra.gmra.mrb[32].mxu1 %vm1055_vm1, %v9086_v13  ;;  %7457 = vmatpush3.bf16.msra.mxu0 %v9087_v17 }
 0x138   : > { %7463 = vmatpush3.bf16.msra.mxu1 %v9088_v20  ;;  %7458 = vmatprep.subr.bf16.mxu0 %v7654_v8 }
 0x139   : > { %7464 = vmatprep.subr.bf16.mxu1 %v7654_v8  ;;  %7009 = vmatprep.mubr.msk.f32.mxu0 %vm7655_vm0, %v9066_v58 }
 0x13a   : > { %7020 = vmatprep.mubr.msk.f32.mxu1 %vm7655_vm0, %v9066_v58 }
 0x13b   : > { %7460 = vmatpush3.bf16.msra.mxu0 %v9089_v21 }
 0x13c   : > { %7466 = vmatpush3.bf16.msra.mxu1 %v9090_v26  ;;  %7467 = vmatprep.subr.bf16.mxu0 %v7654_v8 }
 0x13d   : > { %7473 = vmatprep.subr.bf16.mxu1 %v7654_v8 }
 0x13e   : > { %7010 = vmatmul.mubr.msk.f32.vlgmr.msra.gmra.mrb[34].mxu0 %vm1055_vm1, %v9091_v27 }
 0x13f   : > { %7021 = vmatmul.mubr.msk.f32.vlgmr.msra.gmra.mrb[34].mxu1 %vm1055_vm1, %v9092_v28  ;;  %7469 = vmatpush3.bf16.msra.mxu0 %v9093_v29 }
 0x140   : > { %7475 = vmatpush3.bf16.msra.mxu1 %v9094_v34  ;;  %7470 = vmatprep.subr.bf16.mxu0 %v7654_v8 }
 0x141   : > { %7476 = vmatprep.subr.bf16.mxu1 %v7654_v8  ;;  %7031 = vmatprep.mubr.msk.f32.mxu0 %vm7655_vm0, %v9066_v58 }
 0x142   : > { %7042 = vmatprep.mubr.msk.f32.mxu1 %vm7655_vm0, %v9066_v58 }
 0x143   : > { %7472 = vmatpush3.bf16.msra.mxu0 %v9095_v35 }
 0x144   : > { %7478 = vmatpush3.bf16.msra.mxu1 %v9096_v41  ;;  %7479 = vmatprep.subr.bf16.mxu0 %v7654_v8 }
 0x145   : > { %7485 = vmatprep.subr.bf16.mxu1 %v7654_v8 }
 0x146   : > { %7032 = vmatmul.mubr.msk.f32.vlgmr.msra.gmra.mrb[36].mxu0 %vm1055_vm1, %v9097_v43 }
 0x147   : > { %7043 = vmatmul.mubr.msk.f32.vlgmr.msra.gmra.mrb[36].mxu1 %vm1055_vm1, %v9098_v48  ;;  %7481 = vmatpush3.bf16.msra.mxu0 %v9099_v49 }
 0x148   : > { %7487 = vmatpush3.bf16.msra.mxu1 %v9100_v55  ;;  %7482 = vmatprep.subr.bf16.mxu0 %v7654_v8 }
 0x149   : > { %v8792_v57 = vpop.f32.mrb[0].mxu0  ;;  %7488 = vmatprep.subr.bf16.mxu1 %v7654_v8  ;;  %7053 = vmatprep.mubr.msk.f32.mxu0 %vm7655_vm0, %v9066_v58 }
 0x14a   : > { %v8797_v62 = vpop.f32.mrb[0].mxu1  ;;  %v6461_v63 = vpop.f32.mrb[1].mxu0  ;;  %7064 = vmatprep.mubr.msk.f32.mxu1 %vm7655_vm0, %v9066_v58 }
 0x14b   : > { %v6472_v5 = vpop.f32.mrb[1].mxu1  ;;  %7484 = vmatpush3.bf16.msra.mxu0 %v9101_v7 }
 0x14c   : > { %7490 = vmatpush3.bf16.msra.mxu1 %v9102_v15  ;;  %7491 = vmatprep.subr.bf16.mxu0 %v7654_v8 }
 0x14d   : > { %7497 = vmatprep.subr.bf16.mxu1 %v7654_v8 }
 0x14e   : > { %7054 = vmatmul.mubr.msk.f32.vlgmr.msra.gmra.mrb[38].mxu0 %vm1055_vm1, %v9103_v16 }
 0x14f   : > { %7065 = vmatmul.mubr.msk.f32.vlgmr.msra.gmra.mrb[38].mxu1 %vm1055_vm1, %v9104_v25  ;;  %7493 = vmatpush3.bf16.msra.mxu0 %v9105_v31 }
 0x150   : > { %7499 = vmatpush3.bf16.msra.mxu1 %v9106_v38  ;;  %7494 = vmatprep.subr.bf16.mxu0 %v7654_v8 }
 0x151   : > { %v8812_v39 = vpop.f32.mrb[2].mxu0  ;;  %7500 = vmatprep.subr.bf16.mxu1 %v7654_v8  ;;  %7075 = vmatprep.mubr.msk.f32.mxu0 %vm7655_vm0, %v9066_v58 }
 0x152   : > { %v8817_v51 = vpop.f32.mrb[2].mxu1  ;;  %v6483_v53 = vpop.f32.mrb[3].mxu0  ;;  %7086 = vmatprep.mubr.msk.f32.mxu1 %vm7655_vm0, %v9066_v58 }
 0x153   : > { %v6494_v0 = vpop.f32.mrb[3].mxu1  ;;  %7496 = vmatpush3.bf16.msra.mxu0 %v9107_v1 }
 0x154   : > { %7502 = vmatpush3.bf16.msra.mxu1 %v9108_v14  ;;  %7503 = vmatprep.subr.bf16.mxu0 %v7654_v8 }
 0x155   : > { %7509 = vmatprep.subr.bf16.mxu1 %v7654_v8 }
 0x156   : > { %7076 = vmatmul.mubr.msk.f32.vlgmr.msra.gmra.mrb[40].mxu0 %vm1055_vm1, %v9109_v19 }
 0x157   : > { %7087 = vmatmul.mubr.msk.f32.vlgmr.msra.gmra.mrb[40].mxu1 %vm1055_vm1, %v9110_v36  ;;  %7505 = vmatpush3.bf16.msra.mxu0 %v9111_v37 }
 0x158   : > { %7511 = vmatpush3.bf16.msra.mxu1 %v9112_v59  ;;  %7506 = vmatprep.subr.bf16.mxu0 %v7654_v8 }
 0x159   : > { %v8832_v61 = vpop.f32.mrb[4].mxu0  ;;  %7512 = vmatprep.subr.bf16.mxu1 %v7654_v8  ;;  %7097 = vmatprep.mubr.msk.f32.mxu0 %vm7655_vm0, %v9066_v58 }
 0x15a   : > { %v8837_v22 = vpop.f32.mrb[4].mxu1  ;;  %v6505_v23 = vpop.f32.mrb[5].mxu0  ;;  %7108 = vmatprep.mubr.msk.f32.mxu1 %vm7655_vm0, %v9066_v58 }
 0x15b   : > { %v6516_v46 = vpop.f32.mrb[5].mxu1  ;;  %7508 = vmatpush3.bf16.msra.mxu0 %v9113_v2 }
 0x15c   : > { %7514 = vmatpush3.bf16.msra.mxu1 %v9114_v11  ;;  %7515 = vmatprep.subr.bf16.mxu0 %v7654_v8 }
 0x15d   : > { %7521 = vmatprep.subr.bf16.mxu1 %v7654_v8 }
 0x15e   : > { %7098 = vmatmul.mubr.msk.f32.vlgmr.msra.gmra.mrb[42].mxu0 %vm1055_vm1, %v9115_v60 }
 0x15f   : > { %7109 = vmatmul.mubr.msk.f32.vlgmr.msra.gmra.mrb[42].mxu1 %vm1055_vm1, %v9116_v52  ;;  %7517 = vmatpush3.bf16.msra.mxu0 %v9117_v30 }
 0x160   : > { %7523 = vmatpush3.bf16.msra.mxu1 %v9118_v56  ;;  %7518 = vmatprep.subr.bf16.mxu0 %v7654_v8 }
 0x161   : > { %v8852_v18 = vpop.f32.mrb[6].mxu0  ;;  %7524 = vmatprep.subr.bf16.mxu1 %v7654_v8  ;;  %7119 = vmatprep.mubr.msk.f32.mxu0 %vm7655_vm0, %v9066_v58 }
 0x162   : > { %v8857_v44 = vpop.f32.mrb[6].mxu1  ;;  %v6527_v6 = vpop.f32.mrb[7].mxu0  ;;  %7130 = vmatprep.mubr.msk.f32.mxu1 %vm7655_vm0, %v9066_v58 }
 0x163   : > { %v6538_v50 = vpop.f32.mrb[7].mxu1  ;;  %7520 = vmatpush3.bf16.msra.mxu0 %v9119_v45 }
 0x164   : > { %7526 = vmatpush3.bf16.msra.mxu1 %v8554_v54  ;;  %7527 = vmatprep.subr.bf16.mxu0 %v7654_v8 }
 0x165   : > { %7533 = vmatprep.subr.bf16.mxu1 %v7654_v8 }
 0x166   : > { %7120 = vmatmul.mubr.msk.f32.vlgmr.msra.gmra.mrb[44].mxu0 %vm1055_vm1, %v9120_v24 }
 0x167   : > { %7131 = vmatmul.mubr.msk.f32.vlgmr.msra.gmra.mrb[44].mxu1 %vm1055_vm1, %v9121_v42  ;;  %7529 = vmatpush3.bf16.msra.mxu0 %v8569_v3  ;;  %v9123_v3 = vld [vmem:[#allocation19_spill] sm:$0xff] }
 0x168   : > { %7535 = vmatpush3.bf16.msra.mxu1 %v8576_v4  ;;  %7530 = vmatprep.subr.bf16.mxu0 %v7654_v8  ;;  %v9122_v4 = vld [vmem:[#allocation18_spill] sm:$0xff] }
 0x169   : > { %v8872_v32 = vpop.f32.mrb[8].mxu0  ;;  %7536 = vmatprep.subr.bf16.mxu1 %v7654_v8  ;;  %7141 = vmatprep.mubr.msk.f32.mxu0 %vm7655_vm0, %v9066_v58 }
 0x16a   : > { %v1782_v54 = vpop.f32.mrb[8].mxu1  ;;  %v6549_v10 = vpop.f32.mrb[9].mxu0  ;;  %7152 = vmatprep.mubr.msk.f32.mxu1 %vm7655_vm0, %v9066_v58 }
 0x16b   : > { %v6560_v12 = vpop.f32.mrb[9].mxu1  ;;  %7532 = vmatpush3.bf16.msra.mxu0 %v8588_v9 }
 0x16c   : > { %7538 = vmatpush3.bf16.msra.mxu1 %v8592_v33 }
 0x16e   : > { %7142 = vmatmul.mubr.msk.f32.vlgmr.msra.gmra.mrb[46].mxu0 %vm1055_vm1, %v9122_v4 }
 0x16f   : > { %7153 = vmatmul.mubr.msk.f32.vlgmr.msra.gmra.mrb[46].mxu1 %vm1055_vm1, %v9123_v3 }
 0x171   : > { %v1855_v8 = vpop.f32.mrb[10].mxu0 }
 0x172   : > { %v1928_v40 = vpop.f32.mrb[10].mxu1  ;;  %v6571_v47 = vpop.f32.mrb[11].mxu0 }
 0x173   : > { %v6582_v13 = vpop.f32.mrb[11].mxu1 }
 0x179   : > { %v8885_v17 = vpop.f32.mrb[12].mxu0 }
 0x17a   : > { %v8887_v20 = vpop.f32.mrb[12].mxu1  ;;  %v6593_v58 = vpop.f32.mrb[13].mxu0 }
 0x17b   : > { %v6604_v21 = vpop.f32.mrb[13].mxu1 }
 0x181   : > { %v8889_v9 = vpop.f32.mrb[14].mxu0 }
 0x182   : > { %v8891_v33 = vpop.f32.mrb[14].mxu1  ;;  %v6615_v26 = vpop.f32.mrb[15].mxu0 }
 0x183   : > { %v6626_v27 = vpop.f32.mrb[15].mxu1 }
 0x189   : > { %v2293_v28 = vpop.f32.mrb[16].mxu0 }
 0x18a   : > { %v4512_v29 = vsub.f32 %v8792_v57, %v2293_v28  ;;  %v2366_v34 = vpop.f32.mrb[16].mxu1  ;;  %v6637_v35 = vpop.f32.mrb[17].mxu0 }
 0x18b   : > { %v4513_v41 = vsub.f32 %v8797_v62, %v2366_v34  ;;  %v6648_v43 = vpop.f32.mrb[17].mxu1 }
 0x18c   : > { %4529 = vst.msk [vmem:[%s8896_s17] sm:$0x3] %vm4528_vm2, %v4512_v29 }
 0x18d   : > { %4530 = vst.msk [vmem:[%s8896_s17 + $0x2] sm:$0x3] %vm4528_vm2, %v4513_v41 }
 0x191   : > { %v2439_v48 = vpop.f32.mrb[18].mxu0 }
 0x192   : > { %v4514_v49 = vsub.f32 %v8812_v39, %v2439_v48  ;;  %v2512_v55 = vpop.f32.mrb[18].mxu1  ;;  %v6659_v57 = vpop.f32.mrb[19].mxu0 }
 0x193   : > { %v4515_v62 = vsub.f32 %v8817_v51, %v2512_v55  ;;  %v6670_v63 = vpop.f32.mrb[19].mxu1 }
 0x194   : > { %4531 = vst.msk [vmem:[%s8896_s17 + $0x4] sm:$0x3] %vm4528_vm2, %v4514_v49 }
 0x195   : > { %4532 = vst.msk [vmem:[%s8896_s17 + $0x6] sm:$0x3] %vm4528_vm2, %v4515_v62 }
 0x199   : > { %v2585_v5 = vpop.f32.mrb[20].mxu0 }
 0x19a   : > { %v4516_v7 = vsub.f32 %v8832_v61, %v2585_v5  ;;  %v2658_v15 = vpop.f32.mrb[20].mxu1  ;;  %v6681_v16 = vpop.f32.mrb[21].mxu0 }
 0x19b   : > { %v4517_v25 = vsub.f32 %v8837_v22, %v2658_v15  ;;  %v6692_v31 = vpop.f32.mrb[21].mxu1 }
 0x19c   : > { %4533 = vst.msk [vmem:[%s8896_s17 + $0x8] sm:$0x3] %vm4528_vm2, %v4516_v7 }
 0x19d   : > { %4534 = vst.msk [vmem:[%s8896_s17 + $0xa] sm:$0x3] %vm4528_vm2, %v4517_v25  ;;  %v5709_v25 = vld [vmem:[%s8896_s17] sm:$0xff] (%p7711_p6)  }
 0x19e   : > { %5710 = vst [vmem:[%s5693_s23] sm:$0xff] (%p7711_p6), %v5709_v25  }
 0x1a1   : > { %v2731_v38 = vpop.f32.mrb[22].mxu0 }
 0x1a2   : > { %v4518_v39 = vsub.f32 %v8852_v18, %v2731_v38  ;;  %v2804_v51 = vpop.f32.mrb[22].mxu1  ;;  %v6703_v53 = vpop.f32.mrb[23].mxu0 }
 0x1a3   : > { %v4519_v0 = vsub.f32 %v8857_v44, %v2804_v51  ;;  %v6714_v1 = vpop.f32.mrb[23].mxu1 }
 0x1a4   : > { %4535 = vst.msk [vmem:[%s8896_s17 + $0xc] sm:$0x3] %vm4528_vm2, %v4518_v39 }
 0x1a5   : > { %4536 = vst.msk [vmem:[%s8896_s17 + $0xe] sm:$0x3] %vm4528_vm2, %v4519_v0 }
 0x1a9   : > { %v2877_v14 = vpop.f32.mrb[24].mxu0 }
 0x1aa   : > { %v4520_v19 = vsub.f32 %v8872_v32, %v2877_v14  ;;  %v2950_v36 = vpop.f32.mrb[24].mxu1  ;;  %v6725_v37 = vpop.f32.mrb[25].mxu0 }
 0x1ab   : > { %v4521_v59 = vsub.f32 %v1782_v54, %v2950_v36  ;;  %v6736_v61 = vpop.f32.mrb[25].mxu1 }
 0x1ac   : > { %4537 = vst.msk [vmem:[%s8896_s17 + $0x10] sm:$0x3] %vm4528_vm2, %v4520_v19  ;;  %v5717_v31 = vld [vmem:[%s8896_s17 + $0x8] sm:$0xff] (%p7711_p6)  }
 0x1ad   : > { %4538 = vst.msk [vmem:[%s8896_s17 + $0x12] sm:$0x3] %vm4528_vm2, %v4521_v59  ;;  %5718 = vst [vmem:[%s5693_s23 + $0x8] sm:$0xff] (%p7711_p6), %v5717_v31  }
 0x1b1   : > { %v3023_v22 = vpop.f32.mrb[26].mxu0 }
 0x1b2   : > { %v4522_v23 = vsub.f32 %v1855_v8, %v3023_v22  ;;  %v3096_v46 = vpop.f32.mrb[26].mxu1  ;;  %v6747_v2 = vpop.f32.mrb[27].mxu0 }
 0x1b3   : > { %v4523_v11 = vsub.f32 %v1928_v40, %v3096_v46  ;;  %v6758_v60 = vpop.f32.mrb[27].mxu1 }
 0x1b4   : > { %4539 = vst.msk [vmem:[%s8896_s17 + $0x14] sm:$0x3] %vm4528_vm2, %v4522_v23 }
 0x1b5   : > { %4540 = vst.msk [vmem:[%s8896_s17 + $0x16] sm:$0x3] %vm4528_vm2, %v4523_v11 }
 0x1b9   : > { %v3169_v52 = vpop.f32.mrb[28].mxu0 }
 0x1ba   : > { %v4524_v30 = vsub.f32 %v8885_v17, %v3169_v52  ;;  %v3242_v56 = vpop.f32.mrb[28].mxu1  ;;  %v6769_v18 = vpop.f32.mrb[29].mxu0 }
 0x1bb   : > { %v4525_v44 = vsub.f32 %v8887_v20, %v3242_v56  ;;  %v6780_v6 = vpop.f32.mrb[29].mxu1 }
 0x1bc   : > { %4541 = vst.msk [vmem:[%s8896_s17 + $0x18] sm:$0x3] %vm4528_vm2, %v4524_v30  ;;  %v5725_v38 = vld [vmem:[%s8896_s17 + $0x10] sm:$0xff] (%p7711_p6)  }
 0x1bd   : > { %4542 = vst.msk [vmem:[%s8896_s17 + $0x1a] sm:$0x3] %vm4528_vm2, %v4525_v44  ;;  %5726 = vst [vmem:[%s5693_s23 + $0x10] sm:$0xff] (%p7711_p6), %v5725_v38  }
 0x1c1   : > { %v3315_v50 = vpop.f32.mrb[30].mxu0 }
 0x1c2   : > { %v4526_v45 = vsub.f32 %v8889_v9, %v3315_v50  ;;  %v3388_v24 = vpop.f32.mrb[30].mxu1  ;;  %v6791_v42 = vpop.f32.mrb[31].mxu0 }
 0x1c3   : > { %v4527_v32 = vsub.f32 %v8891_v33, %v3388_v24  ;;  %v6802_v54 = vpop.f32.mrb[31].mxu1 }
 0x1c4   : > { %4543 = vst.msk [vmem:[%s8896_s17 + $0x1c] sm:$0x3] %vm4528_vm2, %v4526_v45 }
 0x1c5   : > { %4544 = vst.msk [vmem:[%s8896_s17 + $0x1e] sm:$0x3] %vm4528_vm2, %v4527_v32 }
 0x1cc   : > { %v5733_v39 = vld [vmem:[%s8896_s17 + $0x18] sm:$0xff] (%p7711_p6)  }
 0x1cd   : > { %5734 = vst [vmem:[%s5693_s23 + $0x18] sm:$0xff] (%p7711_p6), %v5733_v39  }
 0x209   : > { %v4611_v10 = vpop.f32.mrb[32].mxu0 }
 0x20a   : > { %6107 = vst.msk [vmem:[%s8896_s17 + $0x20] sm:$0x3] %vm4528_vm2, %v4611_v10  ;;  %v4681_v12 = vpop.f32.mrb[32].mxu1  ;;  %v6989_v4 = vpop.f32.mrb[33].mxu0 }
 0x20b   : > { %6108 = vst.msk [vmem:[%s8896_s17 + $0x22] sm:$0x3] %vm4528_vm2, %v4681_v12  ;;  %v7000_v3 = vpop.f32.mrb[33].mxu1 }
 0x211   : > { %v4751_v8 = vpop.f32.mrb[34].mxu0 }
 0x212   : > { %6109 = vst.msk [vmem:[%s8896_s17 + $0x24] sm:$0x3] %vm4528_vm2, %v4751_v8  ;;  %v4821_v40 = vpop.f32.mrb[34].mxu1  ;;  %v7011_v47 = vpop.f32.mrb[35].mxu0 }
 0x213   : > { %6110 = vst.msk [vmem:[%s8896_s17 + $0x26] sm:$0x3] %vm4528_vm2, %v4821_v40  ;;  %v7022_v13 = vpop.f32.mrb[35].mxu1 }
 0x219   : > { %v4891_v17 = vpop.f32.mrb[36].mxu0 }
 0x21a   : > { %6111 = vst.msk [vmem:[%s8896_s17 + $0x28] sm:$0x3] %vm4528_vm2, %v4891_v17  ;;  %v4961_v20 = vpop.f32.mrb[36].mxu1  ;;  %v7033_v58 = vpop.f32.mrb[37].mxu0  ;;  %v5741_v51 = vld [vmem:[%s8896_s17 + $0x20] sm:$0xff] (%p7711_p6)  }
 0x21b   : > { %6112 = vst.msk [vmem:[%s8896_s17 + $0x2a] sm:$0x3] %vm4528_vm2, %v4961_v20  ;;  %v7044_v21 = vpop.f32.mrb[37].mxu1  ;;  %5742 = vst [vmem:[%s5693_s23 + $0x40] sm:$0xff] (%p7711_p6), %v5741_v51  }
 0x221   : > { %v5031_v9 = vpop.f32.mrb[38].mxu0 }
 0x222   : > { %6113 = vst.msk [vmem:[%s8896_s17 + $0x2c] sm:$0x3] %vm4528_vm2, %v5031_v9  ;;  %v5101_v33 = vpop.f32.mrb[38].mxu1  ;;  %v7055_v26 = vpop.f32.mrb[39].mxu0 }
 0x223   : > { %6114 = vst.msk [vmem:[%s8896_s17 + $0x2e] sm:$0x3] %vm4528_vm2, %v5101_v33  ;;  %v7066_v27 = vpop.f32.mrb[39].mxu1 }
 0x229   : > { %v5171_v28 = vpop.f32.mrb[40].mxu0 }
 0x22a   : > { %6115 = vst.msk [vmem:[%s8896_s17 + $0x30] sm:$0x3] %vm4528_vm2, %v5171_v28  ;;  %v5241_v29 = vpop.f32.mrb[40].mxu1  ;;  %v7077_v34 = vpop.f32.mrb[41].mxu0  ;;  %v5749_v53 = vld [vmem:[%s8896_s17 + $0x28] sm:$0xff] (%p7711_p6)  }
 0x22b   : > { %6116 = vst.msk [vmem:[%s8896_s17 + $0x32] sm:$0x3] %vm4528_vm2, %v5241_v29  ;;  %v7088_v35 = vpop.f32.mrb[41].mxu1  ;;  %5750 = vst [vmem:[%s5693_s23 + $0x48] sm:$0xff] (%p7711_p6), %v5749_v53  }
 0x231   : > { %v5311_v41 = vpop.f32.mrb[42].mxu0 }
 0x232   : > { %6117 = vst.msk [vmem:[%s8896_s17 + $0x34] sm:$0x3] %vm4528_vm2, %v5311_v41  ;;  %v5381_v43 = vpop.f32.mrb[42].mxu1  ;;  %v7099_v48 = vpop.f32.mrb[43].mxu0 }
 0x233   : > { %6118 = vst.msk [vmem:[%s8896_s17 + $0x36] sm:$0x3] %vm4528_vm2, %v5381_v43  ;;  %v7110_v49 = vpop.f32.mrb[43].mxu1 }
 0x239   : > { %v5451_v55 = vpop.f32.mrb[44].mxu0 }
 0x23a   : > { %6119 = vst.msk [vmem:[%s8896_s17 + $0x38] sm:$0x3] %vm4528_vm2, %v5451_v55  ;;  %v5521_v57 = vpop.f32.mrb[44].mxu1  ;;  %v7121_v62 = vpop.f32.mrb[45].mxu0  ;;  %v5757_v0 = vld [vmem:[%s8896_s17 + $0x30] sm:$0xff] (%p7711_p6)  }
 0x23b   : > { %6120 = vst.msk [vmem:[%s8896_s17 + $0x3a] sm:$0x3] %vm4528_vm2, %v5521_v57  ;;  %v7132_v63 = vpop.f32.mrb[45].mxu1  ;;  %5758 = vst [vmem:[%s5693_s23 + $0x50] sm:$0xff] (%p7711_p6), %v5757_v0  }
 0x23d   : > { %5688 = sbr.rel (!%p7711_p6) target bundleno = 588 (0x24c), region = 111 }
 0x241   : > { %v5591_v5 = vpop.f32.mrb[46].mxu0 }
 0x242   : > { %6121 = vst.msk [vmem:[%s8896_s17 + $0x3c] sm:$0x3] %vm4528_vm2, %v5591_v5  ;;  %v5661_v7 = vpop.f32.mrb[46].mxu1  ;;  %v7143_v15 = vpop.f32.mrb[47].mxu0 }
 0x243   : > { %6122 = vst.msk [vmem:[%s8896_s17 + $0x3e] sm:$0x3] %vm4528_vm2, %v5661_v7  ;;  %v7154_v16 = vpop.f32.mrb[47].mxu1 }
 0x24a   : > { %v5765_v1 = vld [vmem:[%s8896_s17 + $0x38] sm:$0xff]  }
 0x24b   : > { %5766 = vst [vmem:[%s5693_s23 + $0x58] sm:$0xff] %v5765_v1  }
 0x24c PF: > { %s12_s13 = sadd.s32 1, %s7652_s13   ;;  %s9124_s9 = smov %s7640_s10 }
 0x24d   : > { %p9_p11 = scmp.ge.s32.totalorder %s12_s13, 4   ;;  %s9125_s10 = smov %s7716_s20 }
 0x24e   : > { %s9126_s11 = smov %s7648_s12  ;;  %s9127_s12 = smov %s9129_s14 }
 0x24f   :  { %11 = sbr.rel (!%p9_p11) target bundleno = 3 (0x3), region = 194 }

// kernel: fno_forward.10
= control target key start
LH: loop header
LB: loop body
LE: loop exit
PB: predicated region body
PF: predicated region fallthrough
CT: control target
= control target key end

     0   :  { %s685_s15 = smov 0   ;;  %s687_s16 = smov 0   ;;  %s805_s0 = inlined_call_operand.vmem [shape: f32[32,512], index: 0, kind: input, shape index: {}]   ;;  %s806_s1 = inlined_call_operand.vmem [shape: f32[32,32], index: 1, kind: input, shape index: {}]   ;;  %s807_s2 = inlined_call_operand.vmem [shape: f32[32,1], index: 2, kind: input, shape index: {}]   ;;  %s808_s3 = inlined_call_operand.vmem [shape: f32[32,512], index: 3, kind: input, shape index: {}]   ;;  %s809_s4 = inlined_call_operand.vmem [shape: f32[32,512], index: 4, kind: output, shape index: {}]  }
   0x1   :  { %s689_s17 = smov 0  }
   0x2 LB: > { %s568_s18 = sadd.s32 4294967295, %s656_s17   ;;  %s702_s19 = sadd.s32 1, %s656_s17   ;;  %s656_s17 = sphi %s689_s17, %s814_s17   ;;  %s652_s16 = sphi %s687_s16, %s813_s16   ;;  %s648_s15 = sphi %s685_s15, %s812_s15  }
   0x3   : > { %s18_s20 = ssub.s32 %s656_s17, %s702_s19  ;;  %s21_s21 = sadd.s32 1, %s652_s16 }
   0x4   : > { %p19_p0 = scmp.eq.s32.totalorder %s18_s20, 0  ;;  %p28_p1 = scmp.ne.s32.totalorder %s652_s16, %s648_s15 }
   0x5   : > { %p29_p2 = scmp.eq.s32.totalorder %s656_s17, 0  ;;  %p126_p3 = scmp.eq.s32.totalorder %s568_s18, 1 }
   0x6   : > { %s713_s22 = scalar_select %p19_p0, %s652_s16, %s21_s21  }
   0x7   : > { %p715_p4 = por %p29_p2, %p28_p1  ;;  %p719_p5 = por %p126_p3, %p28_p1 }
   0x8   : > { %p571_p6 = scmp.ge.s32.totalorder %s656_s17, 2 }
   0xa   : > { %154 = sbr.rel (%p571_p6) target bundleno = 33 (0x21), region = 24 }
  0x11   : > { %157 = sbr.rel (!%p715_p4) target bundleno = 25 (0x19), region = 28  ;;  %s159_s25 = sand.u32 (%p715_p4), 1, %s652_s16  }
  0x12   : > { %s591_s26 = sshll.u32 (%p715_p4), %s656_s17, 4  ;;  %s572_s27 = sshll.u32 (%p715_p4), %s159_s25, 6 }
  0x13   : > { %s164_s30 = scalar_lea.vmem (%p715_p4), %s805_s0, %s591_s26  ;;  %s161_s5 = scalar_lea.vmem (%p715_p4), [#allocation2], %s572_s27 }
  0x14   : > { %v177_v0 = vld [vmem:[%s164_s30] sm:$0xff] (%p715_p4)  ;;  %v179_v1 = vld [vmem:[%s164_s30 + $0x8] sm:$0xff] (%p715_p4) }
  0x15   : > { %v181_v2 = vld [vmem:[%s164_s30 + $0x20] sm:$0xff] (%p715_p4)  ;;  %178 = vst [vmem:[%s161_s5] sm:$0xff] (%p715_p4), %v177_v0  ;;  %180 = vst [vmem:[%s161_s5 + $0x8] sm:$0xff] (%p715_p4), %v179_v1  ;;  %v183_v3 = vld [vmem:[%s164_s30 + $0x28] sm:$0xff] (%p715_p4) }
  0x16   : > { %182 = vst [vmem:[%s161_s5 + $0x10] sm:$0xff] (%p715_p4), %v181_v2  ;;  %v185_v4 = vld [vmem:[%s164_s30 + $0x40] sm:$0xff] (%p715_p4)  ;;  %v187_v5 = vld [vmem:[%s164_s30 + $0x48] sm:$0xff] (%p715_p4)  ;;  %184 = vst [vmem:[%s161_s5 + $0x18] sm:$0xff] (%p715_p4), %v183_v3 }
  0x17   : > { %186 = vst [vmem:[%s161_s5 + $0x20] sm:$0xff] (%p715_p4), %v185_v4  ;;  %188 = vst [vmem:[%s161_s5 + $0x28] sm:$0xff] (%p715_p4), %v187_v5  ;;  %v189_v6 = vld [vmem:[%s164_s30 + $0x60] sm:$0xff] (%p715_p4)  ;;  %v191_v7 = vld [vmem:[%s164_s30 + $0x68] sm:$0xff] (%p715_p4) }
  0x18   : > { %190 = vst [vmem:[%s161_s5 + $0x30] sm:$0xff] %v189_v6  ;;  %192 = vst [vmem:[%s161_s5 + $0x38] sm:$0xff] %v191_v7 }
  0x19 PF: > { %198 = sbr.rel (!%p715_p4) target bundleno = 33 (0x21), region = 51  ;;  %s200_s6 = sand.u32 (%p715_p4), 1, %s652_s16  }
  0x1a   : > { %s592_s7 = sshll.u32 (%p715_p4), %s656_s17, 4  ;;  %s575_s8 = sshll.u32 (%p715_p4), %s200_s6, 6 }
  0x1b   : > { %s205_s11 = scalar_lea.vmem (%p715_p4), %s808_s3, %s592_s7  ;;  %s202_s12 = scalar_lea.vmem (%p715_p4), [#allocation3], %s575_s8 }
  0x1c   : > { %v218_v8 = vld [vmem:[%s205_s11] sm:$0xff] (%p715_p4)  ;;  %v220_v9 = vld [vmem:[%s205_s11 + $0x8] sm:$0xff] (%p715_p4) }
  0x1d   : > { %v222_v10 = vld [vmem:[%s205_s11 + $0x20] sm:$0xff] (%p715_p4)  ;;  %219 = vst [vmem:[%s202_s12] sm:$0xff] (%p715_p4), %v218_v8  ;;  %221 = vst [vmem:[%s202_s12 + $0x8] sm:$0xff] (%p715_p4), %v220_v9  ;;  %v224_v11 = vld [vmem:[%s205_s11 + $0x28] sm:$0xff] (%p715_p4) }
  0x1e   : > { %223 = vst [vmem:[%s202_s12 + $0x10] sm:$0xff] (%p715_p4), %v222_v10  ;;  %v226_v12 = vld [vmem:[%s205_s11 + $0x40] sm:$0xff] (%p715_p4)  ;;  %v228_v13 = vld [vmem:[%s205_s11 + $0x48] sm:$0xff] (%p715_p4)  ;;  %225 = vst [vmem:[%s202_s12 + $0x18] sm:$0xff] (%p715_p4), %v224_v11 }
  0x1f   : > { %227 = vst [vmem:[%s202_s12 + $0x20] sm:$0xff] (%p715_p4), %v226_v12  ;;  %229 = vst [vmem:[%s202_s12 + $0x28] sm:$0xff] (%p715_p4), %v228_v13  ;;  %v230_v14 = vld [vmem:[%s205_s11 + $0x60] sm:$0xff] (%p715_p4)  ;;  %v232_v15 = vld [vmem:[%s205_s11 + $0x68] sm:$0xff] (%p715_p4) }
  0x20   : > { %231 = vst [vmem:[%s202_s12 + $0x30] sm:$0xff] %v230_v14  ;;  %233 = vst [vmem:[%s202_s12 + $0x38] sm:$0xff] %v232_v15 }
  0x21 PF: > { %p578_p7 = scmp.ge.s32.totalorder %s656_s17, 1  ;;  %p238_p8 = scmp.lt.s32.totalorder %s656_s17, 3 }
  0x23   : > { %p239_p9 = pnand %p578_p7, %p238_p8 }
  0x24   : > { %s245_s13 = sand.u32 (!%p239_p9), 1, %s648_s15   ;;  %v658_v16 = vmov (!%p239_p9), 0.0   ;;  %v297_v17 = vld [vmem:[%s807_s2 + $0x10] sm:$0xff] (!%p239_p9)  ;;  %v295_v18 = vld [vmem:[%s807_s2] sm:$0xff] (!%p239_p9)  ;;  %v659_v19 = vmov (!%p239_p9), 0   ;;  %v298_v31 = vld [vmem:[%s807_s2 + $0x18] sm:$0xff] (!%p239_p9) }
  0x25   : > { %242 = sbr.rel (%p239_p9) target bundleno = 283 (0x11b), region = 74  ;;  %s741_s14 = sshll.u32 (!%p239_p9), %s245_s13, 6  ;;  %396 = vmatprep.mubr.f32.mxu0 (!%p239_p9), %v658_v16  ;;  %408 = vmatprep.mubr.f32.mxu1 (!%p239_p9), %v658_v16  ;;  %v296_v32 = vld [vmem:[%s807_s2 + $0x8] sm:$0xff] (!%p239_p9)  ;;  %v283_v34 = vld [vmem:[%s806_s1] sm:$0xff] (!%p239_p9)  ;;  %vm319_vm0 = vcmask (!%p239_p9), 261120   ;;  %v285_v35 = vld [vmem:[%s806_s1 + $0x10] sm:$0xff] (!%p239_p9) }
  0x26   : > { %633 = vset.pattern.permute.xlu1 (!%p239_p9), %v659_v19  ;;  %632 = vset.pattern.permute.xlu0 (!%p239_p9), %v659_v19  ;;  %s247_s26 = scalar_lea.vmem (!%p239_p9), [#allocation2], %s741_s14  ;;  %v284_v36 = vld [vmem:[%s806_s1 + $0x8] sm:$0xff] (!%p239_p9)  ;;  %v286_v37 = vld [vmem:[%s806_s1 + $0x18] sm:$0xff] (!%p239_p9)  ;;  %s254_s12 = scalar_lea.vmem (!%p239_p9), [#allocation3], %s741_s14 }
  0x27   : > { %v288_v20 = vld [vmem:[%s247_s26 + $0x8] sm:$0xff] (!%p239_p9)  ;;  %v290_v21 = vld [vmem:[%s247_s26 + $0x18] sm:$0xff] (!%p239_p9)  ;;  %v287_v22 = vld [vmem:[%s247_s26] sm:$0xff] (!%p239_p9)  ;;  %311 = vperm.xlu1 (!%p239_p9), %633, %v297_v17   ;;  %301 = vperm.xlu0 (!%p239_p9), %632, %v295_v18   ;;  %s770_s13 = scalar_lea.vmem (!%p239_p9), [#allocation4], %s741_s14 }
  0x28   : > { %v594_v23 = vpack.c.bf16 (!%p239_p9), %v290_v21, %v288_v20  ;;  %v289_v24 = vld [vmem:[%s247_s26 + $0x10] sm:$0xff] (!%p239_p9)  ;;  %v292_v25 = vld [vmem:[%s247_s26 + $0x28] sm:$0xff] (!%p239_p9)  ;;  %v294_v26 = vld [vmem:[%s247_s26 + $0x38] sm:$0xff] (!%p239_p9) }
  0x29   : > { %v596_v27 = vpack.c.bf16 (!%p239_p9), %v289_v24, %v287_v22  ;;  %v598_v28 = vpack.c.bf16 (!%p239_p9), %v294_v26, %v292_v25  ;;  %v291_v29 = vld [vmem:[%s247_s26 + $0x20] sm:$0xff] (!%p239_p9)  ;;  %v293_v30 = vld [vmem:[%s247_s26 + $0x30] sm:$0xff] (!%p239_p9)  ;;  %v422_v47 = vld [vmem:[%s254_s12 + $0x8] sm:$0xff] (!%p239_p9) }
  0x2a   : > { %595 = vmatprep.subr.bf16.mxu0 (!%p239_p9), %v594_v23  ;;  %602 = vmatprep.subr.bf16.mxu1 (!%p239_p9), %v594_v23  ;;  %v600_v33 = vpack.c.bf16 (!%p239_p9), %v293_v30, %v291_v29  ;;  %v421_v41 = vld [vmem:[%s254_s12] sm:$0xff] (!%p239_p9)  ;;  %v426_v49 = vld [vmem:[%s254_s12 + $0x28] sm:$0xff] (!%p239_p9)  ;;  %v423_v59 = vld [vmem:[%s254_s12 + $0x10] sm:$0xff] (!%p239_p9) }
  0x2b   : > { %597 = vmatpush1.bf16.msra.mxu0 (!%p239_p9), %v596_v27  ;;  %604 = vmatpush1.bf16.msra.mxu1 (!%p239_p9), %v596_v27  ;;  %v425_v43 = vld [vmem:[%s254_s12 + $0x20] sm:$0xff] (!%p239_p9)  ;;  %v427_v61 = vld [vmem:[%s254_s12 + $0x30] sm:$0xff] (!%p239_p9)  ;;  %v424_v3 = vld [vmem:[%s254_s12 + $0x18] sm:$0xff] (!%p239_p9) }
  0x2c   : > { %599 = vmatprep.subr.bf16.mxu0 %v598_v28  ;;  %603 = vmatprep.subr.bf16.mxu1 %v598_v28  ;;  %v428_v5 = vld [vmem:[%s254_s12 + $0x38] sm:$0xff]  ;;  %s593_s14 = sshll.u32 (%p719_p5), %s568_s18, 4 }
  0x2d   : > { %316 = vperm.xlu1 %633, %v298_v31   ;;  %306 = vperm.xlu0 %632, %v296_v32   ;;  %s462_s23 = scalar_lea.vmem (%p719_p5), %s809_s4, %s593_s14 }
  0x2f   : > { %601 = vmatpush1.bf16.msra.mxu0 %v600_v33  ;;  %605 = vmatpush1.bf16.msra.mxu1 %v600_v33 }
  0x32   : > { %582 = vmatmul.mubr.msk.f32.vlgmr.msra.gmra.mrb[0].mxu0 %vm319_vm0, %v283_v34  ;;  %584 = vmatmul.mubr.msk.f32.vlgmr.msra.gmra.mrb[0].mxu1 %vm319_vm0, %v285_v35 }
  0x33   : > { %402 = vmatprep.mubr.f32.mxu0 %v658_v16  ;;  %414 = vmatprep.mubr.f32.mxu1 %v658_v16 }
  0x36   : > { %583 = vmatmul.mubr.msk.f32.gmra.mrb[2].mxu0 %vm319_vm0, %v284_v36  ;;  %585 = vmatmul.mubr.msk.f32.gmra.mrb[2].mxu1 %vm319_vm0, %v286_v37 }
  0xa6   : > { %v312_v38 = vpop.permute.xlu1 %311  ;;  %v302_v39 = vpop.permute.xlu0 %301 }
  0xac   : > { %v317_v54 = vpop.permute.xlu1 %316  ;;  %v307_v55 = vpop.permute.xlu0 %306 }
 0x105   : > { %v398_v40 = vpop.f32.mrb[0].mxu0  ;;  %v410_v42 = vpop.f32.mrb[0].mxu1 }
 0x106   : > { %v399_v44 = vadd.f32 %v398_v40, %v302_v39  ;;  %v411_v45 = vadd.f32 %v410_v42, %v312_v38  ;;  %v400_v46 = vpop.f32.mrb[1].mxu0  ;;  %v412_v48 = vpop.f32.mrb[1].mxu1 }
 0x107   : > { %v401_v50 = vadd.f32 %v400_v46, %v302_v39  ;;  %v413_v51 = vadd.f32 %v412_v48, %v312_v38 }
 0x108   : > { %v429_v52 = vadd.f32 %v421_v41, %v399_v44  ;;  %v433_v53 = vadd.f32 %v425_v43, %v411_v45 }
 0x109   : > { %v430_v56 = vadd.f32 %v422_v47, %v401_v50  ;;  %v434_v57 = vadd.f32 %v426_v49, %v413_v51  ;;  %v404_v58 = vpop.f32.mrb[2].mxu0  ;;  %v416_v60 = vpop.f32.mrb[2].mxu1 }
 0x10a   : > { %v437_v62 = vmax.f32 %v429_v52, 0.0  ;;  %v441_v63 = vmax.f32 %v433_v53, 0.0  ;;  %v405_v0 = vadd.f32 %v404_v58, %v307_v55  ;;  %v417_v1 = vadd.f32 %v416_v60, %v317_v54  ;;  %v406_v2 = vpop.f32.mrb[3].mxu0  ;;  %v418_v4 = vpop.f32.mrb[3].mxu1 }
 0x10b   : > { %v438_v6 = vmax.f32 %v430_v56, 0.0  ;;  %v442_v7 = vmax.f32 %v434_v57, 0.0  ;;  %v407_v8 = vadd.f32 %v406_v2, %v307_v55  ;;  %v419_v9 = vadd.f32 %v418_v4, %v317_v54  ;;  %459 = sbr.rel (!%p719_p5) target bundleno = 283 (0x11b), region = 86 }
 0x10c   : > { %445 = vst [vmem:[%s770_s13] sm:$0xff] %v437_v62  ;;  %449 = vst [vmem:[%s770_s13 + $0x20] sm:$0xff] %v441_v63  ;;  %v431_v10 = vadd.f32 %v423_v59, %v405_v0  ;;  %v435_v11 = vadd.f32 %v427_v61, %v417_v1 }
 0x10d   : > { %446 = vst [vmem:[%s770_s13 + $0x8] sm:$0xff] %v438_v6  ;;  %450 = vst [vmem:[%s770_s13 + $0x28] sm:$0xff] %v442_v7  ;;  %v432_v12 = vadd.f32 %v424_v3, %v407_v8  ;;  %v436_v13 = vadd.f32 %v428_v5, %v419_v9 }
 0x10e   : > { %v439_v14 = vmax.f32 %v431_v10, 0.0  ;;  %v443_v15 = vmax.f32 %v435_v11, 0.0 }
 0x10f   : > { %v440_v16 = vmax.f32 %v432_v12, 0.0  ;;  %v444_v17 = vmax.f32 %v436_v13, 0.0 }
 0x110   : > { %447 = vst [vmem:[%s770_s13 + $0x10] sm:$0xff] %v439_v14  ;;  %451 = vst [vmem:[%s770_s13 + $0x30] sm:$0xff] %v443_v15 }
 0x111   : > { %448 = vst [vmem:[%s770_s13 + $0x18] sm:$0xff] %v440_v16  ;;  %452 = vst [vmem:[%s770_s13 + $0x38] sm:$0xff] %v444_v17 }
 0x113   : > { %v475_v18 = vld [vmem:[%s770_s13] sm:$0xff] }
 0x114   : > { %v477_v19 = vld [vmem:[%s770_s13 + $0x8] sm:$0xff]  ;;  %v483_v22 = vld [vmem:[%s770_s13 + $0x20] sm:$0xff]  ;;  %476 = vst [vmem:[%s462_s23] sm:$0xff] %v475_v18 }
 0x115   : > { %v485_v23 = vld [vmem:[%s770_s13 + $0x28] sm:$0xff]  ;;  %478 = vst [vmem:[%s462_s23 + $0x8] sm:$0xff] %v477_v19  ;;  %484 = vst [vmem:[%s462_s23 + $0x40] sm:$0xff] %v483_v22 }
 0x116   : > { %486 = vst [vmem:[%s462_s23 + $0x48] sm:$0xff] %v485_v23 }
 0x117   : > { %v479_v20 = vld [vmem:[%s770_s13 + $0x10] sm:$0xff] }
 0x118   : > { %v481_v21 = vld [vmem:[%s770_s13 + $0x18] sm:$0xff]  ;;  %480 = vst [vmem:[%s462_s23 + $0x20] sm:$0xff] %v479_v20  ;;  %v487_v24 = vld [vmem:[%s770_s13 + $0x30] sm:$0xff] }
 0x119   : > { %482 = vst [vmem:[%s462_s23 + $0x28] sm:$0xff] %v481_v21  ;;  %v489_v25 = vld [vmem:[%s770_s13 + $0x38] sm:$0xff]  ;;  %488 = vst [vmem:[%s462_s23 + $0x60] sm:$0xff] %v487_v24 }
 0x11a   : > { %490 = vst [vmem:[%s462_s23 + $0x68] sm:$0xff] %v489_v25 }
 0x11b PF: > { %p11_p10 = scmp.ge.s32.totalorder %s702_s19, 4   ;;  %s812_s15 = smov %s652_s16 }
 0x11c   : > { %s813_s16 = smov %s713_s22  ;;  %s814_s17 = smov %s702_s19 }
 0x11d   :  { %13 = sbr.rel (!%p11_p10) target bundleno = 2 (0x2), region = 148 }

// kernel: fno_forward.14
= control target key start
LH: loop header
LB: loop body
LE: loop exit
PB: predicated region body
PF: predicated region fallthrough
CT: control target
= control target key end

     0   :  { %s677_s15 = smov 0   ;;  %s679_s16 = smov 0   ;;  %s797_s0 = inlined_call_operand.vmem [shape: f32[32,512], index: 0, kind: input, shape index: {}]   ;;  %s798_s1 = inlined_call_operand.vmem [shape: f32[32,32], index: 1, kind: input, shape index: {}]   ;;  %s799_s2 = inlined_call_operand.vmem [shape: f32[32,1], index: 2, kind: input, shape index: {}]   ;;  %s800_s3 = inlined_call_operand.vmem [shape: f32[32,512], index: 3, kind: input, shape index: {}]   ;;  %s801_s4 = inlined_call_operand.vmem [shape: f32[32,512], index: 4, kind: output, shape index: {}]  }
   0x1   :  { %s681_s17 = smov 0  }
   0x2 LB: > { %s560_s18 = sadd.s32 4294967295, %s648_s17   ;;  %s694_s19 = sadd.s32 1, %s648_s17   ;;  %s648_s17 = sphi %s681_s17, %s806_s17   ;;  %s644_s16 = sphi %s679_s16, %s805_s16   ;;  %s640_s15 = sphi %s677_s15, %s804_s15  }
   0x3   : > { %s18_s20 = ssub.s32 %s648_s17, %s694_s19  ;;  %s21_s21 = sadd.s32 1, %s644_s16 }
   0x4   : > { %p19_p0 = scmp.eq.s32.totalorder %s18_s20, 0  ;;  %p28_p1 = scmp.ne.s32.totalorder %s644_s16, %s640_s15 }
   0x5   : > { %p29_p2 = scmp.eq.s32.totalorder %s648_s17, 0  ;;  %p126_p3 = scmp.eq.s32.totalorder %s560_s18, 1 }
   0x6   : > { %s705_s22 = scalar_select %p19_p0, %s644_s16, %s21_s21  }
   0x7   : > { %p707_p4 = por %p29_p2, %p28_p1  ;;  %p711_p5 = por %p126_p3, %p28_p1 }
   0x8   : > { %p563_p6 = scmp.ge.s32.totalorder %s648_s17, 2 }
   0xa   : > { %154 = sbr.rel (%p563_p6) target bundleno = 33 (0x21), region = 24 }
  0x11   : > { %157 = sbr.rel (!%p707_p4) target bundleno = 25 (0x19), region = 28  ;;  %s159_s25 = sand.u32 (%p707_p4), 1, %s644_s16  }
  0x12   : > { %s583_s26 = sshll.u32 (%p707_p4), %s648_s17, 4  ;;  %s564_s27 = sshll.u32 (%p707_p4), %s159_s25, 6 }
  0x13   : > { %s164_s30 = scalar_lea.vmem (%p707_p4), %s797_s0, %s583_s26  ;;  %s161_s5 = scalar_lea.vmem (%p707_p4), [#allocation2], %s564_s27 }
  0x14   : > { %v177_v0 = vld [vmem:[%s164_s30] sm:$0xff] (%p707_p4)  ;;  %v179_v1 = vld [vmem:[%s164_s30 + $0x8] sm:$0xff] (%p707_p4) }
  0x15   : > { %v181_v2 = vld [vmem:[%s164_s30 + $0x20] sm:$0xff] (%p707_p4)  ;;  %178 = vst [vmem:[%s161_s5] sm:$0xff] (%p707_p4), %v177_v0  ;;  %180 = vst [vmem:[%s161_s5 + $0x8] sm:$0xff] (%p707_p4), %v179_v1  ;;  %v183_v3 = vld [vmem:[%s164_s30 + $0x28] sm:$0xff] (%p707_p4) }
  0x16   : > { %182 = vst [vmem:[%s161_s5 + $0x10] sm:$0xff] (%p707_p4), %v181_v2  ;;  %v185_v4 = vld [vmem:[%s164_s30 + $0x40] sm:$0xff] (%p707_p4)  ;;  %v187_v5 = vld [vmem:[%s164_s30 + $0x48] sm:$0xff] (%p707_p4)  ;;  %184 = vst [vmem:[%s161_s5 + $0x18] sm:$0xff] (%p707_p4), %v183_v3 }
  0x17   : > { %186 = vst [vmem:[%s161_s5 + $0x20] sm:$0xff] (%p707_p4), %v185_v4  ;;  %188 = vst [vmem:[%s161_s5 + $0x28] sm:$0xff] (%p707_p4), %v187_v5  ;;  %v189_v6 = vld [vmem:[%s164_s30 + $0x60] sm:$0xff] (%p707_p4)  ;;  %v191_v7 = vld [vmem:[%s164_s30 + $0x68] sm:$0xff] (%p707_p4) }
  0x18   : > { %190 = vst [vmem:[%s161_s5 + $0x30] sm:$0xff] %v189_v6  ;;  %192 = vst [vmem:[%s161_s5 + $0x38] sm:$0xff] %v191_v7 }
  0x19 PF: > { %198 = sbr.rel (!%p707_p4) target bundleno = 33 (0x21), region = 51  ;;  %s200_s6 = sand.u32 (%p707_p4), 1, %s644_s16  }
  0x1a   : > { %s584_s7 = sshll.u32 (%p707_p4), %s648_s17, 4  ;;  %s567_s8 = sshll.u32 (%p707_p4), %s200_s6, 6 }
  0x1b   : > { %s205_s11 = scalar_lea.vmem (%p707_p4), %s800_s3, %s584_s7  ;;  %s202_s12 = scalar_lea.vmem (%p707_p4), [#allocation3], %s567_s8 }
  0x1c   : > { %v218_v8 = vld [vmem:[%s205_s11] sm:$0xff] (%p707_p4)  ;;  %v220_v9 = vld [vmem:[%s205_s11 + $0x8] sm:$0xff] (%p707_p4) }
  0x1d   : > { %v222_v10 = vld [vmem:[%s205_s11 + $0x20] sm:$0xff] (%p707_p4)  ;;  %219 = vst [vmem:[%s202_s12] sm:$0xff] (%p707_p4), %v218_v8  ;;  %221 = vst [vmem:[%s202_s12 + $0x8] sm:$0xff] (%p707_p4), %v220_v9  ;;  %v224_v11 = vld [vmem:[%s205_s11 + $0x28] sm:$0xff] (%p707_p4) }
  0x1e   : > { %223 = vst [vmem:[%s202_s12 + $0x10] sm:$0xff] (%p707_p4), %v222_v10  ;;  %v226_v12 = vld [vmem:[%s205_s11 + $0x40] sm:$0xff] (%p707_p4)  ;;  %v228_v13 = vld [vmem:[%s205_s11 + $0x48] sm:$0xff] (%p707_p4)  ;;  %225 = vst [vmem:[%s202_s12 + $0x18] sm:$0xff] (%p707_p4), %v224_v11 }
  0x1f   : > { %227 = vst [vmem:[%s202_s12 + $0x20] sm:$0xff] (%p707_p4), %v226_v12  ;;  %229 = vst [vmem:[%s202_s12 + $0x28] sm:$0xff] (%p707_p4), %v228_v13  ;;  %v230_v14 = vld [vmem:[%s205_s11 + $0x60] sm:$0xff] (%p707_p4)  ;;  %v232_v15 = vld [vmem:[%s205_s11 + $0x68] sm:$0xff] (%p707_p4) }
  0x20   : > { %231 = vst [vmem:[%s202_s12 + $0x30] sm:$0xff] %v230_v14  ;;  %233 = vst [vmem:[%s202_s12 + $0x38] sm:$0xff] %v232_v15 }
  0x21 PF: > { %p570_p7 = scmp.ge.s32.totalorder %s648_s17, 1  ;;  %p238_p8 = scmp.lt.s32.totalorder %s648_s17, 3 }
  0x23   : > { %p239_p9 = pnand %p570_p7, %p238_p8 }
  0x24   : > { %s245_s13 = sand.u32 (!%p239_p9), 1, %s640_s15   ;;  %v650_v16 = vmov (!%p239_p9), 0.0   ;;  %v297_v17 = vld [vmem:[%s799_s2 + $0x10] sm:$0xff] (!%p239_p9)  ;;  %v295_v18 = vld [vmem:[%s799_s2] sm:$0xff] (!%p239_p9)  ;;  %v651_v19 = vmov (!%p239_p9), 0   ;;  %v298_v31 = vld [vmem:[%s799_s2 + $0x18] sm:$0xff] (!%p239_p9) }
  0x25   : > { %242 = sbr.rel (%p239_p9) target bundleno = 281 (0x119), region = 74  ;;  %s733_s14 = sshll.u32 (!%p239_p9), %s245_s13, 6  ;;  %396 = vmatprep.mubr.f32.mxu0 (!%p239_p9), %v650_v16  ;;  %408 = vmatprep.mubr.f32.mxu1 (!%p239_p9), %v650_v16  ;;  %v296_v32 = vld [vmem:[%s799_s2 + $0x8] sm:$0xff] (!%p239_p9)  ;;  %v283_v34 = vld [vmem:[%s798_s1] sm:$0xff] (!%p239_p9)  ;;  %vm319_vm0 = vcmask (!%p239_p9), 261120   ;;  %v285_v35 = vld [vmem:[%s798_s1 + $0x10] sm:$0xff] (!%p239_p9) }
  0x26   : > { %625 = vset.pattern.permute.xlu1 (!%p239_p9), %v651_v19  ;;  %624 = vset.pattern.permute.xlu0 (!%p239_p9), %v651_v19  ;;  %s247_s26 = scalar_lea.vmem (!%p239_p9), [#allocation2], %s733_s14  ;;  %v284_v36 = vld [vmem:[%s798_s1 + $0x8] sm:$0xff] (!%p239_p9)  ;;  %v286_v37 = vld [vmem:[%s798_s1 + $0x18] sm:$0xff] (!%p239_p9)  ;;  %s254_s12 = scalar_lea.vmem (!%p239_p9), [#allocation3], %s733_s14 }
  0x27   : > { %v288_v20 = vld [vmem:[%s247_s26 + $0x8] sm:$0xff] (!%p239_p9)  ;;  %v290_v21 = vld [vmem:[%s247_s26 + $0x18] sm:$0xff] (!%p239_p9)  ;;  %v287_v22 = vld [vmem:[%s247_s26] sm:$0xff] (!%p239_p9)  ;;  %311 = vperm.xlu1 (!%p239_p9), %625, %v297_v17   ;;  %301 = vperm.xlu0 (!%p239_p9), %624, %v295_v18   ;;  %s762_s13 = scalar_lea.vmem (!%p239_p9), [#allocation4], %s733_s14 }
  0x28   : > { %v586_v23 = vpack.c.bf16 (!%p239_p9), %v290_v21, %v288_v20  ;;  %v289_v24 = vld [vmem:[%s247_s26 + $0x10] sm:$0xff] (!%p239_p9)  ;;  %v292_v25 = vld [vmem:[%s247_s26 + $0x28] sm:$0xff] (!%p239_p9)  ;;  %v294_v26 = vld [vmem:[%s247_s26 + $0x38] sm:$0xff] (!%p239_p9) }
  0x29   : > { %v588_v27 = vpack.c.bf16 (!%p239_p9), %v289_v24, %v287_v22  ;;  %v590_v28 = vpack.c.bf16 (!%p239_p9), %v294_v26, %v292_v25  ;;  %v291_v29 = vld [vmem:[%s247_s26 + $0x20] sm:$0xff] (!%p239_p9)  ;;  %v293_v30 = vld [vmem:[%s247_s26 + $0x30] sm:$0xff] (!%p239_p9)  ;;  %v422_v47 = vld [vmem:[%s254_s12 + $0x8] sm:$0xff] (!%p239_p9) }
  0x2a   : > { %587 = vmatprep.subr.bf16.mxu0 (!%p239_p9), %v586_v23  ;;  %594 = vmatprep.subr.bf16.mxu1 (!%p239_p9), %v586_v23  ;;  %v592_v33 = vpack.c.bf16 (!%p239_p9), %v293_v30, %v291_v29  ;;  %v421_v41 = vld [vmem:[%s254_s12] sm:$0xff] (!%p239_p9)  ;;  %v426_v49 = vld [vmem:[%s254_s12 + $0x28] sm:$0xff] (!%p239_p9)  ;;  %v423_v59 = vld [vmem:[%s254_s12 + $0x10] sm:$0xff] (!%p239_p9) }
  0x2b   : > { %589 = vmatpush1.bf16.msra.mxu0 (!%p239_p9), %v588_v27  ;;  %596 = vmatpush1.bf16.msra.mxu1 (!%p239_p9), %v588_v27  ;;  %v425_v43 = vld [vmem:[%s254_s12 + $0x20] sm:$0xff] (!%p239_p9)  ;;  %v427_v61 = vld [vmem:[%s254_s12 + $0x30] sm:$0xff] (!%p239_p9)  ;;  %v424_v1 = vld [vmem:[%s254_s12 + $0x18] sm:$0xff] (!%p239_p9) }
  0x2c   : > { %591 = vmatprep.subr.bf16.mxu0 %v590_v28  ;;  %595 = vmatprep.subr.bf16.mxu1 %v590_v28  ;;  %v428_v3 = vld [vmem:[%s254_s12 + $0x38] sm:$0xff]  ;;  %s585_s14 = sshll.u32 (%p711_p5), %s560_s18, 4 }
  0x2d   : > { %316 = vperm.xlu1 %625, %v298_v31   ;;  %306 = vperm.xlu0 %624, %v296_v32   ;;  %s454_s23 = scalar_lea.vmem (%p711_p5), %s801_s4, %s585_s14 }
  0x2f   : > { %593 = vmatpush1.bf16.msra.mxu0 %v592_v33  ;;  %597 = vmatpush1.bf16.msra.mxu1 %v592_v33 }
  0x32   : > { %574 = vmatmul.mubr.msk.f32.vlgmr.msra.gmra.mrb[0].mxu0 %vm319_vm0, %v283_v34  ;;  %576 = vmatmul.mubr.msk.f32.vlgmr.msra.gmra.mrb[0].mxu1 %vm319_vm0, %v285_v35 }
  0x33   : > { %402 = vmatprep.mubr.f32.mxu0 %v650_v16  ;;  %414 = vmatprep.mubr.f32.mxu1 %v650_v16 }
  0x36   : > { %575 = vmatmul.mubr.msk.f32.gmra.mrb[2].mxu0 %vm319_vm0, %v284_v36  ;;  %577 = vmatmul.mubr.msk.f32.gmra.mrb[2].mxu1 %vm319_vm0, %v286_v37 }
  0xa6   : > { %v312_v38 = vpop.permute.xlu1 %311  ;;  %v302_v39 = vpop.permute.xlu0 %301 }
  0xac   : > { %v317_v54 = vpop.permute.xlu1 %316  ;;  %v307_v55 = vpop.permute.xlu0 %306 }
 0x105   : > { %v398_v40 = vpop.f32.mrb[0].mxu0  ;;  %v410_v42 = vpop.f32.mrb[0].mxu1 }
 0x106   : > { %v399_v44 = vadd.f32 %v398_v40, %v302_v39  ;;  %v411_v45 = vadd.f32 %v410_v42, %v312_v38  ;;  %v400_v46 = vpop.f32.mrb[1].mxu0  ;;  %v412_v48 = vpop.f32.mrb[1].mxu1 }
 0x107   : > { %v401_v50 = vadd.f32 %v400_v46, %v302_v39  ;;  %v413_v51 = vadd.f32 %v412_v48, %v312_v38 }
 0x108   : > { %v429_v52 = vadd.f32 %v421_v41, %v399_v44  ;;  %v433_v53 = vadd.f32 %v425_v43, %v411_v45 }
 0x109   : > { %v430_v56 = vadd.f32 %v422_v47, %v401_v50  ;;  %v434_v57 = vadd.f32 %v426_v49, %v413_v51  ;;  %v404_v58 = vpop.f32.mrb[2].mxu0  ;;  %v416_v60 = vpop.f32.mrb[2].mxu1  ;;  %451 = sbr.rel (!%p711_p5) target bundleno = 281 (0x119), region = 86 }
 0x10a   : > { %437 = vst [vmem:[%s762_s13] sm:$0xff] %v429_v52  ;;  %441 = vst [vmem:[%s762_s13 + $0x20] sm:$0xff] %v433_v53  ;;  %v405_v62 = vadd.f32 %v404_v58, %v307_v55  ;;  %v417_v63 = vadd.f32 %v416_v60, %v317_v54  ;;  %v406_v0 = vpop.f32.mrb[3].mxu0  ;;  %v418_v2 = vpop.f32.mrb[3].mxu1 }
 0x10b   : > { %438 = vst [vmem:[%s762_s13 + $0x8] sm:$0xff] %v430_v56  ;;  %442 = vst [vmem:[%s762_s13 + $0x28] sm:$0xff] %v434_v57  ;;  %v407_v4 = vadd.f32 %v406_v0, %v307_v55  ;;  %v419_v5 = vadd.f32 %v418_v2, %v317_v54 }
 0x10c   : > { %v431_v6 = vadd.f32 %v423_v59, %v405_v62  ;;  %v435_v7 = vadd.f32 %v427_v61, %v417_v63 }
 0x10d   : > { %v432_v8 = vadd.f32 %v424_v1, %v407_v4  ;;  %v436_v9 = vadd.f32 %v428_v3, %v419_v5 }
 0x10e   : > { %439 = vst [vmem:[%s762_s13 + $0x10] sm:$0xff] %v431_v6  ;;  %443 = vst [vmem:[%s762_s13 + $0x30] sm:$0xff] %v435_v7 }
 0x10f   : > { %440 = vst [vmem:[%s762_s13 + $0x18] sm:$0xff] %v432_v8  ;;  %444 = vst [vmem:[%s762_s13 + $0x38] sm:$0xff] %v436_v9 }
 0x111   : > { %v467_v10 = vld [vmem:[%s762_s13] sm:$0xff] }
 0x112   : > { %v469_v11 = vld [vmem:[%s762_s13 + $0x8] sm:$0xff]  ;;  %v475_v14 = vld [vmem:[%s762_s13 + $0x20] sm:$0xff]  ;;  %468 = vst [vmem:[%s454_s23] sm:$0xff] %v467_v10 }
 0x113   : > { %v477_v15 = vld [vmem:[%s762_s13 + $0x28] sm:$0xff]  ;;  %470 = vst [vmem:[%s454_s23 + $0x8] sm:$0xff] %v469_v11  ;;  %476 = vst [vmem:[%s454_s23 + $0x40] sm:$0xff] %v475_v14 }
 0x114   : > { %478 = vst [vmem:[%s454_s23 + $0x48] sm:$0xff] %v477_v15 }
 0x115   : > { %v471_v12 = vld [vmem:[%s762_s13 + $0x10] sm:$0xff] }
 0x116   : > { %v473_v13 = vld [vmem:[%s762_s13 + $0x18] sm:$0xff]  ;;  %472 = vst [vmem:[%s454_s23 + $0x20] sm:$0xff] %v471_v12  ;;  %v479_v16 = vld [vmem:[%s762_s13 + $0x30] sm:$0xff] }
 0x117   : > { %474 = vst [vmem:[%s454_s23 + $0x28] sm:$0xff] %v473_v13  ;;  %v481_v17 = vld [vmem:[%s762_s13 + $0x38] sm:$0xff]  ;;  %480 = vst [vmem:[%s454_s23 + $0x60] sm:$0xff] %v479_v16 }
 0x118   : > { %482 = vst [vmem:[%s454_s23 + $0x68] sm:$0xff] %v481_v17 }
 0x119 PF: > { %p11_p10 = scmp.ge.s32.totalorder %s694_s19, 4   ;;  %s804_s15 = smov %s644_s16 }
 0x11a   : > { %s805_s16 = smov %s705_s22  ;;  %s806_s17 = smov %s694_s19 }
 0x11b   :  { %13 = sbr.rel (!%p11_p10) target bundleno = 2 (0x2), region = 148 }

// kernel: fno_forward.15
= control target key start
LH: loop header
LB: loop body
LE: loop exit
PB: predicated region body
PF: predicated region fallthrough
CT: control target
= control target key end

     0   :  { %s535_s0 = inlined_call_operand.vmem [shape: f32[32,512], index: 0, kind: input, shape index: {}]   ;;  %s536_s1 = inlined_call_operand.vmem [shape: f32[1,32], index: 1, kind: input, shape index: {}]   ;;  %s537_s2 = inlined_call_operand.<no memory space> [shape: f32[1,1], index: 2, kind: input, shape index: {}]   ;;  %s538_s3 = inlined_call_operand.vmem [shape: f32[1,512], index: 3, kind: output, shape index: {}]  }
   0x1   :  { %v8_v0 = vstv %s537_s2 }
   0x2   :  { %9 = vst [vmem:[#allocation2] sm:$0x1] %v8_v0 }
   0x3   :  { %s480_s14 = smov 0   ;;  %s482_s15 = smov 0  }
   0x4   :  { %s484_s16 = smov 0  }
   0x5 LB: > { %s380_s2 = sadd.s32 4294967295, %s452_s16   ;;  %s497_s17 = sadd.s32 1, %s452_s16   ;;  %s452_s16 = sphi %s484_s16, %s541_s16   ;;  %s448_s15 = sphi %s482_s15, %s540_s15   ;;  %s444_s14 = sphi %s480_s14, %s539_s14  }
   0x6   : > { %s19_s18 = ssub.s32 %s452_s16, %s497_s17  ;;  %s22_s19 = sadd.s32 1, %s448_s15 }
   0x7   : > { %p20_p0 = scmp.eq.s32.totalorder %s19_s18, 0  ;;  %p29_p1 = scmp.ne.s32.totalorder %s448_s15, %s444_s14 }
   0x8   : > { %p30_p2 = scmp.eq.s32.totalorder %s452_s16, 0  ;;  %p383_p4 = scmp.ge.s32.totalorder %s452_s16, 2 }
   0x9   : > { %s506_s20 = scalar_select %p20_p0, %s448_s15, %s22_s19  }
   0xa   : > { %p31_p3 = por %p30_p2, %p29_p1  ;;  %129 = sbr.rel (%p383_p4) target bundleno = 25 (0x19), region = 24 }
  0x11   : > { %132 = sbr.rel (!%p31_p3) target bundleno = 25 (0x19), region = 28  ;;  %s134_s21 = sand.u32 (%p31_p3), 1, %s448_s15  }
  0x12   : > { %s393_s22 = sshll.u32 (%p31_p3), %s452_s16, 4  ;;  %s384_s23 = sshll.u32 (%p31_p3), %s134_s21, 6 }
  0x13   : > { %s139_s26 = scalar_lea.vmem (%p31_p3), %s535_s0, %s393_s22  ;;  %s136_s27 = scalar_lea.vmem (%p31_p3), [#allocation3], %s384_s23 }
  0x14   : > { %v152_v1 = vld [vmem:[%s139_s26] sm:$0xff] (%p31_p3)  ;;  %v154_v2 = vld [vmem:[%s139_s26 + $0x8] sm:$0xff] (%p31_p3) }
  0x15   : > { %v156_v3 = vld [vmem:[%s139_s26 + $0x20] sm:$0xff] (%p31_p3)  ;;  %153 = vst [vmem:[%s136_s27] sm:$0xff] (%p31_p3), %v152_v1  ;;  %155 = vst [vmem:[%s136_s27 + $0x8] sm:$0xff] (%p31_p3), %v154_v2  ;;  %v158_v4 = vld [vmem:[%s139_s26 + $0x28] sm:$0xff] (%p31_p3) }
  0x16   : > { %157 = vst [vmem:[%s136_s27 + $0x10] sm:$0xff] (%p31_p3), %v156_v3  ;;  %v160_v5 = vld [vmem:[%s139_s26 + $0x40] sm:$0xff] (%p31_p3)  ;;  %v162_v6 = vld [vmem:[%s139_s26 + $0x48] sm:$0xff] (%p31_p3)  ;;  %159 = vst [vmem:[%s136_s27 + $0x18] sm:$0xff] (%p31_p3), %v158_v4 }
  0x17   : > { %161 = vst [vmem:[%s136_s27 + $0x20] sm:$0xff] (%p31_p3), %v160_v5  ;;  %163 = vst [vmem:[%s136_s27 + $0x28] sm:$0xff] (%p31_p3), %v162_v6  ;;  %v164_v7 = vld [vmem:[%s139_s26 + $0x60] sm:$0xff] (%p31_p3)  ;;  %v166_v8 = vld [vmem:[%s139_s26 + $0x68] sm:$0xff] (%p31_p3) }
  0x18   : > { %165 = vst [vmem:[%s136_s27 + $0x30] sm:$0xff] %v164_v7  ;;  %167 = vst [vmem:[%s136_s27 + $0x38] sm:$0xff] %v166_v8 }
  0x19 PF: > { %p387_p5 = scmp.ge.s32.totalorder %s452_s16, 1  ;;  %p172_p6 = scmp.lt.s32.totalorder %s452_s16, 3 }
  0x1b   : > { %p173_p7 = pnand %p387_p5, %p172_p6 }
  0x1c   : > { %s179_s28 = sand.u32 (!%p173_p7), 1, %s444_s14   ;;  %v454_v9 = vmov (!%p173_p7), 0.0   ;;  %v455_v10 = vmov (!%p173_p7), 0   ;;  %v216_v11 = vld [vmem:[#allocation2] sm:$0x1] (!%p173_p7)  ;;  %vm226_vm0 = vcmask (!%p173_p7), 261120   ;;  %v222_v25 = vlaneseq (!%p173_p7) }
  0x1d   : > { %176 = sbr.rel (%p173_p7) target bundleno = 264 (0x108), region = 51  ;;  %s388_s29 = sshll.u32 (!%p173_p7), %s179_s28, 6  ;;  %294 = vmatprep.mubr.f32.mxu0 (!%p173_p7), %v454_v9  ;;  %429 = vset.pattern.permute.xlu0 (!%p173_p7), %v455_v10  ;;  %v207_v24 = vld [vmem:[%s536_s1] sm:$0x1] (!%p173_p7)  ;;  %v456_v29 = vmov (!%p173_p7), 1966171168  }
  0x1e   : > { %219 = vperm.xlu0 (!%p173_p7), %429, %v216_v11   ;;  %s181_s30 = scalar_lea.vmem (!%p173_p7), [#allocation3], %s388_s29  ;;  %v223_v26 = vshrl.u32 (!%p173_p7), %v222_v25, 7  ;;  %v305_v30 = vunpack.c.l.s4 (!%p173_p7), %v456_v29  ;;  %s389_s6 = sshll.u32 (!%p173_p7), %s380_s2, 1  ;;  %vm321_vm1 = vcmp.lt.s32.totalorder (!%p173_p7), %v222_v25, 256 }
  0x1f   : > { %v209_v12 = vld [vmem:[%s181_s30 + $0x8] sm:$0xff] (!%p173_p7)  ;;  %v211_v13 = vld [vmem:[%s181_s30 + $0x18] sm:$0xff] (!%p173_p7)  ;;  %v208_v14 = vld [vmem:[%s181_s30] sm:$0xff] (!%p173_p7)  ;;  %p203_p8 = scmp.lt.s32.totalorder (!%p173_p7), %s389_s6, 3 }
  0x20   : > { %v394_v15 = vpack.c.bf16 (!%p173_p7), %v211_v13, %v209_v12  ;;  %v210_v16 = vld [vmem:[%s181_s30 + $0x10] sm:$0xff] (!%p173_p7)  ;;  %v213_v17 = vld [vmem:[%s181_s30 + $0x28] sm:$0xff] (!%p173_p7)  ;;  %v215_v18 = vld [vmem:[%s181_s30 + $0x38] sm:$0xff] (!%p173_p7)  ;;  %v224_v27 = vsub.s32 (!%p173_p7), 0, %v223_v26  ;;  %v306_v32 = vunpack.c.0.s8 (!%p173_p7), %v305_v30 }
  0x21   : > { %v396_v19 = vpack.c.bf16 (!%p173_p7), %v210_v16, %v208_v14  ;;  %v398_v20 = vpack.c.bf16 (!%p173_p7), %v215_v18, %v213_v17  ;;  %v212_v21 = vld [vmem:[%s181_s30 + $0x20] sm:$0xff] (!%p173_p7)  ;;  %v214_v22 = vld [vmem:[%s181_s30 + $0x30] sm:$0xff] (!%p173_p7) }
  0x22   : > { %395 = vmatprep.subr.bf16.mxu0 (!%p173_p7), %v394_v15  ;;  %v400_v23 = vpack.c.bf16 (!%p173_p7), %v214_v22, %v212_v21  ;;  %v309_v37 = vsub.s32 (!%p173_p7), %v306_v32, %v223_v26 }
  0x23   : > { %397 = vmatpush1.bf16.msra.mxu0 (!%p173_p7), %v396_v19 }
  0x24   : > { %399 = vmatprep.subr.bf16.mxu0 %v398_v20  ;;  %s543_s6 = smov (!%p203_p8, %s389_s6), 3 }
  0x25   : > { %s205_s9 = scalar_lea.vmem %s538_s3, %s543_s6 }
  0x27   : > { %401 = vmatpush1.bf16.msra.mxu0 %v400_v23 }
  0x2a   : > { %390 = vmatmul.mubr.msk.f32.vlgmr.msra.gmra.mrb[0].mxu0 %vm226_vm0, %v207_v24 }
  0x9d   : > { %v220_v28 = vpop.permute.xlu0 %219 }
  0x9e   : > { %v225_v31 = vrot.slane %v220_v28, %v224_v27 }
  0xfd   : > { %v296_v33 = vpop.f32.mrb[0].mxu0 }
  0xfe   : > { %v297_v34 = vadd.f32 %v296_v33, %v225_v31  ;;  %v298_v35 = vpop.f32.mrb[1].mxu0 }
  0xff   : > { %v299_v36 = vadd.f32 %v298_v35, %v225_v31 }
 0x101   : > { %v303_v38 = vcombine.low %v297_v34, %v299_v36 }
 0x103   : > { %v310_v39 = vrot.slane %v303_v38, %v309_v37 }
 0x105   : > { %v317_v40 = vrot.slane %v310_v39, %v309_v37 }
 0x107   : > { %323 = vst.msk [vmem:[%s205_s9] sm:$0x3] %vm321_vm1, %v317_v40 }
 0x108 PF: > { %p12_p9 = scmp.ge.s32.totalorder %s497_s17, 4   ;;  %s539_s14 = smov %s448_s15 }
 0x109   : > { %s540_s15 = smov %s506_s20  ;;  %s541_s16 = smov %s497_s17 }
 0x10a   :  { %14 = sbr.rel (!%p12_p9) target bundleno = 5 (0x5), region = 90 }

</bundles_post_ra>
